<compile_context>
chip_gen: v7x
topology: tpu7x:2x2x1
jax: 0.10.0
libtpu: 0.0.40
codegen_flags: <defaults>
</compile_context>

<pallas_src>
import functools

import jax
import jax.numpy as jnp
from jax.experimental import pallas as pl
from jax.experimental.pallas import tpu as pltpu

_MXU_DTYPE = jnp.bfloat16   # MXU matmul input dtype (f32 accumulation everywhere)


# ----------------------------- shared math helpers ---------------------------------


def _layernorm(x, g, b, eps=1e-5):
    mu = jnp.mean(x, axis=-1, keepdims=True)
    xc = x - mu
    var = jnp.mean(xc * xc, axis=-1, keepdims=True)
    return xc * jax.lax.rsqrt(var + eps) * g + b


def _softmax(s, approx_recip):
    m = jnp.max(s, axis=-1, keepdims=True)
    e = jnp.exp(s - m)
    denom = jnp.sum(e, axis=-1, keepdims=True)
    if approx_recip:
        return e * pl.reciprocal(denom, approx=True)   # EUP slot, in-kernel only
    return e / denom


def _mm(a, w):
    """2-D matmul with bf16 MXU inputs, f32 accumulation."""
    return jnp.dot(a.astype(_MXU_DTYPE), w.astype(_MXU_DTYPE),
                   preferred_element_type=jnp.float32)


def _bmm(a, b, dims):
    """Batched matmul (single batch dim) with bf16 MXU inputs, f32 accumulation."""
    return jax.lax.dot_general(a.astype(_MXU_DTYPE), b.astype(_MXU_DTYPE), dims,
                               preferred_element_type=jnp.float32)


# --------------------------- kernel-side attention core ------------------------------


def _attn_core(q, k, v, B, Tq, Tk, nhead, mask_b, out_w, out_b, attn_sc):
    """q/k/v: (B*T, E) f32 (q already pre-scaled by 1/sqrt(dh) via the weights).

    mask_b: additive (B, Tq, Tk) or None.  out_w: (E, E) bf16, out_b: (1, E) f32.
    attn_sc: (B*Tq, E) bf16 VMEM scratch used to concatenate head outputs so the
    output projection is a single K=E matmul.  Returns (B*Tq, E) f32.
    """
    E = q.shape[-1]
    dh = E // nhead
    for h in range(nhead):                       # static head loop
        qh = q[:, h * dh:(h + 1) * dh].reshape(B, Tq, dh)
        kh = k[:, h * dh:(h + 1) * dh].reshape(B, Tk, dh)
        vh = v[:, h * dh:(h + 1) * dh].reshape(B, Tk, dh)
        s = _bmm(qh, kh, (((2,), (2,)), ((0,), (0,))))          # (B, Tq, Tk)
        if mask_b is not None:                                  # broadcast hoisted out
            s = s + mask_b
        p = _softmax(s, approx_recip=True)
        oh = _bmm(p, vh, (((2,), (1,)), ((0,), (0,))))          # (B, Tq, dh)
        attn_sc[:, h * dh:(h + 1) * dh] = oh.reshape(B * Tq, dh).astype(_MXU_DTYPE)
    return _mm(attn_sc[...], out_w) + out_b                     # one K=E out-projection


# --------------------------------- Pallas kernel ------------------------------------


def _fused_decoder_kernel(*refs, nhead, B, T, S, E, use_mmask, has_final_norm):
    tgt_ref, mem_ref, tmask_ref = refs[0:3]
    if use_mmask:
        mmask_ref, rest = refs[3], refs[4:]
    else:
        mmask_ref, rest = None, refs[3:]
    (sa_in_w_ref, sa_in_b_ref, sa_out_w_ref, sa_out_b_ref,
     ca_in_w_ref, ca_in_b_ref, ca_out_w_ref, ca_out_b_ref,
     w1_ref, b1_ref, w2_ref, b2_ref, ln_g_ref, ln_b_ref,
     fn_g_ref, fn_b_ref, x_ref, attn_sc) = rest

    layer = pl.program_id(0)

    @pl.when(layer == 0)
    def _():
        x_ref[...] = tgt_ref[...]               # seed resident activations from tgt

    x = x_ref[...]                              # (B*T, E) f32, resident output block
    mem_bf = mem_ref[...]                       # (B*S, E) bf16 (cast once on host)
    tmask_b = jnp.broadcast_to(tmask_ref[...][None], (B, T, T))      # hoisted broadcast
    mmask_b = (jnp.broadcast_to(mmask_ref[...][None], (B, T, S))
               if use_mmask else None)
    ln_g = ln_g_ref[0]                          # (3, E)
    ln_b = ln_b_ref[0]

    # ----- self-attention block (fused QKV projection, scale folded into Wq) -----
    qkv = _mm(x, sa_in_w_ref[0]) + sa_in_b_ref[0]                    # (B*T, 3E)
    sa = _attn_core(qkv[:, 0:E], qkv[:, E:2 * E], qkv[:, 2 * E:3 * E],
                    B, T, T, nhead, tmask_b, sa_out_w_ref[0], sa_out_b_ref[0], attn_sc)
    x = _layernorm(x + sa, ln_g[0:1, :], ln_b[0:1, :])

    # ----- cross-attention block (fused KV projection on memory) -----
    q = _mm(x, ca_in_w_ref[0][:, 0:E]) + ca_in_b_ref[0][:, 0:E]      # (B*T, E)
    kv = _mm(mem_bf, ca_in_w_ref[0][:, E:3 * E]) + ca_in_b_ref[0][:, E:3 * E]
    ca = _attn_core(q, kv[:, 0:E], kv[:, E:2 * E],
                    B, T, S, nhead, mmask_b, ca_out_w_ref[0], ca_out_b_ref[0], attn_sc)
    x = _layernorm(x + ca, ln_g[1:2, :], ln_b[1:2, :])

    # ----- feed-forward block (ReLU) -----
    h = jnp.maximum(_mm(x, w1_ref[0]) + b1_ref[0], 0.0)
    ff = _mm(h, w2_ref[0]) + b2_ref[0]
    x = _layernorm(x + ff, ln_g[2:3, :], ln_b[2:3, :])

    x_ref[...] = x                              # carry to next layer (resident)

    @pl.when(layer == pl.num_programs(0) - 1)
    def _():
        if has_final_norm:
            x_ref[...] = _layernorm(x, fn_g_ref[...], fn_b_ref[...])


# ------------------------------------ wrapper ----------------------------------------


def _vmem_limit_bytes(B, T, S, E, dff, use_mmask):
    """Explicit scoped-VMEM budget: 2x residents + 2x per-layer weights + temporaries."""
    f32, bf = 4, 2
    resident = (B * T * E * f32                       # tgt rows
                + B * S * E * bf                      # memory rows (bf16)
                + T * T * f32                         # tgt_mask
                + (T * S * f32 if use_mmask else 0)   # memory_mask
                + 2 * E * f32                         # final-norm g/b
                + B * T * E * f32                     # resident output (activations)
                + B * T * E * bf)                     # head-concat scratch
    per_layer = (2 * (E * 3 * E) * bf + 2 * (3 * E) * f32   # self/cross in_proj w+b
                 + 2 * (E * E) * bf + 2 * E * f32           # self/cross out_proj w+b
                 + 2 * (E * dff) * bf + (dff + E) * f32     # ffn w1/b1, w2/b2
                 + 6 * E * f32)                             # 3x LayerNorm g/b
    temporaries = (B * T * 3 * E + 2 * B * max(T, S) * E
                   + 2 * B * T * max(T, S) + B * T * dff) * f32
    budget = 2 * resident + 2 * per_layer + temporaries + (2 << 20)
    budget = max(budget, 32 << 20)                    # never below the scoped defaults
    try:
        cap = int(pltpu.get_tpu_info().vmem_capacity_bytes * 0.9)
    except Exception:                                 # pragma: no cover
        cap = 56 << 20                                # safe even on v7x (64 MiB physical)
    return int(min(budget, cap))


def transformer_decoder(tgt, memory, params, final_norm, tgt_mask=None,
                        memory_mask=None, nhead=4):
    """tgt: (T, B, E), memory: (S, B, E) (PyTorch seq-first). Returns (T, B, E)."""
    T, B, E = tgt.shape
    S = memory.shape[0]
    L = len(params)
    dh = E // nhead
    scale = 1.0 / (dh ** 0.5)

    x_rows = jnp.transpose(tgt, (1, 0, 2)).reshape(B * T, E).astype(jnp.float32)
    mem_rows = jnp.transpose(memory, (1, 0, 2)).reshape(B * S, E).astype(_MXU_DTYPE)

    tmask = (jnp.zeros((T, T), jnp.float32) if tgt_mask is None
             else tgt_mask.astype(jnp.float32))
    use_mmask = memory_mask is not None
    mmask = None if memory_mask is None else memory_mask.astype(jnp.float32)

    # fold 1/sqrt(dh) into the Q columns of in_proj (host-side, free)
    qkv_scale = jnp.concatenate(
        [jnp.full((E,), scale, jnp.float32), jnp.ones((2 * E,), jnp.float32)])

    def stack(name, dtype=None, fold_q_scale=False):
        a = jnp.stack([p[name] for p in params], axis=0)
        if fold_q_scale:
            a = a * qkv_scale
        return a.astype(dtype) if dtype is not None else a

    bf = _MXU_DTYPE
    weights = [
        stack("sa_in_w", bf, fold_q_scale=True), stack("sa_in_b", None, fold_q_scale=True),
        stack("sa_out_w", bf), stack("sa_out_b"),
        stack("ca_in_w", bf, fold_q_scale=True), stack("ca_in_b", None, fold_q_scale=True),
        stack("ca_out_w", bf), stack("ca_out_b"),
        stack("w1", bf), stack("b1"), stack("w2", bf), stack("b2"),
        stack("ln_g"), stack("ln_b"),
    ]

    has_final_norm = final_norm is not None
    fn_g = final_norm["g"] if has_final_norm else jnp.ones((1, E), jnp.float32)
    fn_b = final_norm["b"] if has_final_norm else jnp.zeros((1, E), jnp.float32)

    in_specs = [
        pl.BlockSpec((B * T, E), lambda l: (0, 0)),     # tgt rows: DMA'd once, resident
        pl.BlockSpec((B * S, E), lambda l: (0, 0)),     # memory rows (bf16): resident
        pl.BlockSpec((T, T), lambda l: (0, 0)),         # tgt_mask (un-broadcast)
    ]
    operands = [x_rows, mem_rows, tmask]
    if use_mmask:                                       # only DMA the mask if it exists
        in_specs.append(pl.BlockSpec((T, S), lambda l: (0, 0)))
        operands.append(mmask)
    # per-layer weights: streamed along the layer grid axis (double-buffered)
    in_specs += [pl.BlockSpec((1,) + w.shape[1:], lambda l: (l, 0, 0)) for w in weights]
    in_specs += [pl.BlockSpec((1, E), lambda l: (0, 0)),
                 pl.BlockSpec((1, E), lambda l: (0, 0))]
    operands += weights + [fn_g, fn_b]

    kernel = functools.partial(
        _fused_decoder_kernel, nhead=nhead, B=B, T=T, S=S, E=E,
        use_mmask=use_mmask, has_final_norm=has_final_norm)

    out = pl.pallas_call(
        kernel,
        out_shape=jax.ShapeDtypeStruct((B * T, E), jnp.float32),
        grid=(L,),
        in_specs=in_specs,
        out_specs=pl.BlockSpec((B * T, E), lambda l: (0, 0)),   # resident activations
        scratch_shapes=[pltpu.VMEM((B * T, E), _MXU_DTYPE)],    # head-concat scratch
        compiler_params=pltpu.CompilerParams(
            dimension_semantics=("arbitrary",),
            vmem_limit_bytes=_vmem_limit_bytes(B, T, S, E,
                                               params[0]["w1"].shape[1], use_mmask)),
    )(*operands)
    return jnp.transpose(out.reshape(B, T, E), (1, 0, 2))


# ------------------------------ deterministic params ---------------------------------


def init_params(key, num_layers, E, dff):
    params = []
    for _ in range(num_layers):
        key, *ks = jax.random.split(key, 15)
        n = lambda k, shape, s=0.1: (s * jax.random.normal(k, shape, dtype=jnp.float32))
        layer = dict(
            sa_in_w=n(ks[0], (E, 3 * E)), sa_in_b=n(ks[1], (1, 3 * E)),
            sa_out_w=n(ks[2], (E, E)), sa_out_b=n(ks[3], (1, E)),
            ca_in_w=n(ks[4], (E, 3 * E)), ca_in_b=n(ks[5], (1, 3 * E)),
            ca_out_w=n(ks[6], (E, E)), ca_out_b=n(ks[7], (1, E)),
            w1=n(ks[8], (E, dff)), b1=n(ks[9], (1, dff)),
            w2=n(ks[10], (dff, E)), b2=n(ks[11], (1, E)),
            ln_g=1.0 + n(ks[12], (3, E), 0.05), ln_b=n(ks[13], (3, E), 0.05),
        )
        params.append(layer)
    key, k1, k2 = jax.random.split(key, 3)
    final_norm = dict(g=1.0 + 0.05 * jax.random.normal(k1, (1, E), dtype=jnp.float32),
                      b=0.05 * jax.random.normal(k2, (1, E), dtype=jnp.float32))
    return params, final_norm


# ------------------------------- pure-JAX reference ----------------------------------


def _mha_ref(q_in, kv_in, B, Tq, Tk, in_w, in_b, out_w, out_b, mask, nhead):
    """Reference MHA (unscaled weights, explicit score scaling, exact softmax divide,
    same bf16-MXU / f32-accumulation policy)."""
    E = q_in.shape[-1]
    dh = E // nhead
    scale = 1.0 / (dh ** 0.5)
    q = _mm(q_in, in_w[:, 0 * E:1 * E]) + in_b[:, 0 * E:1 * E]
    k = _mm(kv_in, in_w[:, 1 * E:2 * E]) + in_b[:, 1 * E:2 * E]
    v = _mm(kv_in, in_w[:, 2 * E:3 * E]) + in_b[:, 2 * E:3 * E]
    acc = None
    for h in range(nhead):
        qh = q[:, h * dh:(h + 1) * dh].reshape(B, Tq, dh)
        kh = k[:, h * dh:(h + 1) * dh].reshape(B, Tk, dh)
        vh = v[:, h * dh:(h + 1) * dh].reshape(B, Tk, dh)
        s = _bmm(qh, kh, (((2,), (2,)), ((0,), (0,)))) * scale
        if mask is not None:
            s = s + mask[None]
        p = _softmax(s, approx_recip=False)
        oh = _bmm(p, vh, (((2,), (1,)), ((0,), (0,))))
        ph = _mm(oh.reshape(B * Tq, dh), out_w[h * dh:(h + 1) * dh, :])
        acc = ph if acc is None else acc + ph
    return acc + out_b


def reference_forward(tgt, memory, params, final_norm, tgt_mask, memory_mask, nhead):
    T, B, E = tgt.shape
    S = memory.shape[0]
    x = jnp.transpose(tgt, (1, 0, 2)).reshape(B * T, E).astype(jnp.float32)
    mem = jnp.transpose(memory, (1, 0, 2)).reshape(B * S, E).astype(jnp.float32)
    tmask = (jnp.zeros((T, T), jnp.float32) if tgt_mask is None
             else tgt_mask.astype(jnp.float32))
    mmask = None if memory_mask is None else memory_mask.astype(jnp.float32)
    for p in params:
        sa = _mha_ref(x, x, B, T, T, p["sa_in_w"], p["sa_in_b"], p["sa_out_w"],
                      p["sa_out_b"], tmask, nhead)
        x = _layernorm(x + sa, p["ln_g"][0:1], p["ln_b"][0:1])
        ca = _mha_ref(x, mem, B, T, S, p["ca_in_w"], p["ca_in_b"], p["ca_out_w"],
                      p["ca_out_b"], mmask, nhead)
        x = _layernorm(x + ca, p["ln_g"][1:2], p["ln_b"][1:2])
        h = jnp.maximum(_mm(x, p["w1"]) + p["b1"], 0.0)
        x = _layernorm(x + _mm(h, p["w2"]) + p["b2"], p["ln_g"][2:3], p["ln_b"][2:3])
    if final_norm is not None:
        x = _layernorm(x, final_norm["g"], final_norm["b"])
    return jnp.transpose(x.reshape(B, T, E), (1, 0, 2))


# --------------------------------------- main -----------------------------------------


if __name__ == "__main__":
    T, S, B, E = 8, 16, 2, 32          # tgt len, memory len, batch, d_model
    NHEAD, DFF, NLAYERS = 4, 64, 2
    # NOTE: production configs should keep E (and head dim) multiples of 128 for
    # lane-dense vregs / unmasked stores; the toy demo is intentionally tiny.

    key = jax.random.PRNGKey(0)
    k_tgt, k_mem, k_par = jax.random.split(key, 3)
    tgt = jax.random.normal(k_tgt, (T, B, E), dtype=jnp.float32)       # (seq, batch, d_model)
    memory = jax.random.normal(k_mem, (S, B, E), dtype=jnp.float32)    # (seq, batch, d_model)
    params, final_norm = init_params(k_par, NLAYERS, E, DFF)

    # causal tgt_mask (additive, -inf above diagonal), memory_mask = None
    rows = jnp.arange(T)
    tgt_mask = jnp.where(rows[None, :] > rows[:, None], -jnp.inf, 0.0).astype(jnp.float32)

    out = transformer_decoder(tgt, memory, params, final_norm,
                              tgt_mask=tgt_mask, memory_mask=None, nhead=NHEAD)
    out = jax.block_until_ready(out)

    ref = jax.block_until_ready(
        reference_forward(tgt, memory, params, final_norm, tgt_mask, None, NHEAD))
    assert out.shape == (T, B, E)
    assert jnp.all(jnp.isfinite(out))
    err = float(jnp.max(jnp.abs(out - ref)))
    # tolerance covers approx-reciprocal, bf16 MXU rounding and the host-side
    # bf16 rounding of the scale-folded Q projection weights
    assert err < 3e-2, err

    print("KERNEL_OK")
</pallas_src>

<mosaic_0001>
module attributes {stable_mosaic.version = 11 : i64} {
  func.func @_fused_decoder_kernel(%arg0: i32, %arg1: memref<16x32xf32, #tpu.memory_space<vmem>>, %arg2: memref<32x32xbf16, #tpu.memory_space<vmem>>, %arg3: memref<8x8xf32, #tpu.memory_space<vmem>>, %arg4: memref<1x32x96xbf16, #tpu.memory_space<vmem>>, %arg5: memref<1x1x96xf32, #tpu.memory_space<vmem>>, %arg6: memref<1x32x32xbf16, #tpu.memory_space<vmem>>, %arg7: memref<1x1x32xf32, #tpu.memory_space<vmem>>, %arg8: memref<1x32x96xbf16, #tpu.memory_space<vmem>>, %arg9: memref<1x1x96xf32, #tpu.memory_space<vmem>>, %arg10: memref<1x32x32xbf16, #tpu.memory_space<vmem>>, %arg11: memref<1x1x32xf32, #tpu.memory_space<vmem>>, %arg12: memref<1x32x64xbf16, #tpu.memory_space<vmem>>, %arg13: memref<1x1x64xf32, #tpu.memory_space<vmem>>, %arg14: memref<1x64x32xbf16, #tpu.memory_space<vmem>>, %arg15: memref<1x1x32xf32, #tpu.memory_space<vmem>>, %arg16: memref<1x3x32xf32, #tpu.memory_space<vmem>>, %arg17: memref<1x3x32xf32, #tpu.memory_space<vmem>>, %arg18: memref<1x32xf32, #tpu.memory_space<vmem>>, %arg19: memref<1x32xf32, #tpu.memory_space<vmem>>, %arg20: memref<16x32xf32, #tpu.memory_space<vmem>>, %arg21: memref<16x32xbf16, #tpu.memory_space<vmem>>) attributes {dimension_semantics = [#tpu.dimension_semantics<arbitrary>], iteration_bounds = array<i64: 2>, scalar_prefetch = 0 : i64, scratch_operands = 1 : i64, tpu.core_type = #tpu.core_type<tc>, window_params = [{pipeline_mode = #tpu.pipeline_mode<synchronous>, transform_indices = @transform_0, window_bounds = array<i64: 16, 32>}, {pipeline_mode = #tpu.pipeline_mode<synchronous>, transform_indices = @transform_1, window_bounds = array<i64: 32, 32>}, {pipeline_mode = #tpu.pipeline_mode<synchronous>, transform_indices = @transform_2, window_bounds = array<i64: 8, 8>}, {transform_indices = @transform_3, window_bounds = array<i64: 1, 32, 96>}, {transform_indices = @transform_4, window_bounds = array<i64: 1, 1, 96>}, {transform_indices = @transform_5, window_bounds = array<i64: 1, 32, 32>}, {transform_indices = @transform_6, window_bounds = array<i64: 1, 1, 32>}, {transform_indices = @transform_7, window_bounds = array<i64: 1, 32, 96>}, {transform_indices = @transform_8, window_bounds = array<i64: 1, 1, 96>}, {transform_indices = @transform_9, window_bounds = array<i64: 1, 32, 32>}, {transform_indices = @transform_10, window_bounds = array<i64: 1, 1, 32>}, {transform_indices = @transform_11, window_bounds = array<i64: 1, 32, 64>}, {transform_indices = @transform_12, window_bounds = array<i64: 1, 1, 64>}, {transform_indices = @transform_13, window_bounds = array<i64: 1, 64, 32>}, {transform_indices = @transform_14, window_bounds = array<i64: 1, 1, 32>}, {transform_indices = @transform_15, window_bounds = array<i64: 1, 3, 32>}, {transform_indices = @transform_16, window_bounds = array<i64: 1, 3, 32>}, {pipeline_mode = #tpu.pipeline_mode<synchronous>, transform_indices = @transform_17, window_bounds = array<i64: 1, 32>}, {pipeline_mode = #tpu.pipeline_mode<synchronous>, transform_indices = @transform_18, window_bounds = array<i64: 1, 32>}, {pipeline_mode = #tpu.pipeline_mode<synchronous>, transform_indices = @transform_19, window_bounds = array<i64: 16, 32>}]} {
    %c0_i32 = arith.constant 0 : i32
    %0 = arith.cmpi eq, %arg0, %c0_i32 : i32
    %1 = arith.extui %0 : i1 to i32
    %c0_i32_0 = arith.constant 0 : i32
    %2 = arith.cmpi ne, %1, %c0_i32_0 : i32
    scf.if %2 {
      %c0_128 = arith.constant 0 : index
      %c0_129 = arith.constant 0 : index
      %356 = vector.load %arg1[%c0_128, %c0_129] : memref<16x32xf32, #tpu.memory_space<vmem>>, vector<16x32xf32>
      %c0_130 = arith.constant 0 : index
      %c0_131 = arith.constant 0 : index
      %357 = vector.load %arg20[%c0_130, %c0_131] : memref<16x32xf32, #tpu.memory_space<vmem>>, vector<16x32xf32>
      tpu.vector_store %arg20[%c0_130, %c0_131], %356 {strides = array<i32>} : memref<16x32xf32, #tpu.memory_space<vmem>>, vector<16x32xf32>,
    } else {
    }
    %c0 = arith.constant 0 : index
    %c0_1 = arith.constant 0 : index
    %3 = vector.load %arg20[%c0, %c0_1] : memref<16x32xf32, #tpu.memory_space<vmem>>, vector<16x32xf32>
    %c0_2 = arith.constant 0 : index
    %c0_3 = arith.constant 0 : index
    %4 = vector.load %arg2[%c0_2, %c0_3] : memref<32x32xbf16, #tpu.memory_space<vmem>>, vector<32x32xbf16>
    %c0_4 = arith.constant 0 : index
    %c0_5 = arith.constant 0 : index
    %5 = vector.load %arg3[%c0_4, %c0_5] : memref<8x8xf32, #tpu.memory_space<vmem>>, vector<8x8xf32>
    %6 = vector.shape_cast %5 : vector<8x8xf32> to vector<1x8x8xf32>
    %7 = vector.shape_cast %6 : vector<1x8x8xf32> to vector<1x8x8xf32>
    %8 = vector.broadcast %7 : vector<1x8x8xf32> to vector<2x8x8xf32>
    %c0_6 = arith.constant 0 : index
    %c0_7 = arith.constant 0 : index
    %c0_8 = arith.constant 0 : index
    %9 = vector.load %arg16[%c0_6, %c0_7, %c0_8] : memref<1x3x32xf32, #tpu.memory_space<vmem>>, vector<1x3x32xf32>
    %10 = vector.shape_cast %9 : vector<1x3x32xf32> to vector<3x32xf32>
    %c0_9 = arith.constant 0 : index
    %c0_10 = arith.constant 0 : index
    %c0_11 = arith.constant 0 : index
    %11 = vector.load %arg17[%c0_9, %c0_10, %c0_11] : memref<1x3x32xf32, #tpu.memory_space<vmem>>, vector<1x3x32xf32>
    %12 = vector.shape_cast %11 : vector<1x3x32xf32> to vector<3x32xf32>
    %c0_12 = arith.constant 0 : index
    %c0_13 = arith.constant 0 : index
    %c0_14 = arith.constant 0 : index
    %13 = vector.load %arg4[%c0_12, %c0_13, %c0_14] : memref<1x32x96xbf16, #tpu.memory_space<vmem>>, vector<1x32x96xbf16>
    %14 = vector.shape_cast %13 : vector<1x32x96xbf16> to vector<32x96xbf16>
    %15 = arith.truncf %3 : vector<16x32xf32> to vector<16x32xbf16>
    %cst = arith.constant dense<0.000000e+00> : vector<16x96xf32>
    %16 = tpu.matmul %15, %14, %cst {dimension_numbers = #tpu.dot_dimension_numbers<[1], [0], [0], [1], [0, 0, 1, 1], [], []>} : vector<16x32xbf16>, vector<32x96xbf16>, vector<16x96xf32> -> vector<16x96xf32>
    %c0_15 = arith.constant 0 : index
    %c0_16 = arith.constant 0 : index
    %c0_17 = arith.constant 0 : index
    %17 = vector.load %arg5[%c0_15, %c0_16, %c0_17] : memref<1x1x96xf32, #tpu.memory_space<vmem>>, vector<1x1x96xf32>
    %18 = vector.shape_cast %17 : vector<1x1x96xf32> to vector<1x96xf32>
    %19 = vector.broadcast %18 : vector<1x96xf32> to vector<16x96xf32>
    %20 = arith.addf %16, %19 : vector<16x96xf32>
    %21 = vector.extract_strided_slice %20 {offsets = [0, 0], sizes = [16, 32], strides = [1, 1]} : vector<16x96xf32> to vector<16x32xf32>
    %22 = vector.extract_strided_slice %20 {offsets = [0, 32], sizes = [16, 32], strides = [1, 1]} : vector<16x96xf32> to vector<16x32xf32>
    %23 = vector.extract_strided_slice %20 {offsets = [0, 64], sizes = [16, 32], strides = [1, 1]} : vector<16x96xf32> to vector<16x32xf32>
    %c0_18 = arith.constant 0 : index
    %c0_19 = arith.constant 0 : index
    %c0_20 = arith.constant 0 : index
    %24 = vector.load %arg6[%c0_18, %c0_19, %c0_20] : memref<1x32x32xbf16, #tpu.memory_space<vmem>>, vector<1x32x32xbf16>
    %25 = vector.shape_cast %24 : vector<1x32x32xbf16> to vector<32x32xbf16>
    %c0_21 = arith.constant 0 : index
    %c0_22 = arith.constant 0 : index
    %c0_23 = arith.constant 0 : index
    %26 = vector.load %arg7[%c0_21, %c0_22, %c0_23] : memref<1x1x32xf32, #tpu.memory_space<vmem>>, vector<1x1x32xf32>
    %27 = vector.shape_cast %26 : vector<1x1x32xf32> to vector<1x32xf32>
    %28 = vector.extract_strided_slice %21 {offsets = [0, 0], sizes = [16, 8], strides = [1, 1]} : vector<16x32xf32> to vector<16x8xf32>
    %29 = vector.shape_cast %28 : vector<16x8xf32> to vector<2x8x8xf32>
    %30 = vector.extract_strided_slice %22 {offsets = [0, 0], sizes = [16, 8], strides = [1, 1]} : vector<16x32xf32> to vector<16x8xf32>
    %31 = vector.shape_cast %30 : vector<16x8xf32> to vector<2x8x8xf32>
    %32 = vector.extract_strided_slice %23 {offsets = [0, 0], sizes = [16, 8], strides = [1, 1]} : vector<16x32xf32> to vector<16x8xf32>
    %33 = vector.shape_cast %32 : vector<16x8xf32> to vector<2x8x8xf32>
    %34 = arith.truncf %29 : vector<2x8x8xf32> to vector<2x8x8xbf16>
    %35 = arith.truncf %31 : vector<2x8x8xf32> to vector<2x8x8xbf16>
    %cst_24 = arith.constant dense<0.000000e+00> : vector<2x8x8xf32>
    %36 = tpu.matmul %34, %35, %cst_24 {dimension_numbers = #tpu.dot_dimension_numbers<[2], [2], [1], [1], [0, 0, 0, 1, 1, 1], [0], [0]>} : vector<2x8x8xbf16>, vector<2x8x8xbf16>, vector<2x8x8xf32> -> vector<2x8x8xf32>
    %37 = arith.addf %36, %8 : vector<2x8x8xf32>
    %cst_25 = arith.constant dense<0xFF800000> : vector<2x8xf32>
    %38 = vector.multi_reduction <maximumf>, %37, %cst_25 [2] : vector<2x8x8xf32> to vector<2x8xf32>
    %39 = vector.shape_cast %38 : vector<2x8xf32> to vector<2x8x1xf32>
    %40 = vector.broadcast %39 : vector<2x8x1xf32> to vector<2x8x8xf32>
    %41 = arith.subf %37, %40 : vector<2x8x8xf32>
    %42 = math.exp %41 : vector<2x8x8xf32>
    %cst_26 = arith.constant dense<0.000000e+00> : vector<2x8xf32>
    %43 = vector.multi_reduction <add>, %42, %cst_26 [2] : vector<2x8x8xf32> to vector<2x8xf32>
    %44 = vector.shape_cast %43 : vector<2x8xf32> to vector<2x8x1xf32>
    %45 = tpu.reciprocal %44 {approx = true} : vector<2x8x1xf32> -> vector<2x8x1xf32>
    %46 = vector.broadcast %45 : vector<2x8x1xf32> to vector<2x8x8xf32>
    %47 = arith.mulf %42, %46 : vector<2x8x8xf32>
    %48 = arith.truncf %47 : vector<2x8x8xf32> to vector<2x8x8xbf16>
    %49 = arith.truncf %33 : vector<2x8x8xf32> to vector<2x8x8xbf16>
    %cst_27 = arith.constant dense<0.000000e+00> : vector<2x8x8xf32>
    %50 = tpu.matmul %48, %49, %cst_27 {dimension_numbers = #tpu.dot_dimension_numbers<[2], [1], [1], [2], [0, 0, 0, 1, 1, 2], [0], [0]>} : vector<2x8x8xbf16>, vector<2x8x8xbf16>, vector<2x8x8xf32> -> vector<2x8x8xf32>
    %51 = vector.shape_cast %50 : vector<2x8x8xf32> to vector<16x8xf32>
    %52 = arith.truncf %51 : vector<16x8xf32> to vector<16x8xbf16>
    %c0_28 = arith.constant 0 : index
    %c0_29 = arith.constant 0 : index
    %53 = vector.load %arg21[%c0_28, %c0_29] : memref<16x32xbf16, #tpu.memory_space<vmem>>, vector<16x8xbf16>
    tpu.vector_store %arg21[%c0_28, %c0_29], %52 {strides = array<i32>} : memref<16x32xbf16, #tpu.memory_space<vmem>>, vector<16x8xbf16>,
    %54 = vector.extract_strided_slice %21 {offsets = [0, 8], sizes = [16, 8], strides = [1, 1]} : vector<16x32xf32> to vector<16x8xf32>
    %55 = vector.shape_cast %54 : vector<16x8xf32> to vector<2x8x8xf32>
    %56 = vector.extract_strided_slice %22 {offsets = [0, 8], sizes = [16, 8], strides = [1, 1]} : vector<16x32xf32> to vector<16x8xf32>
    %57 = vector.shape_cast %56 : vector<16x8xf32> to vector<2x8x8xf32>
    %58 = vector.extract_strided_slice %23 {offsets = [0, 8], sizes = [16, 8], strides = [1, 1]} : vector<16x32xf32> to vector<16x8xf32>
    %59 = vector.shape_cast %58 : vector<16x8xf32> to vector<2x8x8xf32>
    %60 = arith.truncf %55 : vector<2x8x8xf32> to vector<2x8x8xbf16>
    %61 = arith.truncf %57 : vector<2x8x8xf32> to vector<2x8x8xbf16>
    %cst_30 = arith.constant dense<0.000000e+00> : vector<2x8x8xf32>
    %62 = tpu.matmul %60, %61, %cst_30 {dimension_numbers = #tpu.dot_dimension_numbers<[2], [2], [1], [1], [0, 0, 0, 1, 1, 1], [0], [0]>} : vector<2x8x8xbf16>, vector<2x8x8xbf16>, vector<2x8x8xf32> -> vector<2x8x8xf32>
    %63 = arith.addf %62, %8 : vector<2x8x8xf32>
    %cst_31 = arith.constant dense<0xFF800000> : vector<2x8xf32>
    %64 = vector.multi_reduction <maximumf>, %63, %cst_31 [2] : vector<2x8x8xf32> to vector<2x8xf32>
    %65 = vector.shape_cast %64 : vector<2x8xf32> to vector<2x8x1xf32>
    %66 = vector.broadcast %65 : vector<2x8x1xf32> to vector<2x8x8xf32>
    %67 = arith.subf %63, %66 : vector<2x8x8xf32>
    %68 = math.exp %67 : vector<2x8x8xf32>
    %cst_32 = arith.constant dense<0.000000e+00> : vector<2x8xf32>
    %69 = vector.multi_reduction <add>, %68, %cst_32 [2] : vector<2x8x8xf32> to vector<2x8xf32>
    %70 = vector.shape_cast %69 : vector<2x8xf32> to vector<2x8x1xf32>
    %71 = tpu.reciprocal %70 {approx = true} : vector<2x8x1xf32> -> vector<2x8x1xf32>
    %72 = vector.broadcast %71 : vector<2x8x1xf32> to vector<2x8x8xf32>
    %73 = arith.mulf %68, %72 : vector<2x8x8xf32>
    %74 = arith.truncf %73 : vector<2x8x8xf32> to vector<2x8x8xbf16>
    %75 = arith.truncf %59 : vector<2x8x8xf32> to vector<2x8x8xbf16>
    %cst_33 = arith.constant dense<0.000000e+00> : vector<2x8x8xf32>
    %76 = tpu.matmul %74, %75, %cst_33 {dimension_numbers = #tpu.dot_dimension_numbers<[2], [1], [1], [2], [0, 0, 0, 1, 1, 2], [0], [0]>} : vector<2x8x8xbf16>, vector<2x8x8xbf16>, vector<2x8x8xf32> -> vector<2x8x8xf32>
    %77 = vector.shape_cast %76 : vector<2x8x8xf32> to vector<16x8xf32>
    %78 = arith.truncf %77 : vector<16x8xf32> to vector<16x8xbf16>
    %c0_34 = arith.constant 0 : index
    %c8 = arith.constant 8 : index
    %79 = vector.load %arg21[%c0_34, %c8] : memref<16x32xbf16, #tpu.memory_space<vmem>>, vector<16x8xbf16>
    tpu.vector_store %arg21[%c0_34, %c8], %78 {strides = array<i32>} : memref<16x32xbf16, #tpu.memory_space<vmem>>, vector<16x8xbf16>,
    %80 = vector.extract_strided_slice %21 {offsets = [0, 16], sizes = [16, 8], strides = [1, 1]} : vector<16x32xf32> to vector<16x8xf32>
    %81 = vector.shape_cast %80 : vector<16x8xf32> to vector<2x8x8xf32>
    %82 = vector.extract_strided_slice %22 {offsets = [0, 16], sizes = [16, 8], strides = [1, 1]} : vector<16x32xf32> to vector<16x8xf32>
    %83 = vector.shape_cast %82 : vector<16x8xf32> to vector<2x8x8xf32>
    %84 = vector.extract_strided_slice %23 {offsets = [0, 16], sizes = [16, 8], strides = [1, 1]} : vector<16x32xf32> to vector<16x8xf32>
    %85 = vector.shape_cast %84 : vector<16x8xf32> to vector<2x8x8xf32>
    %86 = arith.truncf %81 : vector<2x8x8xf32> to vector<2x8x8xbf16>
    %87 = arith.truncf %83 : vector<2x8x8xf32> to vector<2x8x8xbf16>
    %cst_35 = arith.constant dense<0.000000e+00> : vector<2x8x8xf32>
    %88 = tpu.matmul %86, %87, %cst_35 {dimension_numbers = #tpu.dot_dimension_numbers<[2], [2], [1], [1], [0, 0, 0, 1, 1, 1], [0], [0]>} : vector<2x8x8xbf16>, vector<2x8x8xbf16>, vector<2x8x8xf32> -> vector<2x8x8xf32>
    %89 = arith.addf %88, %8 : vector<2x8x8xf32>
    %cst_36 = arith.constant dense<0xFF800000> : vector<2x8xf32>
    %90 = vector.multi_reduction <maximumf>, %89, %cst_36 [2] : vector<2x8x8xf32> to vector<2x8xf32>
    %91 = vector.shape_cast %90 : vector<2x8xf32> to vector<2x8x1xf32>
    %92 = vector.broadcast %91 : vector<2x8x1xf32> to vector<2x8x8xf32>
    %93 = arith.subf %89, %92 : vector<2x8x8xf32>
    %94 = math.exp %93 : vector<2x8x8xf32>
    %cst_37 = arith.constant dense<0.000000e+00> : vector<2x8xf32>
    %95 = vector.multi_reduction <add>, %94, %cst_37 [2] : vector<2x8x8xf32> to vector<2x8xf32>
    %96 = vector.shape_cast %95 : vector<2x8xf32> to vector<2x8x1xf32>
    %97 = tpu.reciprocal %96 {approx = true} : vector<2x8x1xf32> -> vector<2x8x1xf32>
    %98 = vector.broadcast %97 : vector<2x8x1xf32> to vector<2x8x8xf32>
    %99 = arith.mulf %94, %98 : vector<2x8x8xf32>
    %100 = arith.truncf %99 : vector<2x8x8xf32> to vector<2x8x8xbf16>
    %101 = arith.truncf %85 : vector<2x8x8xf32> to vector<2x8x8xbf16>
    %cst_38 = arith.constant dense<0.000000e+00> : vector<2x8x8xf32>
    %102 = tpu.matmul %100, %101, %cst_38 {dimension_numbers = #tpu.dot_dimension_numbers<[2], [1], [1], [2], [0, 0, 0, 1, 1, 2], [0], [0]>} : vector<2x8x8xbf16>, vector<2x8x8xbf16>, vector<2x8x8xf32> -> vector<2x8x8xf32>
    %103 = vector.shape_cast %102 : vector<2x8x8xf32> to vector<16x8xf32>
    %104 = arith.truncf %103 : vector<16x8xf32> to vector<16x8xbf16>
    %c0_39 = arith.constant 0 : index
    %c16 = arith.constant 16 : index
    %105 = vector.load %arg21[%c0_39, %c16] : memref<16x32xbf16, #tpu.memory_space<vmem>>, vector<16x8xbf16>
    tpu.vector_store %arg21[%c0_39, %c16], %104 {strides = array<i32>} : memref<16x32xbf16, #tpu.memory_space<vmem>>, vector<16x8xbf16>,
    %106 = vector.extract_strided_slice %21 {offsets = [0, 24], sizes = [16, 8], strides = [1, 1]} : vector<16x32xf32> to vector<16x8xf32>
    %107 = vector.shape_cast %106 : vector<16x8xf32> to vector<2x8x8xf32>
    %108 = vector.extract_strided_slice %22 {offsets = [0, 24], sizes = [16, 8], strides = [1, 1]} : vector<16x32xf32> to vector<16x8xf32>
    %109 = vector.shape_cast %108 : vector<16x8xf32> to vector<2x8x8xf32>
    %110 = vector.extract_strided_slice %23 {offsets = [0, 24], sizes = [16, 8], strides = [1, 1]} : vector<16x32xf32> to vector<16x8xf32>
    %111 = vector.shape_cast %110 : vector<16x8xf32> to vector<2x8x8xf32>
    %112 = arith.truncf %107 : vector<2x8x8xf32> to vector<2x8x8xbf16>
    %113 = arith.truncf %109 : vector<2x8x8xf32> to vector<2x8x8xbf16>
    %cst_40 = arith.constant dense<0.000000e+00> : vector<2x8x8xf32>
    %114 = tpu.matmul %112, %113, %cst_40 {dimension_numbers = #tpu.dot_dimension_numbers<[2], [2], [1], [1], [0, 0, 0, 1, 1, 1], [0], [0]>} : vector<2x8x8xbf16>, vector<2x8x8xbf16>, vector<2x8x8xf32> -> vector<2x8x8xf32>
    %115 = arith.addf %114, %8 : vector<2x8x8xf32>
    %cst_41 = arith.constant dense<0xFF800000> : vector<2x8xf32>
    %116 = vector.multi_reduction <maximumf>, %115, %cst_41 [2] : vector<2x8x8xf32> to vector<2x8xf32>
    %117 = vector.shape_cast %116 : vector<2x8xf32> to vector<2x8x1xf32>
    %118 = vector.broadcast %117 : vector<2x8x1xf32> to vector<2x8x8xf32>
    %119 = arith.subf %115, %118 : vector<2x8x8xf32>
    %120 = math.exp %119 : vector<2x8x8xf32>
    %cst_42 = arith.constant dense<0.000000e+00> : vector<2x8xf32>
    %121 = vector.multi_reduction <add>, %120, %cst_42 [2] : vector<2x8x8xf32> to vector<2x8xf32>
    %122 = vector.shape_cast %121 : vector<2x8xf32> to vector<2x8x1xf32>
    %123 = tpu.reciprocal %122 {approx = true} : vector<2x8x1xf32> -> vector<2x8x1xf32>
    %124 = vector.broadcast %123 : vector<2x8x1xf32> to vector<2x8x8xf32>
    %125 = arith.mulf %120, %124 : vector<2x8x8xf32>
    %126 = arith.truncf %125 : vector<2x8x8xf32> to vector<2x8x8xbf16>
    %127 = arith.truncf %111 : vector<2x8x8xf32> to vector<2x8x8xbf16>
    %cst_43 = arith.constant dense<0.000000e+00> : vector<2x8x8xf32>
    %128 = tpu.matmul %126, %127, %cst_43 {dimension_numbers = #tpu.dot_dimension_numbers<[2], [1], [1], [2], [0, 0, 0, 1, 1, 2], [0], [0]>} : vector<2x8x8xbf16>, vector<2x8x8xbf16>, vector<2x8x8xf32> -> vector<2x8x8xf32>
    %129 = vector.shape_cast %128 : vector<2x8x8xf32> to vector<16x8xf32>
    %130 = arith.truncf %129 : vector<16x8xf32> to vector<16x8xbf16>
    %c0_44 = arith.constant 0 : index
    %c24 = arith.constant 24 : index
    %131 = vector.load %arg21[%c0_44, %c24] : memref<16x32xbf16, #tpu.memory_space<vmem>>, vector<16x8xbf16>
    tpu.vector_store %arg21[%c0_44, %c24], %130 {strides = array<i32>} : memref<16x32xbf16, #tpu.memory_space<vmem>>, vector<16x8xbf16>,
    %c0_45 = arith.constant 0 : index
    %c0_46 = arith.constant 0 : index
    %132 = vector.load %arg21[%c0_45, %c0_46] : memref<16x32xbf16, #tpu.memory_space<vmem>>, vector<16x32xbf16>
    %cst_47 = arith.constant dense<0.000000e+00> : vector<16x32xf32>
    %133 = tpu.matmul %132, %25, %cst_47 {dimension_numbers = #tpu.dot_dimension_numbers<[1], [0], [0], [1], [0, 0, 1, 1], [], []>} : vector<16x32xbf16>, vector<32x32xbf16>, vector<16x32xf32> -> vector<16x32xf32>
    %134 = vector.broadcast %27 : vector<1x32xf32> to vector<16x32xf32>
    %135 = arith.addf %133, %134 : vector<16x32xf32>
    %136 = arith.addf %3, %135 : vector<16x32xf32>
    %137 = vector.extract_strided_slice %10 {offsets = [0, 0], sizes = [1, 32], strides = [1, 1]} : vector<3x32xf32> to vector<1x32xf32>
    %138 = vector.extract_strided_slice %12 {offsets = [0, 0], sizes = [1, 32], strides = [1, 1]} : vector<3x32xf32> to vector<1x32xf32>
    %cst_48 = arith.constant dense<0.000000e+00> : vector<16xf32>
    %139 = vector.multi_reduction <add>, %136, %cst_48 [1] : vector<16x32xf32> to vector<16xf32>
    %140 = vector.shape_cast %139 : vector<16xf32> to vector<16x1xf32>
    %cst_49 = arith.constant 3.200000e+01 : f32
    %141 = vector.broadcast %cst_49 : f32 to vector<16x1xf32>
    %142 = arith.divf %140, %141 : vector<16x1xf32>
    %143 = vector.broadcast %142 : vector<16x1xf32> to vector<16x32xf32>
    %144 = arith.subf %136, %143 : vector<16x32xf32>
    %145 = arith.mulf %144, %144 : vector<16x32xf32>
    %cst_50 = arith.constant dense<0.000000e+00> : vector<16xf32>
    %146 = vector.multi_reduction <add>, %145, %cst_50 [1] : vector<16x32xf32> to vector<16xf32>
    %147 = vector.shape_cast %146 : vector<16xf32> to vector<16x1xf32>
    %cst_51 = arith.constant 3.200000e+01 : f32
    %148 = vector.broadcast %cst_51 : f32 to vector<16x1xf32>
    %149 = arith.divf %147, %148 : vector<16x1xf32>
    %cst_52 = arith.constant 9.99999974E-6 : f32
    %150 = vector.broadcast %cst_52 : f32 to vector<16x1xf32>
    %151 = arith.addf %149, %150 : vector<16x1xf32>
    %152 = math.rsqrt %151 : vector<16x1xf32>
    %153 = vector.broadcast %152 : vector<16x1xf32> to vector<16x32xf32>
    %154 = arith.mulf %144, %153 : vector<16x32xf32>
    %155 = vector.broadcast %137 : vector<1x32xf32> to vector<16x32xf32>
    %156 = arith.mulf %154, %155 : vector<16x32xf32>
    %157 = vector.broadcast %138 : vector<1x32xf32> to vector<16x32xf32>
    %158 = arith.addf %156, %157 : vector<16x32xf32>
    %c0_53 = arith.constant 0 : index
    %c0_54 = arith.constant 0 : index
    %c0_55 = arith.constant 0 : index
    %159 = vector.load %arg8[%c0_53, %c0_54, %c0_55] : memref<1x32x96xbf16, #tpu.memory_space<vmem>>, vector<1x32x96xbf16>
    %160 = vector.shape_cast %159 : vector<1x32x96xbf16> to vector<32x96xbf16>
    %161 = vector.extract_strided_slice %160 {offsets = [0, 0], sizes = [32, 32], strides = [1, 1]} : vector<32x96xbf16> to vector<32x32xbf16>
    %162 = arith.truncf %158 : vector<16x32xf32> to vector<16x32xbf16>
    %cst_56 = arith.constant dense<0.000000e+00> : vector<16x32xf32>
    %163 = tpu.matmul %162, %161, %cst_56 {dimension_numbers = #tpu.dot_dimension_numbers<[1], [0], [0], [1], [0, 0, 1, 1], [], []>} : vector<16x32xbf16>, vector<32x32xbf16>, vector<16x32xf32> -> vector<16x32xf32>
    %c0_57 = arith.constant 0 : index
    %c0_58 = arith.constant 0 : index
    %c0_59 = arith.constant 0 : index
    %164 = vector.load %arg9[%c0_57, %c0_58, %c0_59] : memref<1x1x96xf32, #tpu.memory_space<vmem>>, vector<1x1x96xf32>
    %165 = vector.shape_cast %164 : vector<1x1x96xf32> to vector<1x96xf32>
    %166 = vector.extract_strided_slice %165 {offsets = [0, 0], sizes = [1, 32], strides = [1, 1]} : vector<1x96xf32> to vector<1x32xf32>
    %167 = vector.broadcast %166 : vector<1x32xf32> to vector<16x32xf32>
    %168 = arith.addf %163, %167 : vector<16x32xf32>
    %c0_60 = arith.constant 0 : index
    %c0_61 = arith.constant 0 : index
    %c0_62 = arith.constant 0 : index
    %169 = vector.load %arg8[%c0_60, %c0_61, %c0_62] : memref<1x32x96xbf16, #tpu.memory_space<vmem>>, vector<1x32x96xbf16>
    %170 = vector.shape_cast %169 : vector<1x32x96xbf16> to vector<32x96xbf16>
    %171 = vector.extract_strided_slice %170 {offsets = [0, 32], sizes = [32, 64], strides = [1, 1]} : vector<32x96xbf16> to vector<32x64xbf16>
    %cst_63 = arith.constant dense<0.000000e+00> : vector<32x64xf32>
    %172 = tpu.matmul %4, %171, %cst_63 {dimension_numbers = #tpu.dot_dimension_numbers<[1], [0], [0], [1], [0, 0, 1, 1], [], []>} : vector<32x32xbf16>, vector<32x64xbf16>, vector<32x64xf32> -> vector<32x64xf32>
    %c0_64 = arith.constant 0 : index
    %c0_65 = arith.constant 0 : index
    %c0_66 = arith.constant 0 : index
    %173 = vector.load %arg9[%c0_64, %c0_65, %c0_66] : memref<1x1x96xf32, #tpu.memory_space<vmem>>, vector<1x1x96xf32>
    %174 = vector.shape_cast %173 : vector<1x1x96xf32> to vector<1x96xf32>
    %175 = vector.extract_strided_slice %174 {offsets = [0, 32], sizes = [1, 64], strides = [1, 1]} : vector<1x96xf32> to vector<1x64xf32>
    %176 = vector.broadcast %175 : vector<1x64xf32> to vector<32x64xf32>
    %177 = arith.addf %172, %176 : vector<32x64xf32>
    %178 = vector.extract_strided_slice %177 {offsets = [0, 0], sizes = [32, 32], strides = [1, 1]} : vector<32x64xf32> to vector<32x32xf32>
    %179 = vector.extract_strided_slice %177 {offsets = [0, 32], sizes = [32, 32], strides = [1, 1]} : vector<32x64xf32> to vector<32x32xf32>
    %c0_67 = arith.constant 0 : index
    %c0_68 = arith.constant 0 : index
    %c0_69 = arith.constant 0 : index
    %180 = vector.load %arg10[%c0_67, %c0_68, %c0_69] : memref<1x32x32xbf16, #tpu.memory_space<vmem>>, vector<1x32x32xbf16>
    %181 = vector.shape_cast %180 : vector<1x32x32xbf16> to vector<32x32xbf16>
    %c0_70 = arith.constant 0 : index
    %c0_71 = arith.constant 0 : index
    %c0_72 = arith.constant 0 : index
    %182 = vector.load %arg11[%c0_70, %c0_71, %c0_72] : memref<1x1x32xf32, #tpu.memory_space<vmem>>, vector<1x1x32xf32>
    %183 = vector.shape_cast %182 : vector<1x1x32xf32> to vector<1x32xf32>
    %184 = vector.extract_strided_slice %168 {offsets = [0, 0], sizes = [16, 8], strides = [1, 1]} : vector<16x32xf32> to vector<16x8xf32>
    %185 = vector.shape_cast %184 : vector<16x8xf32> to vector<2x8x8xf32>
    %186 = vector.extract_strided_slice %178 {offsets = [0, 0], sizes = [32, 8], strides = [1, 1]} : vector<32x32xf32> to vector<32x8xf32>
    %187 = vector.shape_cast %186 : vector<32x8xf32> to vector<2x16x8xf32>
    %188 = vector.extract_strided_slice %179 {offsets = [0, 0], sizes = [32, 8], strides = [1, 1]} : vector<32x32xf32> to vector<32x8xf32>
    %189 = vector.shape_cast %188 : vector<32x8xf32> to vector<2x16x8xf32>
    %190 = arith.truncf %185 : vector<2x8x8xf32> to vector<2x8x8xbf16>
    %191 = arith.truncf %187 : vector<2x16x8xf32> to vector<2x16x8xbf16>
    %cst_73 = arith.constant dense<0.000000e+00> : vector<2x8x16xf32>
    %192 = tpu.matmul %190, %191, %cst_73 {dimension_numbers = #tpu.dot_dimension_numbers<[2], [2], [1], [1], [0, 0, 0, 1, 1, 1], [0], [0]>} : vector<2x8x8xbf16>, vector<2x16x8xbf16>, vector<2x8x16xf32> -> vector<2x8x16xf32>
    %cst_74 = arith.constant dense<0xFF800000> : vector<2x8xf32>
    %193 = vector.multi_reduction <maximumf>, %192, %cst_74 [2] : vector<2x8x16xf32> to vector<2x8xf32>
    %194 = vector.shape_cast %193 : vector<2x8xf32> to vector<2x8x1xf32>
    %195 = vector.broadcast %194 : vector<2x8x1xf32> to vector<2x8x16xf32>
    %196 = arith.subf %192, %195 : vector<2x8x16xf32>
    %197 = math.exp %196 : vector<2x8x16xf32>
    %cst_75 = arith.constant dense<0.000000e+00> : vector<2x8xf32>
    %198 = vector.multi_reduction <add>, %197, %cst_75 [2] : vector<2x8x16xf32> to vector<2x8xf32>
    %199 = vector.shape_cast %198 : vector<2x8xf32> to vector<2x8x1xf32>
    %200 = tpu.reciprocal %199 {approx = true} : vector<2x8x1xf32> -> vector<2x8x1xf32>
    %201 = vector.broadcast %200 : vector<2x8x1xf32> to vector<2x8x16xf32>
    %202 = arith.mulf %197, %201 : vector<2x8x16xf32>
    %203 = arith.truncf %202 : vector<2x8x16xf32> to vector<2x8x16xbf16>
    %204 = arith.truncf %189 : vector<2x16x8xf32> to vector<2x16x8xbf16>
    %cst_76 = arith.constant dense<0.000000e+00> : vector<2x8x8xf32>
    %205 = tpu.matmul %203, %204, %cst_76 {dimension_numbers = #tpu.dot_dimension_numbers<[2], [1], [1], [2], [0, 0, 0, 1, 1, 2], [0], [0]>} : vector<2x8x16xbf16>, vector<2x16x8xbf16>, vector<2x8x8xf32> -> vector<2x8x8xf32>
    %206 = vector.shape_cast %205 : vector<2x8x8xf32> to vector<16x8xf32>
    %207 = arith.truncf %206 : vector<16x8xf32> to vector<16x8xbf16>
    %c0_77 = arith.constant 0 : index
    %c0_78 = arith.constant 0 : index
    %208 = vector.load %arg21[%c0_77, %c0_78] : memref<16x32xbf16, #tpu.memory_space<vmem>>, vector<16x8xbf16>
    tpu.vector_store %arg21[%c0_77, %c0_78], %207 {strides = array<i32>} : memref<16x32xbf16, #tpu.memory_space<vmem>>, vector<16x8xbf16>,
    %209 = vector.extract_strided_slice %168 {offsets = [0, 8], sizes = [16, 8], strides = [1, 1]} : vector<16x32xf32> to vector<16x8xf32>
    %210 = vector.shape_cast %209 : vector<16x8xf32> to vector<2x8x8xf32>
    %211 = vector.extract_strided_slice %178 {offsets = [0, 8], sizes = [32, 8], strides = [1, 1]} : vector<32x32xf32> to vector<32x8xf32>
    %212 = vector.shape_cast %211 : vector<32x8xf32> to vector<2x16x8xf32>
    %213 = vector.extract_strided_slice %179 {offsets = [0, 8], sizes = [32, 8], strides = [1, 1]} : vector<32x32xf32> to vector<32x8xf32>
    %214 = vector.shape_cast %213 : vector<32x8xf32> to vector<2x16x8xf32>
    %215 = arith.truncf %210 : vector<2x8x8xf32> to vector<2x8x8xbf16>
    %216 = arith.truncf %212 : vector<2x16x8xf32> to vector<2x16x8xbf16>
    %cst_79 = arith.constant dense<0.000000e+00> : vector<2x8x16xf32>
    %217 = tpu.matmul %215, %216, %cst_79 {dimension_numbers = #tpu.dot_dimension_numbers<[2], [2], [1], [1], [0, 0, 0, 1, 1, 1], [0], [0]>} : vector<2x8x8xbf16>, vector<2x16x8xbf16>, vector<2x8x16xf32> -> vector<2x8x16xf32>
    %cst_80 = arith.constant dense<0xFF800000> : vector<2x8xf32>
    %218 = vector.multi_reduction <maximumf>, %217, %cst_80 [2] : vector<2x8x16xf32> to vector<2x8xf32>
    %219 = vector.shape_cast %218 : vector<2x8xf32> to vector<2x8x1xf32>
    %220 = vector.broadcast %219 : vector<2x8x1xf32> to vector<2x8x16xf32>
    %221 = arith.subf %217, %220 : vector<2x8x16xf32>
    %222 = math.exp %221 : vector<2x8x16xf32>
    %cst_81 = arith.constant dense<0.000000e+00> : vector<2x8xf32>
    %223 = vector.multi_reduction <add>, %222, %cst_81 [2] : vector<2x8x16xf32> to vector<2x8xf32>
    %224 = vector.shape_cast %223 : vector<2x8xf32> to vector<2x8x1xf32>
    %225 = tpu.reciprocal %224 {approx = true} : vector<2x8x1xf32> -> vector<2x8x1xf32>
    %226 = vector.broadcast %225 : vector<2x8x1xf32> to vector<2x8x16xf32>
    %227 = arith.mulf %222, %226 : vector<2x8x16xf32>
    %228 = arith.truncf %227 : vector<2x8x16xf32> to vector<2x8x16xbf16>
    %229 = arith.truncf %214 : vector<2x16x8xf32> to vector<2x16x8xbf16>
    %cst_82 = arith.constant dense<0.000000e+00> : vector<2x8x8xf32>
    %230 = tpu.matmul %228, %229, %cst_82 {dimension_numbers = #tpu.dot_dimension_numbers<[2], [1], [1], [2], [0, 0, 0, 1, 1, 2], [0], [0]>} : vector<2x8x16xbf16>, vector<2x16x8xbf16>, vector<2x8x8xf32> -> vector<2x8x8xf32>
    %231 = vector.shape_cast %230 : vector<2x8x8xf32> to vector<16x8xf32>
    %232 = arith.truncf %231 : vector<16x8xf32> to vector<16x8xbf16>
    %c0_83 = arith.constant 0 : index
    %c8_84 = arith.constant 8 : index
    %233 = vector.load %arg21[%c0_83, %c8_84] : memref<16x32xbf16, #tpu.memory_space<vmem>>, vector<16x8xbf16>
    tpu.vector_store %arg21[%c0_83, %c8_84], %232 {strides = array<i32>} : memref<16x32xbf16, #tpu.memory_space<vmem>>, vector<16x8xbf16>,
    %234 = vector.extract_strided_slice %168 {offsets = [0, 16], sizes = [16, 8], strides = [1, 1]} : vector<16x32xf32> to vector<16x8xf32>
    %235 = vector.shape_cast %234 : vector<16x8xf32> to vector<2x8x8xf32>
    %236 = vector.extract_strided_slice %178 {offsets = [0, 16], sizes = [32, 8], strides = [1, 1]} : vector<32x32xf32> to vector<32x8xf32>
    %237 = vector.shape_cast %236 : vector<32x8xf32> to vector<2x16x8xf32>
    %238 = vector.extract_strided_slice %179 {offsets = [0, 16], sizes = [32, 8], strides = [1, 1]} : vector<32x32xf32> to vector<32x8xf32>
    %239 = vector.shape_cast %238 : vector<32x8xf32> to vector<2x16x8xf32>
    %240 = arith.truncf %235 : vector<2x8x8xf32> to vector<2x8x8xbf16>
    %241 = arith.truncf %237 : vector<2x16x8xf32> to vector<2x16x8xbf16>
    %cst_85 = arith.constant dense<0.000000e+00> : vector<2x8x16xf32>
    %242 = tpu.matmul %240, %241, %cst_85 {dimension_numbers = #tpu.dot_dimension_numbers<[2], [2], [1], [1], [0, 0, 0, 1, 1, 1], [0], [0]>} : vector<2x8x8xbf16>, vector<2x16x8xbf16>, vector<2x8x16xf32> -> vector<2x8x16xf32>
    %cst_86 = arith.constant dense<0xFF800000> : vector<2x8xf32>
    %243 = vector.multi_reduction <maximumf>, %242, %cst_86 [2] : vector<2x8x16xf32> to vector<2x8xf32>
    %244 = vector.shape_cast %243 : vector<2x8xf32> to vector<2x8x1xf32>
    %245 = vector.broadcast %244 : vector<2x8x1xf32> to vector<2x8x16xf32>
    %246 = arith.subf %242, %245 : vector<2x8x16xf32>
    %247 = math.exp %246 : vector<2x8x16xf32>
    %cst_87 = arith.constant dense<0.000000e+00> : vector<2x8xf32>
    %248 = vector.multi_reduction <add>, %247, %cst_87 [2] : vector<2x8x16xf32> to vector<2x8xf32>
    %249 = vector.shape_cast %248 : vector<2x8xf32> to vector<2x8x1xf32>
    %250 = tpu.reciprocal %249 {approx = true} : vector<2x8x1xf32> -> vector<2x8x1xf32>
    %251 = vector.broadcast %250 : vector<2x8x1xf32> to vector<2x8x16xf32>
    %252 = arith.mulf %247, %251 : vector<2x8x16xf32>
    %253 = arith.truncf %252 : vector<2x8x16xf32> to vector<2x8x16xbf16>
    %254 = arith.truncf %239 : vector<2x16x8xf32> to vector<2x16x8xbf16>
    %cst_88 = arith.constant dense<0.000000e+00> : vector<2x8x8xf32>
    %255 = tpu.matmul %253, %254, %cst_88 {dimension_numbers = #tpu.dot_dimension_numbers<[2], [1], [1], [2], [0, 0, 0, 1, 1, 2], [0], [0]>} : vector<2x8x16xbf16>, vector<2x16x8xbf16>, vector<2x8x8xf32> -> vector<2x8x8xf32>
    %256 = vector.shape_cast %255 : vector<2x8x8xf32> to vector<16x8xf32>
    %257 = arith.truncf %256 : vector<16x8xf32> to vector<16x8xbf16>
    %c0_89 = arith.constant 0 : index
    %c16_90 = arith.constant 16 : index
    %258 = vector.load %arg21[%c0_89, %c16_90] : memref<16x32xbf16, #tpu.memory_space<vmem>>, vector<16x8xbf16>
    tpu.vector_store %arg21[%c0_89, %c16_90], %257 {strides = array<i32>} : memref<16x32xbf16, #tpu.memory_space<vmem>>, vector<16x8xbf16>,
    %259 = vector.extract_strided_slice %168 {offsets = [0, 24], sizes = [16, 8], strides = [1, 1]} : vector<16x32xf32> to vector<16x8xf32>
    %260 = vector.shape_cast %259 : vector<16x8xf32> to vector<2x8x8xf32>
    %261 = vector.extract_strided_slice %178 {offsets = [0, 24], sizes = [32, 8], strides = [1, 1]} : vector<32x32xf32> to vector<32x8xf32>
    %262 = vector.shape_cast %261 : vector<32x8xf32> to vector<2x16x8xf32>
    %263 = vector.extract_strided_slice %179 {offsets = [0, 24], sizes = [32, 8], strides = [1, 1]} : vector<32x32xf32> to vector<32x8xf32>
    %264 = vector.shape_cast %263 : vector<32x8xf32> to vector<2x16x8xf32>
    %265 = arith.truncf %260 : vector<2x8x8xf32> to vector<2x8x8xbf16>
    %266 = arith.truncf %262 : vector<2x16x8xf32> to vector<2x16x8xbf16>
    %cst_91 = arith.constant dense<0.000000e+00> : vector<2x8x16xf32>
    %267 = tpu.matmul %265, %266, %cst_91 {dimension_numbers = #tpu.dot_dimension_numbers<[2], [2], [1], [1], [0, 0, 0, 1, 1, 1], [0], [0]>} : vector<2x8x8xbf16>, vector<2x16x8xbf16>, vector<2x8x16xf32> -> vector<2x8x16xf32>
    %cst_92 = arith.constant dense<0xFF800000> : vector<2x8xf32>
    %268 = vector.multi_reduction <maximumf>, %267, %cst_92 [2] : vector<2x8x16xf32> to vector<2x8xf32>
    %269 = vector.shape_cast %268 : vector<2x8xf32> to vector<2x8x1xf32>
    %270 = vector.broadcast %269 : vector<2x8x1xf32> to vector<2x8x16xf32>
    %271 = arith.subf %267, %270 : vector<2x8x16xf32>
    %272 = math.exp %271 : vector<2x8x16xf32>
    %cst_93 = arith.constant dense<0.000000e+00> : vector<2x8xf32>
    %273 = vector.multi_reduction <add>, %272, %cst_93 [2] : vector<2x8x16xf32> to vector<2x8xf32>
    %274 = vector.shape_cast %273 : vector<2x8xf32> to vector<2x8x1xf32>
    %275 = tpu.reciprocal %274 {approx = true} : vector<2x8x1xf32> -> vector<2x8x1xf32>
    %276 = vector.broadcast %275 : vector<2x8x1xf32> to vector<2x8x16xf32>
    %277 = arith.mulf %272, %276 : vector<2x8x16xf32>
    %278 = arith.truncf %277 : vector<2x8x16xf32> to vector<2x8x16xbf16>
    %279 = arith.truncf %264 : vector<2x16x8xf32> to vector<2x16x8xbf16>
    %cst_94 = arith.constant dense<0.000000e+00> : vector<2x8x8xf32>
    %280 = tpu.matmul %278, %279, %cst_94 {dimension_numbers = #tpu.dot_dimension_numbers<[2], [1], [1], [2], [0, 0, 0, 1, 1, 2], [0], [0]>} : vector<2x8x16xbf16>, vector<2x16x8xbf16>, vector<2x8x8xf32> -> vector<2x8x8xf32>
    %281 = vector.shape_cast %280 : vector<2x8x8xf32> to vector<16x8xf32>
    %282 = arith.truncf %281 : vector<16x8xf32> to vector<16x8xbf16>
    %c0_95 = arith.constant 0 : index
    %c24_96 = arith.constant 24 : index
    %283 = vector.load %arg21[%c0_95, %c24_96] : memref<16x32xbf16, #tpu.memory_space<vmem>>, vector<16x8xbf16>
    tpu.vector_store %arg21[%c0_95, %c24_96], %282 {strides = array<i32>} : memref<16x32xbf16, #tpu.memory_space<vmem>>, vector<16x8xbf16>,
    %c0_97 = arith.constant 0 : index
    %c0_98 = arith.constant 0 : index
    %284 = vector.load %arg21[%c0_97, %c0_98] : memref<16x32xbf16, #tpu.memory_space<vmem>>, vector<16x32xbf16>
    %cst_99 = arith.constant dense<0.000000e+00> : vector<16x32xf32>
    %285 = tpu.matmul %284, %181, %cst_99 {dimension_numbers = #tpu.dot_dimension_numbers<[1], [0], [0], [1], [0, 0, 1, 1], [], []>} : vector<16x32xbf16>, vector<32x32xbf16>, vector<16x32xf32> -> vector<16x32xf32>
    %286 = vector.broadcast %183 : vector<1x32xf32> to vector<16x32xf32>
    %287 = arith.addf %285, %286 : vector<16x32xf32>
    %288 = arith.addf %158, %287 : vector<16x32xf32>
    %289 = vector.extract_strided_slice %10 {offsets = [1, 0], sizes = [1, 32], strides = [1, 1]} : vector<3x32xf32> to vector<1x32xf32>
    %290 = vector.extract_strided_slice %12 {offsets = [1, 0], sizes = [1, 32], strides = [1, 1]} : vector<3x32xf32> to vector<1x32xf32>
    %cst_100 = arith.constant dense<0.000000e+00> : vector<16xf32>
    %291 = vector.multi_reduction <add>, %288, %cst_100 [1] : vector<16x32xf32> to vector<16xf32>
    %292 = vector.shape_cast %291 : vector<16xf32> to vector<16x1xf32>
    %cst_101 = arith.constant 3.200000e+01 : f32
    %293 = vector.broadcast %cst_101 : f32 to vector<16x1xf32>
    %294 = arith.divf %292, %293 : vector<16x1xf32>
    %295 = vector.broadcast %294 : vector<16x1xf32> to vector<16x32xf32>
    %296 = arith.subf %288, %295 : vector<16x32xf32>
    %297 = arith.mulf %296, %296 : vector<16x32xf32>
    %cst_102 = arith.constant dense<0.000000e+00> : vector<16xf32>
    %298 = vector.multi_reduction <add>, %297, %cst_102 [1] : vector<16x32xf32> to vector<16xf32>
    %299 = vector.shape_cast %298 : vector<16xf32> to vector<16x1xf32>
    %cst_103 = arith.constant 3.200000e+01 : f32
    %300 = vector.broadcast %cst_103 : f32 to vector<16x1xf32>
    %301 = arith.divf %299, %300 : vector<16x1xf32>
    %cst_104 = arith.constant 9.99999974E-6 : f32
    %302 = vector.broadcast %cst_104 : f32 to vector<16x1xf32>
    %303 = arith.addf %301, %302 : vector<16x1xf32>
    %304 = math.rsqrt %303 : vector<16x1xf32>
    %305 = vector.broadcast %304 : vector<16x1xf32> to vector<16x32xf32>
    %306 = arith.mulf %296, %305 : vector<16x32xf32>
    %307 = vector.broadcast %289 : vector<1x32xf32> to vector<16x32xf32>
    %308 = arith.mulf %306, %307 : vector<16x32xf32>
    %309 = vector.broadcast %290 : vector<1x32xf32> to vector<16x32xf32>
    %310 = arith.addf %308, %309 : vector<16x32xf32>
    %c0_105 = arith.constant 0 : index
    %c0_106 = arith.constant 0 : index
    %c0_107 = arith.constant 0 : index
    %311 = vector.load %arg12[%c0_105, %c0_106, %c0_107] : memref<1x32x64xbf16, #tpu.memory_space<vmem>>, vector<1x32x64xbf16>
    %312 = vector.shape_cast %311 : vector<1x32x64xbf16> to vector<32x64xbf16>
    %313 = arith.truncf %310 : vector<16x32xf32> to vector<16x32xbf16>
    %cst_108 = arith.constant dense<0.000000e+00> : vector<16x64xf32>
    %314 = tpu.matmul %313, %312, %cst_108 {dimension_numbers = #tpu.dot_dimension_numbers<[1], [0], [0], [1], [0, 0, 1, 1], [], []>} : vector<16x32xbf16>, vector<32x64xbf16>, vector<16x64xf32> -> vector<16x64xf32>
    %c0_109 = arith.constant 0 : index
    %c0_110 = arith.constant 0 : index
    %c0_111 = arith.constant 0 : index
    %315 = vector.load %arg13[%c0_109, %c0_110, %c0_111] : memref<1x1x64xf32, #tpu.memory_space<vmem>>, vector<1x1x64xf32>
    %316 = vector.shape_cast %315 : vector<1x1x64xf32> to vector<1x64xf32>
    %317 = vector.broadcast %316 : vector<1x64xf32> to vector<16x64xf32>
    %318 = arith.addf %314, %317 : vector<16x64xf32>
    %cst_112 = arith.constant 0.000000e+00 : f32
    %319 = vector.broadcast %cst_112 : f32 to vector<16x64xf32>
    %320 = arith.maximumf %318, %319 : vector<16x64xf32>
    %c0_113 = arith.constant 0 : index
    %c0_114 = arith.constant 0 : index
    %c0_115 = arith.constant 0 : index
    %321 = vector.load %arg14[%c0_113, %c0_114, %c0_115] : memref<1x64x32xbf16, #tpu.memory_space<vmem>>, vector<1x64x32xbf16>
    %322 = vector.shape_cast %321 : vector<1x64x32xbf16> to vector<64x32xbf16>
    %323 = arith.truncf %320 : vector<16x64xf32> to vector<16x64xbf16>
    %cst_116 = arith.constant dense<0.000000e+00> : vector<16x32xf32>
    %324 = tpu.matmul %323, %322, %cst_116 {dimension_numbers = #tpu.dot_dimension_numbers<[1], [0], [0], [1], [0, 0, 1, 1], [], []>} : vector<16x64xbf16>, vector<64x32xbf16>, vector<16x32xf32> -> vector<16x32xf32>
    %c0_117 = arith.constant 0 : index
    %c0_118 = arith.constant 0 : index
    %c0_119 = arith.constant 0 : index
    %325 = vector.load %arg15[%c0_117, %c0_118, %c0_119] : memref<1x1x32xf32, #tpu.memory_space<vmem>>, vector<1x1x32xf32>
    %326 = vector.shape_cast %325 : vector<1x1x32xf32> to vector<1x32xf32>
    %327 = vector.broadcast %326 : vector<1x32xf32> to vector<16x32xf32>
    %328 = arith.addf %324, %327 : vector<16x32xf32>
    %329 = arith.addf %310, %328 : vector<16x32xf32>
    %330 = vector.extract_strided_slice %10 {offsets = [2, 0], sizes = [1, 32], strides = [1, 1]} : vector<3x32xf32> to vector<1x32xf32>
    %331 = vector.extract_strided_slice %12 {offsets = [2, 0], sizes = [1, 32], strides = [1, 1]} : vector<3x32xf32> to vector<1x32xf32>
    %cst_120 = arith.constant dense<0.000000e+00> : vector<16xf32>
    %332 = vector.multi_reduction <add>, %329, %cst_120 [1] : vector<16x32xf32> to vector<16xf32>
    %333 = vector.shape_cast %332 : vector<16xf32> to vector<16x1xf32>
    %cst_121 = arith.constant 3.200000e+01 : f32
    %334 = vector.broadcast %cst_121 : f32 to vector<16x1xf32>
    %335 = arith.divf %333, %334 : vector<16x1xf32>
    %336 = vector.broadcast %335 : vector<16x1xf32> to vector<16x32xf32>
    %337 = arith.subf %329, %336 : vector<16x32xf32>
    %338 = arith.mulf %337, %337 : vector<16x32xf32>
    %cst_122 = arith.constant dense<0.000000e+00> : vector<16xf32>
    %339 = vector.multi_reduction <add>, %338, %cst_122 [1] : vector<16x32xf32> to vector<16xf32>
    %340 = vector.shape_cast %339 : vector<16xf32> to vector<16x1xf32>
    %cst_123 = arith.constant 3.200000e+01 : f32
    %341 = vector.broadcast %cst_123 : f32 to vector<16x1xf32>
    %342 = arith.divf %340, %341 : vector<16x1xf32>
    %cst_124 = arith.constant 9.99999974E-6 : f32
    %343 = vector.broadcast %cst_124 : f32 to vector<16x1xf32>
    %344 = arith.addf %342, %343 : vector<16x1xf32>
    %345 = math.rsqrt %344 : vector<16x1xf32>
    %346 = vector.broadcast %345 : vector<16x1xf32> to vector<16x32xf32>
    %347 = arith.mulf %337, %346 : vector<16x32xf32>
    %348 = vector.broadcast %330 : vector<1x32xf32> to vector<16x32xf32>
    %349 = arith.mulf %347, %348 : vector<16x32xf32>
    %350 = vector.broadcast %331 : vector<1x32xf32> to vector<16x32xf32>
    %351 = arith.addf %349, %350 : vector<16x32xf32>
    %c0_125 = arith.constant 0 : index
    %c0_126 = arith.constant 0 : index
    %352 = vector.load %arg20[%c0_125, %c0_126] : memref<16x32xf32, #tpu.memory_space<vmem>>, vector<16x32xf32>
    tpu.vector_store %arg20[%c0_125, %c0_126], %351 {strides = array<i32>} : memref<16x32xf32, #tpu.memory_space<vmem>>, vector<16x32xf32>,
    %c1_i32 = arith.constant 1 : i32
    %353 = arith.cmpi eq, %arg0, %c1_i32 : i32
    %354 = arith.extui %353 : i1 to i32
    %c0_i32_127 = arith.constant 0 : i32
    %355 = arith.cmpi ne, %354, %c0_i32_127 : i32
    scf.if %355 {
      %c0_128 = arith.constant 0 : index
      %c0_129 = arith.constant 0 : index
      %356 = vector.load %arg18[%c0_128, %c0_129] : memref<1x32xf32, #tpu.memory_space<vmem>>, vector<1x32xf32>
      %c0_130 = arith.constant 0 : index
      %c0_131 = arith.constant 0 : index
      %357 = vector.load %arg19[%c0_130, %c0_131] : memref<1x32xf32, #tpu.memory_space<vmem>>, vector<1x32xf32>
      %cst_132 = arith.constant dense<0.000000e+00> : vector<16xf32>
      %358 = vector.multi_reduction <add>, %351, %cst_132 [1] : vector<16x32xf32> to vector<16xf32>
      %359 = vector.shape_cast %358 : vector<16xf32> to vector<16x1xf32>
      %cst_133 = arith.constant 3.200000e+01 : f32
      %360 = vector.broadcast %cst_133 : f32 to vector<16x1xf32>
      %361 = arith.divf %359, %360 : vector<16x1xf32>
      %362 = vector.broadcast %361 : vector<16x1xf32> to vector<16x32xf32>
      %363 = arith.subf %351, %362 : vector<16x32xf32>
      %364 = arith.mulf %363, %363 : vector<16x32xf32>
      %cst_134 = arith.constant dense<0.000000e+00> : vector<16xf32>
      %365 = vector.multi_reduction <add>, %364, %cst_134 [1] : vector<16x32xf32> to vector<16xf32>
      %366 = vector.shape_cast %365 : vector<16xf32> to vector<16x1xf32>
      %cst_135 = arith.constant 3.200000e+01 : f32
      %367 = vector.broadcast %cst_135 : f32 to vector<16x1xf32>
      %368 = arith.divf %366, %367 : vector<16x1xf32>
      %cst_136 = arith.constant 9.99999974E-6 : f32
      %369 = vector.broadcast %cst_136 : f32 to vector<16x1xf32>
      %370 = arith.addf %368, %369 : vector<16x1xf32>
      %371 = math.rsqrt %370 : vector<16x1xf32>
      %372 = vector.broadcast %371 : vector<16x1xf32> to vector<16x32xf32>
      %373 = arith.mulf %363, %372 : vector<16x32xf32>
      %374 = vector.broadcast %356 : vector<1x32xf32> to vector<16x32xf32>
      %375 = arith.mulf %373, %374 : vector<16x32xf32>
      %376 = vector.broadcast %357 : vector<1x32xf32> to vector<16x32xf32>
      %377 = arith.addf %375, %376 : vector<16x32xf32>
      %c0_137 = arith.constant 0 : index
      %c0_138 = arith.constant 0 : index
      %378 = vector.load %arg20[%c0_137, %c0_138] : memref<16x32xf32, #tpu.memory_space<vmem>>, vector<16x32xf32>
      tpu.vector_store %arg20[%c0_137, %c0_138], %377 {strides = array<i32>} : memref<16x32xf32, #tpu.memory_space<vmem>>, vector<16x32xf32>,
    } else {
    }
    return
  }
  func.func @transform_0(%arg0: i32) -> (i32, i32) {
    %c0_i32 = arith.constant 0 : i32
    %c0_i32_0 = arith.constant 0 : i32
    %c0_i32_1 = arith.constant 0 : i32
    return %c0_i32, %c0_i32_0 : i32, i32
  }
  func.func @transform_1(%arg0: i32) -> (i32, i32) {
    %c0_i32 = arith.constant 0 : i32
    %c0_i32_0 = arith.constant 0 : i32
    %c0_i32_1 = arith.constant 0 : i32
    return %c0_i32, %c0_i32_0 : i32, i32
  }
  func.func @transform_2(%arg0: i32) -> (i32, i32) {
    %c0_i32 = arith.constant 0 : i32
    %c0_i32_0 = arith.constant 0 : i32
    %c0_i32_1 = arith.constant 0 : i32
    return %c0_i32, %c0_i32_0 : i32, i32
  }
  func.func @transform_3(%arg0: i32) -> (i32, i32, i32) {
    %c0_i32 = arith.constant 0 : i32
    %c0_i32_0 = arith.constant 0 : i32
    %c0_i32_1 = arith.constant 0 : i32
    return %arg0, %c0_i32, %c0_i32_0 : i32, i32, i32
  }
  func.func @transform_4(%arg0: i32) -> (i32, i32, i32) {
    %c0_i32 = arith.constant 0 : i32
    %c0_i32_0 = arith.constant 0 : i32
    %c0_i32_1 = arith.constant 0 : i32
    return %arg0, %c0_i32, %c0_i32_0 : i32, i32, i32
  }
  func.func @transform_5(%arg0: i32) -> (i32, i32, i32) {
    %c0_i32 = arith.constant 0 : i32
    %c0_i32_0 = arith.constant 0 : i32
    %c0_i32_1 = arith.constant 0 : i32
    return %arg0, %c0_i32, %c0_i32_0 : i32, i32, i32
  }
  func.func @transform_6(%arg0: i32) -> (i32, i32, i32) {
    %c0_i32 = arith.constant 0 : i32
    %c0_i32_0 = arith.constant 0 : i32
    %c0_i32_1 = arith.constant 0 : i32
    return %arg0, %c0_i32, %c0_i32_0 : i32, i32, i32
  }
  func.func @transform_7(%arg0: i32) -> (i32, i32, i32) {
    %c0_i32 = arith.constant 0 : i32
    %c0_i32_0 = arith.constant 0 : i32
    %c0_i32_1 = arith.constant 0 : i32
    return %arg0, %c0_i32, %c0_i32_0 : i32, i32, i32
  }
  func.func @transform_8(%arg0: i32) -> (i32, i32, i32) {
    %c0_i32 = arith.constant 0 : i32
    %c0_i32_0 = arith.constant 0 : i32
    %c0_i32_1 = arith.constant 0 : i32
    return %arg0, %c0_i32, %c0_i32_0 : i32, i32, i32
  }
  func.func @transform_9(%arg0: i32) -> (i32, i32, i32) {
    %c0_i32 = arith.constant 0 : i32
    %c0_i32_0 = arith.constant 0 : i32
    %c0_i32_1 = arith.constant 0 : i32
    return %arg0, %c0_i32, %c0_i32_0 : i32, i32, i32
  }
  func.func @transform_10(%arg0: i32) -> (i32, i32, i32) {
    %c0_i32 = arith.constant 0 : i32
    %c0_i32_0 = arith.constant 0 : i32
    %c0_i32_1 = arith.constant 0 : i32
    return %arg0, %c0_i32, %c0_i32_0 : i32, i32, i32
  }
  func.func @transform_11(%arg0: i32) -> (i32, i32, i32) {
    %c0_i32 = arith.constant 0 : i32
    %c0_i32_0 = arith.constant 0 : i32
    %c0_i32_1 = arith.constant 0 : i32
    return %arg0, %c0_i32, %c0_i32_0 : i32, i32, i32
  }
  func.func @transform_12(%arg0: i32) -> (i32, i32, i32) {
    %c0_i32 = arith.constant 0 : i32
    %c0_i32_0 = arith.constant 0 : i32
    %c0_i32_1 = arith.constant 0 : i32
    return %arg0, %c0_i32, %c0_i32_0 : i32, i32, i32
  }
  func.func @transform_13(%arg0: i32) -> (i32, i32, i32) {
    %c0_i32 = arith.constant 0 : i32
    %c0_i32_0 = arith.constant 0 : i32
    %c0_i32_1 = arith.constant 0 : i32
    return %arg0, %c0_i32, %c0_i32_0 : i32, i32, i32
  }
  func.func @transform_14(%arg0: i32) -> (i32, i32, i32) {
    %c0_i32 = arith.constant 0 : i32
    %c0_i32_0 = arith.constant 0 : i32
    %c0_i32_1 = arith.constant 0 : i32
    return %arg0, %c0_i32, %c0_i32_0 : i32, i32, i32
  }
  func.func @transform_15(%arg0: i32) -> (i32, i32, i32) {
    %c0_i32 = arith.constant 0 : i32
    %c0_i32_0 = arith.constant 0 : i32
    %c0_i32_1 = arith.constant 0 : i32
    return %arg0, %c0_i32, %c0_i32_0 : i32, i32, i32
  }
  func.func @transform_16(%arg0: i32) -> (i32, i32, i32) {
    %c0_i32 = arith.constant 0 : i32
    %c0_i32_0 = arith.constant 0 : i32
    %c0_i32_1 = arith.constant 0 : i32
    return %arg0, %c0_i32, %c0_i32_0 : i32, i32, i32
  }
  func.func @transform_17(%arg0: i32) -> (i32, i32) {
    %c0_i32 = arith.constant 0 : i32
    %c0_i32_0 = arith.constant 0 : i32
    %c0_i32_1 = arith.constant 0 : i32
    return %c0_i32, %c0_i32_0 : i32, i32
  }
  func.func @transform_18(%arg0: i32) -> (i32, i32) {
    %c0_i32 = arith.constant 0 : i32
    %c0_i32_0 = arith.constant 0 : i32
    %c0_i32_1 = arith.constant 0 : i32
    return %c0_i32, %c0_i32_0 : i32, i32
  }
  func.func @transform_19(%arg0: i32) -> (i32, i32) {
    %c0_i32 = arith.constant 0 : i32
    %c0_i32_0 = arith.constant 0 : i32
    %c0_i32_1 = arith.constant 0 : i32
    return %c0_i32, %c0_i32_0 : i32, i32
  }
}

</mosaic_0001>

<bundles_post_ra>
// kernel: tpu_custom_call.1
= control target key start
LH: loop header
LB: loop body
LE: loop exit
PB: predicated region body
PF: predicated region fallthrough
CT: control target
= control target key end

     0   :  { %s5748_s0 = inlined_call_operand.hbm [shape: f32[16,32], index: 0, kind: input, shape index: {}]   ;;  %s5749_s1 = inlined_call_operand.hbm [shape: bf16[32,32], index: 1, kind: input, shape index: {}]   ;;  %s5750_s2 = inlined_call_operand.hbm [shape: f32[8,8], index: 2, kind: input, shape index: {}]   ;;  %s5751_s3 = inlined_call_operand.vmem [shape: bf16[2,32,96], index: 3, kind: input, shape index: {}]   ;;  %s5752_s4 = inlined_call_operand.hbm [shape: f32[2,1,96], index: 4, kind: input, shape index: {}]   ;;  %s5753_s5 = inlined_call_operand.vmem [shape: bf16[2,32,32], index: 5, kind: input, shape index: {}]   ;;  %s5754_s6 = inlined_call_operand.hbm [shape: f32[2,1,32], index: 6, kind: input, shape index: {}]   ;;  %s5755_s7 = inlined_call_operand.vmem [shape: bf16[2,32,96], index: 7, kind: input, shape index: {}]   ;;  %s5756_s8 = inlined_call_operand.hbm [shape: f32[2,1,96], index: 8, kind: input, shape index: {}]   ;;  %s5757_s9 = inlined_call_operand.vmem [shape: bf16[2,32,32], index: 9, kind: input, shape index: {}]   ;;  %s5758_s10 = inlined_call_operand.hbm [shape: f32[2,1,32], index: 10, kind: input, shape index: {}]   ;;  %s5759_s11 = inlined_call_operand.hbm [shape: bf16[2,32,64], index: 11, kind: input, shape index: {}]   ;;  %s5760_s12 = inlined_call_operand.hbm [shape: f32[2,1,64], index: 12, kind: input, shape index: {}]   ;;  %s5761_s13 = inlined_call_operand.vmem [shape: bf16[2,64,32], index: 13, kind: input, shape index: {}]   ;;  %s5762_s14 = inlined_call_operand.vmem [shape: f32[2,1,32], index: 14, kind: input, shape index: {}]   ;;  %s5763_s15 = inlined_call_operand.vmem [shape: f32[2,3,32], index: 15, kind: input, shape index: {}]   ;;  %s5764_s16 = inlined_call_operand.vmem [shape: f32[2,3,32], index: 16, kind: input, shape index: {}]   ;;  %s5765_s17 = inlined_call_operand.vmem [shape: f32[1,32], index: 17, kind: input, shape index: {}]   ;;  %s5766_s18 = inlined_call_operand.vmem [shape: f32[1,32], index: 18, kind: input, shape index: {}]   ;;  %s5767_s19 = inlined_call_operand.hbm [shape: f32[16,32], index: 19, kind: output, shape index: {}]  }
   0x1   :  { %5796 = sst [smem:[#allocation30_spill]] %s5748_s0 }
   0x2   :  { %5797 = sst [smem:[#allocation31_spill]] %s5749_s1 }
   0x3   :  { %5798 = sst [smem:[#allocation32_spill]] %s5750_s2 }
   0x4   :  { %5799 = sst [smem:[#allocation33_spill]] %s5751_s3 }
   0x5   :  { %5800 = sst [smem:[#allocation34_spill]] %s5752_s4 }
   0x6   :  { %5801 = sst [smem:[#allocation35_spill]] %s5753_s5 }
   0x7   :  { %5802 = sst [smem:[#allocation36_spill]] %s5754_s6 }
   0x8   :  { %5803 = sst [smem:[#allocation37_spill]] %s5755_s7 }
   0x9   :  { %5804 = sst [smem:[#allocation38_spill]] %s5756_s8 }
   0xa   :  { %5805 = sst [smem:[#allocation39_spill]] %s5757_s9 }
   0xb   :  { %5806 = sst [smem:[#allocation40_spill]] %s5759_s11 }
   0xc   :  { %5807 = sst [smem:[#allocation41_spill]] %s5761_s13 }
   0xd   :  { %5808 = sst [smem:[#allocation42_spill]] %s5762_s14 }
   0xe   :  { %5809 = sst [smem:[#allocation43_spill]] %s5763_s15 }
   0xf   :  { %5810 = sst [smem:[#allocation44_spill]] %s5764_s16 }
  0x10   :  { %5811 = sst [smem:[#allocation45_spill]] %s5765_s17 }
  0x11   :  { %5812 = sst [smem:[#allocation46_spill]] %s5766_s18 }
  0x12   :  { %5813 = sst [smem:[#allocation47_spill]] %s5767_s19 }
  0x13   :  { %24 = vsyncpa [#allocation4], 0 }
  0x14   :  { %25 = vsyncpa [#allocation7], 0 }
  0x15   :  { %26 = vsyncpa [#allocation10], 0 }
  0x16   :  { %28 = vsyncpa [#allocation10 + $0x1], 0 }
  0x17   :  { %29 = vsyncpa [#allocation13], 0 }
  0x18   :  { %31 = vsyncpa [#allocation13 + $0x1], 0 }
  0x19   :  { %32 = vsyncpa [#allocation16], 0 }
  0x1a   :  { %34 = vsyncpa [#allocation16 + $0x1], 0 }
  0x1b   :  { %35 = vsyncpa [#allocation5], 0  ;;  %s4861_s0 = smov 0   ;;  %s4863_s30 = smov 0  }
  0x1c   :  { %s4865_s20 = smov 0   ;;  %s4867_s21 = smov 0  }
  0x1d LB: > { %5814 = sst [smem:[#allocation25_spill]] %s4720_s30  ;;  %s4880_s1 = sadd.s32 4294967295, %s4728_s21   ;;  %s4728_s21 = sphi %s4867_s21, %s5871_s21   ;;  %s4724_s20 = sphi %s4865_s20, %s5874_s20   ;;  %s4720_s30 = sphi %s4863_s30, %s5873_s30   ;;  %s4716_s0 = sphi %s4861_s0, %s5872_s0  }
  0x1e   : > { %5815 = sst [smem:[#allocation26_spill]] %s4724_s20  ;;  %s4883_s22 = sadd.s32 1, %s4728_s21  }
  0x1f   : > { %5816 = sst [smem:[#allocation27_spill]] %s4883_s22  ;;  %s134_s2 = ssub.s32 %s4728_s21, %s4883_s22 }
  0x20   : > { %s137_s23 = sadd.s32 1, %s4724_s20  ;;  %p135_p0 = scmp.eq.s32.totalorder %s134_s2, 0 }
  0x21   : > { %p144_p1 = scmp.ne.s32.totalorder %s4724_s20, %s4720_s30  ;;  %p145_p2 = scmp.eq.s32.totalorder %s4728_s21, 0 }
  0x22   : > { %p150_p3 = scmp.ne.s32.totalorder %s4720_s30, %s4716_s0  ;;  %p5775_p5 = scmp.eq.s32.totalorder %s4880_s1, 0 }
  0x23   : > { %s4893_s24 = scalar_select %p135_p0, %s4724_s20, %s137_s23  }
  0x24   : > { %p4895_p4 = por %p145_p2, %p144_p1  ;;  %p3719_p6 = scmp.ge.s32.totalorder %s4728_s21, 1 }
  0x25   : > { %5817 = sst [smem:[#allocation28_spill]] %s4893_s24  ;;  %p536_p7 = scmp.lt.s32.totalorder %s4728_s21, 3 }
  0x26   : > { %p4904_p8 = por %p5775_p5, %p150_p3  ;;  %s4730_s27 = smov [#allocation6]  }
  0x27   : > { %p4909_p10 = pnand %p3719_p6, %p536_p7  ;;  %s561_s28 = sshll.u32 %s4730_s27, 4  ;;  %s562_s28 = int_to_ptr.vmem [resolvable:$true] %s561_s28 }
  0x28   : > { %s5819_s3 = scalar_select %p4904_p8, 1, 0 }
  0x29   : > { %s5821_s26 = scalar_select %p4909_p10, 1, 0 }
  0x2a   : > { %5820 = sst [smem:[#allocation29_spill]] %s5819_s3  ;;  %p4193_p11 = pneg %p4909_p10 }
  0x2b   : > { %p4225_p13 = scmp.lt.s32.totalorder %s4728_s21, 2  ;;  %s4923_s0 = sand.u32 1, %s4728_s21  }
  0x2c   : > { %p4917_p12 = pnand %p4193_p11, %p5775_p5  ;;  %s4926_s2 = sand.u32 1, %s4724_s20  }
  0x2d   : > { %p4930_p0 = pnand %p4225_p13, %p4895_p4  ;;  %s5824_s22 = sld [smem:[#allocation31_spill]] }
  0x2e   : > { %s5822_s29 = scalar_select %p4917_p12, 1, 0 }
  0x2f   : > { %s5823_s23 = scalar_select %p4930_p0, 1, 0 }
  0x30   : > { %p4942_p2 = pneg %p4917_p12 }
  0x32   : > { %s5825_s16 = scalar_select %p4942_p2, 1, 0 }
  0x33   : > { %s4384_s19 = scalar_lea.hbm %s5824_s22, 256 }
  0x34   : > { %p4385_p1 = scmp.ne.s32.totalorder %s5824_s22, %s4384_s19  ;;  %p4391_p6 = scmp.lt.u32.totalorder %s4384_s19, %s5824_s22 }
  0x36   : > { %p4387_p3 = pnand %p4942_p2, %p4385_p1 }
  0x38   : > { %p4388_p4 = pneg %p4387_p3 }
  0x3a   : > { %p4393_p7 = pnand %p4391_p6, %p4388_p4 }
  0x3c   : > { %4396 = shalt.err (!%p4393_p7)
}
  0x3d   : > { %s4397_s24 = scalar_lea.vmem %s562_s28, 256  ;;  %p4405_p5 = scmp.lt.s32.totalorder %s562_s28, %s562_s28 }
  0x3e   : > { %p4398_p11 = scmp.ne.s32.totalorder %s562_s28, %s4397_s24  ;;  %p4406_p8 = scmp.lt.s32.totalorder %s4397_s24, %s4397_s24 }
  0x40   : > { %p4400_p13 = pnand %p4398_p11, %p4942_p2  ;;  %p4407_p10 = por %p4406_p8, %p4405_p5 }
  0x42   : > { %p4401_p9 = pneg %p4400_p13 }
  0x44   : > { %p4408_p0 = pnand %p4407_p10, %p4401_p9 }
  0x46   : > { %4411 = shalt.err (!%p4408_p0)
}
  0x47   : > { %s5779_s17 = smov 64   ;;  %s5784_s18 = smov 4  }
  0x48   : > { %4199 = dma.hbm_to_vmem [thread:$0]  (!%p4917_p12), %s5824_s22, 256, %s562_s28, [#allocation7], %s5779_s17, %s5779_s17, %s5784_s18  }
  0x49   : > { %s4962_s27 = sshll.u32 %s4728_s21, 4  ;;  %s5826_s4 = sld [smem:[#allocation34_spill]] }
  0x4a   : > { %s603_s14 = scalar_lea.vmem [#allocation9], %s4926_s2  ;;  %s5785_s9 = scalar_lea.sflag [#allocation10], %s4923_s0 }
  0x4b   : > { %s610_s13 = sshll.u32 %s603_s14, 4  ;;  %p5827_p8 = scmp.ne.s32.totalorder %s5823_s23, 0  ;;  %s4971_s13 = int_to_ptr.vmem [resolvable:$true] %s610_s13 }
  0x4d   : > { %p4978_p9 = pneg %p5827_p8 }
  0x4f   : > { %s4968_s15 = scalar_lea.hbm %s5826_s4, %s4962_s27  ;;  %s4417_s25 = scalar_lea.hbm %s5826_s4, 32 }
  0x50   : > { %s4412_s7 = scalar_lea.hbm %s4968_s15, 16  ;;  %p4418_p1 = scmp.lt.u32.totalorder %s4968_s15, %s5826_s4 }
  0x51   : > { %p4413_p5 = scmp.ne.s32.totalorder %s4968_s15, %s4412_s7  ;;  %p4419_p3 = scmp.lt.u32.totalorder %s4417_s25, %s4412_s7 }
  0x52   : > { %s5828_s28 = scalar_select %p4978_p9, 1, 0 }
  0x53   : > { %p4415_p10 = pnand %p4978_p9, %p4413_p5  ;;  %p4420_p4 = por %p4419_p3, %p4418_p1 }
  0x54   : > { %p4421_p6 = scmp.lt.u32.totalorder %s4412_s7, %s4968_s15 }
  0x55   : > { %p4416_p0 = pneg %p4415_p10 }
  0x56   : > { %p4422_p7 = por %p4421_p6, %p4420_p4 }
  0x58   : > { %p4423_p11 = pnand %p4422_p7, %p4416_p0 }
  0x5a   : > { %4426 = shalt.err (!%p4423_p11)
}
  0x5b   : > { %s4427_s17 = scalar_lea.vmem %s4971_s13, 16  ;;  %s4733_s19 = smov [#allocation9]  }
  0x5c   : > { %p4428_p13 = scmp.ne.s32.totalorder %s4971_s13, %s4427_s17  ;;  %s4432_s20 = sshll.u32 %s4733_s19, 4  ;;  %s4433_s20 = int_to_ptr.vmem [resolvable:$false] %s4432_s20 }
  0x5d   : > { %s4434_s24 = scalar_lea.vmem %s4433_s20, 32  ;;  %p4435_p12 = scmp.lt.s32.totalorder %s4971_s13, %s4433_s20 }
  0x5e   : > { %p4430_p5 = pnand %p4428_p13, %p4978_p9  ;;  %p4436_p2 = scmp.lt.s32.totalorder %s4434_s24, %s4427_s17 }
  0x60   : > { %p4431_p10 = pneg %p4430_p5  ;;  %p4437_p1 = por %p4436_p2, %p4435_p12 }
  0x62   : > { %p4438_p3 = pnand %p4437_p1, %p4431_p10 }
  0x64   : > { %4441 = shalt.err (!%p4438_p3)
}
  0x65   : > { %4206 = dma.hbm_to_vmem [thread:$0]  (!%p5827_p8), %s4968_s15, 16, %s4971_s13, %s5785_s9  }
  0x66   : > { %s5829_s8 = sld [smem:[#allocation38_spill]]  ;;  %s653_s17 = scalar_lea.vmem [#allocation12], %s4926_s2 }
  0x67   : > { %s660_s19 = sshll.u32 %s653_s17, 4  ;;  %s3728_s20 = sshll.u32 %s4926_s2, 4  ;;  %s5010_s19 = int_to_ptr.vmem [resolvable:$true] %s660_s19 }
  0x68   : > { %s5786_s24 = scalar_lea.sflag [#allocation13], %s4923_s0 }
  0x6c   : > { %s5007_s14 = scalar_lea.hbm %s5829_s8, %s4962_s27  ;;  %s4447_s7 = scalar_lea.hbm %s5829_s8, 32 }
  0x6d   : > { %s4442_s18 = scalar_lea.hbm %s5007_s14, 16  ;;  %p4448_p4 = scmp.lt.u32.totalorder %s5007_s14, %s5829_s8 }
  0x6e   : > { %p4443_p12 = scmp.ne.s32.totalorder %s5007_s14, %s4442_s18  ;;  %p4449_p6 = scmp.lt.u32.totalorder %s4447_s7, %s4442_s18 }
  0x6f   : > { %p4451_p11 = scmp.lt.u32.totalorder %s4442_s18, %s5007_s14 }
  0x70   : > { %p4445_p2 = pnand %p4443_p12, %p4978_p9  ;;  %p4450_p7 = por %p4449_p6, %p4448_p4 }
  0x72   : > { %p4446_p0 = pneg %p4445_p2  ;;  %p4452_p13 = por %p4451_p11, %p4450_p7 }
  0x74   : > { %p4453_p5 = pnand %p4452_p13, %p4446_p0 }
  0x76   : > { %4456 = shalt.err (!%p4453_p5)
}
  0x77   : > { %s4457_s17 = scalar_lea.vmem %s5010_s19, 16  ;;  %s4734_s13 = smov [#allocation12]  }
  0x78   : > { %p4458_p10 = scmp.ne.s32.totalorder %s5010_s19, %s4457_s17  ;;  %s4462_s15 = sshll.u32 %s4734_s13, 4  ;;  %s4463_s15 = int_to_ptr.vmem [resolvable:$false] %s4462_s15 }
  0x79   : > { %s4464_s9 = scalar_lea.vmem %s4463_s15, 32  ;;  %p4465_p12 = scmp.lt.s32.totalorder %s5010_s19, %s4463_s15 }
  0x7a   : > { %p4460_p1 = pnand %p4458_p10, %p4978_p9  ;;  %p4466_p2 = scmp.lt.s32.totalorder %s4464_s9, %s4457_s17 }
  0x7c   : > { %p4461_p3 = pneg %p4460_p1  ;;  %p4467_p4 = por %p4466_p2, %p4465_p12 }
  0x7e   : > { %p4468_p6 = pnand %p4467_p4, %p4461_p3 }
  0x80   : > { %4471 = shalt.err (!%p4468_p6)
}
  0x81   : > { %4212 = dma.hbm_to_vmem [thread:$0]  (!%p5827_p8), %s5007_s14, 16, %s5010_s19, %s5786_s24  }
  0x82   : > { %s3819_s18 = sshll.u32 %s4728_s21, 8  ;;  %s5830_s11 = sld [smem:[#allocation40_spill]] }
  0x83   : > { %s696_s17 = scalar_lea.vmem [#allocation15], %s3728_s20  ;;  %s5789_s9 = scalar_lea.sflag [#allocation16], %s4923_s0 }
  0x84   : > { %s703_s15 = sshll.u32 %s696_s17, 4  ;;  %s5045_s15 = int_to_ptr.vmem [resolvable:$true] %s703_s15 }
  0x88   : > { %s5041_s13 = scalar_lea.hbm %s5830_s11, %s3819_s18  ;;  %s4477_s19 = scalar_lea.hbm %s5830_s11, 512 }
  0x89   : > { %s4472_s4 = scalar_lea.hbm %s5041_s13, 256  ;;  %p4478_p13 = scmp.lt.u32.totalorder %s5041_s13, %s5830_s11 }
  0x8a   : > { %p4473_p0 = scmp.ne.s32.totalorder %s5041_s13, %s4472_s4  ;;  %p4479_p5 = scmp.lt.u32.totalorder %s4477_s19, %s4472_s4 }
  0x8b   : > { %p4481_p1 = scmp.lt.u32.totalorder %s4472_s4, %s5041_s13 }
  0x8c   : > { %p4475_p7 = pnand %p4473_p0, %p4978_p9  ;;  %p4480_p10 = por %p4479_p5, %p4478_p13 }
  0x8e   : > { %p4476_p11 = pneg %p4475_p7  ;;  %p4482_p3 = por %p4481_p1, %p4480_p10 }
  0x90   : > { %p4483_p12 = pnand %p4482_p3, %p4476_p11 }
  0x92   : > { %4486 = shalt.err (!%p4483_p12)
}
  0x93   : > { %s4487_s20 = scalar_lea.vmem %s5045_s15, 256  ;;  %s4735_s25 = smov [#allocation15]  }
  0x94   : > { %p4488_p2 = scmp.ne.s32.totalorder %s5045_s15, %s4487_s20  ;;  %s4492_s17 = sshll.u32 %s4735_s25, 4  ;;  %s4493_s17 = int_to_ptr.vmem [resolvable:$false] %s4492_s17 }
  0x95   : > { %s4494_s21 = scalar_lea.vmem %s4493_s17, 512  ;;  %p4495_p0 = scmp.lt.s32.totalorder %s5045_s15, %s4493_s17 }
  0x96   : > { %p4490_p4 = pnand %p4488_p2, %p4978_p9  ;;  %p4496_p7 = scmp.lt.s32.totalorder %s4494_s21, %s4487_s20 }
  0x98   : > { %p4491_p6 = pneg %p4490_p4  ;;  %p4497_p13 = por %p4496_p7, %p4495_p0 }
  0x9a   : > { %p4498_p5 = pnand %p4497_p13, %p4491_p6 }
  0x9c   : > { %4501 = shalt.err (!%p4498_p5)
}
  0x9d   : > { %s5831_s4 = smov 4   ;;  %s5832_s14 = smov 64  }
  0x9e   : > { %4218 = dma.hbm_to_vmem [thread:$0]  (!%p5827_p8), %s5041_s13, 256, %s5045_s15, %s5789_s9, %s5832_s14, %s5832_s14, %s5831_s4  }
  0x9f   : > { %s4736_s19 = smov [#allocation3]   ;;  %s5833_s20 = sld [smem:[#allocation30_spill]] }
  0xa0   : > { %s548_s18 = sshll.u32 %s4736_s19, 4  ;;  %p5835_p10 = scmp.ne.s32.totalorder %s5825_s16, 0  ;;  %s549_s18 = int_to_ptr.vmem [resolvable:$true] %s548_s18 }
  0xa5   : > { %s5834_s17 = smov %s5833_s20  ;;  %s4502_s21 = scalar_lea.hbm %s5833_s20, 256 }
  0xa6   : > { %p4503_p11 = scmp.ne.s32.totalorder %s5834_s17, %s4502_s21  ;;  %p4509_p12 = scmp.lt.u32.totalorder %s4502_s21, %s5834_s17 }
  0xa8   : > { %p4505_p1 = pnand %p4503_p11, %p5835_p10 }
  0xaa   : > { %p4506_p3 = pneg %p4505_p1 }
  0xac   : > { %p4511_p2 = pnand %p4509_p12, %p4506_p3 }
  0xae   : > { %4514 = shalt.err (!%p4511_p2)
}
  0xaf   : > { %s4515_s13 = scalar_lea.vmem %s549_s18, 256  ;;  %p4523_p7 = scmp.lt.s32.totalorder %s549_s18, %s549_s18 }
  0xb0   : > { %p4516_p4 = scmp.ne.s32.totalorder %s549_s18, %s4515_s13  ;;  %p4524_p13 = scmp.lt.s32.totalorder %s4515_s13, %s4515_s13 }
  0xb2   : > { %p4518_p6 = pnand %p4516_p4, %p5835_p10  ;;  %p4525_p5 = por %p4524_p13, %p4523_p7 }
  0xb4   : > { %p4519_p0 = pneg %p4518_p6 }
  0xb6   : > { %p4526_p8 = pnand %p4525_p5, %p4519_p0 }
  0xb8   : > { %4529 = shalt.err (!%p4526_p8)
}
  0xb9   : > { %s4737_s8 = smov 128   ;;  %s4738_s11 = smov 8  }
  0xba   : > { %p5836_p11 = scmp.ne.s32.totalorder %s5822_s29, 0  ;;  %s4739_s15 = smov [#allocation8]  }
  0xbb   : > { %s575_s4 = sshll.u32 %s4739_s15, 4  ;;  %s5837_s6 = sld [smem:[#allocation36_spill]]  ;;  %s576_s4 = int_to_ptr.vmem [resolvable:$true] %s575_s4 }
  0xbc   : > { %4196 = dma.hbm_to_vmem [thread:$0]  (!%p5836_p11), %s5834_s17, 256, %s549_s18, [#allocation4], %s4737_s8, %s4737_s8, %s4738_s11  }
  0xbd   : > { %s628_s25 = scalar_lea.vmem [#allocation11], %s4926_s2  ;;  %s5838_s9 = sld [smem:[#allocation32_spill]] }
  0xbe   : > { %s635_s20 = sshll.u32 %s628_s25, 4  ;;  %s636_s20 = int_to_ptr.vmem [resolvable:$true] %s635_s20 }
  0xc1   : > { %s5096_s7 = scalar_lea.hbm %s5837_s6, %s4962_s27 }
  0xc3   : > { %s4530_s5 = scalar_lea.hbm %s5838_s9, 128 }
  0xc4   : > { %p4531_p8 = scmp.ne.s32.totalorder %s5838_s9, %s4530_s5  ;;  %p4537_p12 = scmp.lt.u32.totalorder %s4530_s5, %s5838_s9 }
  0xc6   : > { %p4533_p1 = pnand %p4531_p8, %p5835_p10 }
  0xc8   : > { %p4534_p3 = pneg %p4533_p1 }
  0xca   : > { %p4539_p2 = pnand %p4537_p12, %p4534_p3 }
  0xcc   : > { %4542 = shalt.err (!%p4539_p2)
}
  0xcd   : > { %s4543_s11 = scalar_lea.vmem %s576_s4, 128  ;;  %p4551_p7 = scmp.lt.s32.totalorder %s576_s4, %s576_s4 }
  0xce   : > { %p4544_p4 = scmp.ne.s32.totalorder %s576_s4, %s4543_s11  ;;  %p4552_p13 = scmp.lt.s32.totalorder %s4543_s11, %s4543_s11 }
  0xd0   : > { %p4546_p6 = pnand %p4544_p4, %p5835_p10  ;;  %p4553_p5 = por %p4552_p13, %p4551_p7 }
  0xd2   : > { %p4547_p0 = pneg %p4546_p6 }
  0xd4   : > { %p4554_p9 = pnand %p4553_p5, %p4547_p0 }
  0xd6   : > { %4557 = shalt.err (!%p4554_p9)
}
  0xd7   : > { %4202 = dma.hbm_to_vmem [thread:$0]  (!%p5836_p11), %s5838_s9, 128, %s576_s4, [#allocation7]  }
  0xd8   : > { %s4558_s5 = scalar_lea.hbm %s5096_s7, 16  ;;  %p5839_p8 = scmp.ne.s32.totalorder %s5828_s28, 0 }
  0xd9   : > { %p4559_p10 = scmp.ne.s32.totalorder %s5096_s7, %s4558_s5  ;;  %s4563_s24 = scalar_lea.hbm %s5837_s6, 32 }
  0xda   : > { %p4564_p9 = scmp.lt.u32.totalorder %s5096_s7, %s5837_s6  ;;  %p4565_p12 = scmp.lt.u32.totalorder %s4563_s24, %s4558_s5 }
  0xdb   : > { %p4561_p1 = pnand %p4559_p10, %p5839_p8  ;;  %p4567_p4 = scmp.lt.u32.totalorder %s4558_s5, %s5096_s7 }
  0xdc   : > { %p4566_p2 = por %p4565_p12, %p4564_p9 }
  0xdd   : > { %p4562_p3 = pneg %p4561_p1 }
  0xde   : > { %p4568_p6 = por %p4567_p4, %p4566_p2 }
  0xe0   : > { %p4569_p0 = pnand %p4568_p6, %p4562_p3 }
  0xe2   : > { %4572 = shalt.err (!%p4569_p0)
}
  0xe3   : > { %s4573_s4 = scalar_lea.vmem %s636_s20, 16  ;;  %s4740_s14 = smov [#allocation11]  }
  0xe4   : > { %p4574_p11 = scmp.ne.s32.totalorder %s636_s20, %s4573_s4  ;;  %s4578_s19 = sshll.u32 %s4740_s14, 4  ;;  %s4579_s19 = int_to_ptr.vmem [resolvable:$false] %s4578_s19 }
  0xe5   : > { %s4580_s25 = scalar_lea.vmem %s4579_s19, 32  ;;  %p4581_p5 = scmp.lt.s32.totalorder %s636_s20, %s4579_s19 }
  0xe6   : > { %p4576_p7 = pnand %p4574_p11, %p5839_p8  ;;  %p4582_p10 = scmp.lt.s32.totalorder %s4580_s25, %s4573_s4 }
  0xe8   : > { %p4577_p13 = pneg %p4576_p7  ;;  %p4583_p1 = por %p4582_p10, %p4581_p5 }
  0xea   : > { %p4584_p9 = pnand %p4583_p1, %p4577_p13 }
  0xec   : > { %4587 = shalt.err (!%p4584_p9)
}
  0xed   : > { %p5840_p12 = scmp.ne.s32.totalorder %s5823_s23, 0  ;;  %s5841_s21 = scalar_lea.sflag [#allocation10], %s4923_s0 }
  0xee   : > { %s5140_s8 = scalar_lea.hbm %s5758_s10, %s4962_s27  ;;  %s678_s11 = scalar_lea.vmem [#allocation14], %s4926_s2 }
  0xef   : > { %4209 = dma.hbm_to_vmem [thread:$0]  (!%p5840_p12), %s5096_s7, 16, %s636_s20, %s5841_s21  }
  0xf0   : > { %s685_s30 = sshll.u32 %s678_s11, 4  ;;  %s4588_s3 = scalar_lea.hbm %s5140_s8, 16  ;;  %s686_s30 = int_to_ptr.vmem [resolvable:$true] %s685_s30 }
  0xf1   : > { %p4589_p3 = scmp.ne.s32.totalorder %s5140_s8, %s4588_s3  ;;  %s4593_s7 = scalar_lea.hbm %s5758_s10, 32 }
  0xf2   : > { %p4594_p6 = scmp.lt.u32.totalorder %s5140_s8, %s5758_s10  ;;  %p4595_p0 = scmp.lt.u32.totalorder %s4593_s7, %s4588_s3 }
  0xf3   : > { %p4591_p2 = pnand %p4589_p3, %p5839_p8  ;;  %p4597_p7 = scmp.lt.u32.totalorder %s4588_s3, %s5140_s8 }
  0xf4   : > { %p4596_p11 = por %p4595_p0, %p4594_p6 }
  0xf5   : > { %p4592_p4 = pneg %p4591_p2 }
  0xf6   : > { %p4598_p13 = por %p4597_p7, %p4596_p11 }
  0xf8   : > { %p4599_p5 = pnand %p4598_p13, %p4592_p4 }
  0xfa   : > { %4602 = shalt.err (!%p4599_p5)
}
  0xfb   : > { %s4603_s24 = scalar_lea.vmem %s686_s30, 16  ;;  %s4741_s29 = smov [#allocation14]  }
  0xfc   : > { %p4604_p10 = scmp.ne.s32.totalorder %s686_s30, %s4603_s24  ;;  %s4608_s15 = sshll.u32 %s4741_s29, 4  ;;  %s4609_s15 = int_to_ptr.vmem [resolvable:$false] %s4608_s15 }
  0xfd   : > { %s4610_s4 = scalar_lea.vmem %s4609_s15, 32  ;;  %p4611_p3 = scmp.lt.s32.totalorder %s686_s30, %s4609_s15 }
  0xfe   : > { %p4606_p1 = pnand %p4604_p10, %p5839_p8  ;;  %p4612_p2 = scmp.lt.s32.totalorder %s4610_s4, %s4603_s24 }
 0x100   : > { %p4607_p9 = pneg %p4606_p1  ;;  %p4613_p12 = por %p4612_p2, %p4611_p3 }
 0x102   : > { %p4614_p0 = pnand %p4613_p12, %p4607_p9 }
 0x104   : > { %4617 = shalt.err (!%p4614_p0)
}
 0x105   : > { %p5842_p6 = scmp.ne.s32.totalorder %s5823_s23, 0  ;;  %s5843_s14 = scalar_lea.sflag [#allocation13], %s4923_s0 }
 0x106   : > { %s5166_s21 = scalar_lea.hbm %s5760_s12, %s4962_s27  ;;  %s716_s13 = scalar_lea.vmem [#allocation17], %s4926_s2 }
 0x107   : > { %4215 = dma.hbm_to_vmem [thread:$0]  (!%p5842_p6), %s5140_s8, 16, %s686_s30, %s5843_s14  }
 0x108   : > { %s723_s18 = sshll.u32 %s716_s13, 4  ;;  %s4618_s11 = scalar_lea.hbm %s5166_s21, 16  ;;  %s724_s18 = int_to_ptr.vmem [resolvable:$true] %s723_s18 }
 0x109   : > { %p4619_p12 = scmp.ne.s32.totalorder %s5166_s21, %s4618_s11  ;;  %s4623_s8 = scalar_lea.hbm %s5760_s12, 32 }
 0x10a   : > { %p4624_p7 = scmp.lt.u32.totalorder %s5166_s21, %s5760_s12  ;;  %p4625_p13 = scmp.lt.u32.totalorder %s4623_s8, %s4618_s11 }
 0x10b   : > { %p4621_p4 = pnand %p4619_p12, %p5839_p8  ;;  %p4627_p10 = scmp.lt.u32.totalorder %s4618_s11, %s5166_s21 }
 0x10c   : > { %p4626_p5 = por %p4625_p13, %p4624_p7 }
 0x10d   : > { %p4622_p11 = pneg %p4621_p4 }
 0x10e   : > { %p4628_p1 = por %p4627_p10, %p4626_p5 }
 0x110   : > { %p4629_p9 = pnand %p4628_p1, %p4622_p11 }
 0x112   : > { %4632 = shalt.err (!%p4629_p9)
}
 0x113   : > { %s4633_s2 = scalar_lea.vmem %s724_s18, 16  ;;  %s4742_s27 = smov [#allocation17]  }
 0x114   : > { %p4634_p3 = scmp.ne.s32.totalorder %s724_s18, %s4633_s2  ;;  %s4638_s7 = sshll.u32 %s4742_s27, 4  ;;  %s4639_s7 = int_to_ptr.vmem [resolvable:$false] %s4638_s7 }
 0x115   : > { %s4640_s20 = scalar_lea.vmem %s4639_s7, 32  ;;  %p4641_p12 = scmp.lt.s32.totalorder %s724_s18, %s4639_s7 }
 0x116   : > { %p4636_p2 = pnand %p4634_p3, %p5839_p8  ;;  %p4642_p4 = scmp.lt.s32.totalorder %s4640_s20, %s4633_s2 }
 0x118   : > { %p4637_p0 = pneg %p4636_p2  ;;  %p4643_p6 = por %p4642_p4, %p4641_p12 }
 0x11a   : > { %p4644_p7 = pnand %p4643_p6, %p4637_p0 }
 0x11c   : > { %4647 = shalt.err (!%p4644_p7)
}
 0x11d   : > { %p5844_p13 = scmp.ne.s32.totalorder %s5823_s23, 0  ;;  %s5845_s22 = scalar_lea.sflag [#allocation16], %s4923_s0 }
 0x11e   : > { %p5846_p11 = scmp.ne.s32.totalorder %s5821_s26, 0 }
 0x11f   : > { %4221 = dma.hbm_to_vmem [thread:$0]  (!%p5844_p13), %s5166_s21, 16, %s724_s18, %s5845_s22  }
 0x120   : > { %760 = sbr.rel (%p5846_p11) target bundleno = 8024 (0x1f58), region = 96  ;;  %p5847_p8 = scmp.eq.s32.totalorder (!%p5846_p11), %s4880_s1, 0 }
 0x127   : > { %4691 = dma.done.wait (%p5847_p8), [#allocation4], 256   ;;  %p5848_p5 = pmov %p5847_p8 }
 0x129   : > { %4693 = vsyncadd (%p5848_p5), [#allocation4], 4294967040  ;;  %p5849_p10 = pmov %p5848_p5 }
 0x12a   : > { %p5850_p6 = pmov %p5848_p5 }
 0x12b   : > { %4695 = dma.done.wait (%p5849_p10), [#allocation7], 384  }
 0x12c   : > { %4697 = vsyncadd (%p5850_p6), [#allocation7], 4294966912  ;;  %s5851_s23 = sld [smem:[#allocation25_spill]]  ;;  %s5852_s0 = sld [smem:[#allocation29_spill]] }
 0x12d   : > { %s774_s28 = sand.u32 1, %s4880_s1  }
 0x12e   : > { %s775_s26 = scalar_lea.sflag [#allocation10], %s774_s28 }
 0x132   : > { %s5200_s24 = sand.u32 1, %s5851_s23   ;;  %p5853_p1 = scmp.ne.s32.totalorder %s5852_s0, 0 }
 0x134   : > { %4699 = dma.done.wait (%p5853_p1), %s775_s26, 32  }
 0x135   : > { %4701 = vsyncadd (%p5853_p1), %s775_s26, 4294967264  ;;  %s791_s4 = scalar_lea.sflag [#allocation13], %s774_s28 }
 0x136   : > { %4703 = dma.done.wait (%p5853_p1), %s791_s4, 32  }
 0x137   : > { %4705 = vsyncadd (%p5853_p1), %s791_s4, 4294967264  ;;  %s3736_s19 = sshll.u32 %s5200_s24, 4  ;;  %s807_s21 = scalar_lea.sflag [#allocation16], %s774_s28 }
 0x138   : > { %s5215_s13 = scalar_lea.vmem [#allocation15], %s3736_s19 }
 0x139   : > { %4707 = dma.done.wait (%p5853_p1), %s807_s21, 272  }
 0x13a   : > { %4709 = vsyncadd (%p5853_p1), %s807_s21, 4294967024  ;;  %p924_p9 = scmp.lt.s32.totalorder %s4880_s1, 1  ;;  %s5854_s30 = sld [smem:[#allocation33_spill]] }
 0x13b   : > { %s5855_s7 = sld [smem:[#allocation35_spill]]  ;;  %s5856_s0 = sld [smem:[#allocation37_spill]] }
 0x13c   : > { %s5223_s18 = scalar_select %p924_p9, %s4880_s1, 1 }
 0x13d   : > { %s5857_s19 = sld [smem:[#allocation39_spill]]  ;;  %s5858_s15 = sld [smem:[#allocation41_spill]] }
 0x13e   : > { %s3820_s11 = sshll.u32 %s5223_s18, 4  ;;  %s3824_s3 = sshll.u32 %s5223_s18, 5 }
 0x13f   : > { %s5859_s2 = sld [smem:[#allocation42_spill]]  ;;  %s5860_s22 = sld [smem:[#allocation43_spill]] }
 0x140   : > { %s928_s16 = scalar_lea.vmem %s5854_s30, %s3820_s11  ;;  %s5861_s26 = sld [smem:[#allocation44_spill]] }
 0x141   : > { %s5233_s20 = scalar_lea.vmem %s5855_s7, %s3820_s11  ;;  %s5238_s28 = scalar_lea.vmem %s5856_s0, %s3820_s11 }
 0x142   : > { %s3747_s7 = sshll.u32 %s5223_s18, 2  ;;  %s818_s4 = scalar_lea.vmem [#allocation17], %s5200_s24 }
 0x143   : > { %s5243_s21 = scalar_lea.vmem %s5857_s19, %s3820_s11  ;;  %s5248_s5 = scalar_lea.vmem %s5858_s15, %s3824_s3 }
 0x144   : > { %p5862_p3 = scmp.ne.s32.totalorder %s4880_s1, 0 }
 0x145   : > { %s951_s27 = scalar_lea.vmem %s5859_s2, %s5223_s18  ;;  %s5258_s23 = scalar_lea.vmem %s5860_s22, %s3747_s7  ;;  %v965_v0 = vld [vmem:[#allocation3] sm:$0xff] (!%p5862_p3)  ;;  %vm967_vm0 = vcmask (!%p5862_p3), 261120   ;;  %v966_v1 = vld [vmem:[#allocation3 + $0x8] sm:$0xff] (!%p5862_p3) }
 0x146   : > { %s5263_s11 = scalar_lea.vmem %s5861_s26, %s3747_s7  ;;  %964 = sbr.rel (%p5862_p3) target bundleno = 333 (0x14d), region = 136  ;;  %968 = vst.msk [vmem:[#allocation18] sm:$0xff] (!%p5862_p3), %vm967_vm0, %v965_v0  ;;  %969 = vst.msk [vmem:[#allocation18 + $0x8] sm:$0xff] (!%p5862_p3), %vm967_vm0, %v966_v1 }
 0x14d PF: > { %v4288_v2 = vld [vmem:[%s928_s16] sm:$0xff]   ;;  %v4743_v3 = vmov 0.0   ;;  %v4289_v4 = vld [vmem:[%s928_s16 + $0x8] sm:$0xff]   ;;  %vm4744_vm1 = vmmov 0   ;;  %vm1003_vm2 = vcmask 261120   ;;  %s5863_s6 = scalar_lea.vmem [#allocation9], %s5200_s24 }
 0x14e   : > { %3913 = vmatprep.subr.bf16.mxu1 %v4743_v3  ;;  %3927 = vmatprep.subr.bf16.mxu0 %v4743_v3  ;;  %v5272_v5 = vld [vmem:[#allocation18] sm:$0xff]  ;;  %v5274_v6 = vld [vmem:[#allocation18 + $0x8] sm:$0xff]  ;;  %s4745_s9 = smov 96   ;;  %vm1058_vm3 = vcmask 64512   ;;  %s4746_s29 = smov 64   ;;  %vm1183_vm4 = vcmask 1043456  }
 0x14f   : > { %3914 = vmatpush3.bf16.msra.mxu1 %v4288_v2  ;;  %3917 = vmatprep.mubr.msk.bf16.mxu1 %vm4744_vm1, %v4743_v3  ;;  %v983_v7 = vpack.c.bf16 %v5274_v6, %v5272_v5  ;;  %v3750_v8 = vld [vmem:[%s5863_s6] ss:$0 sm:$0xff]  ;;  %v5307_v21 = vld [vmem:[#allocation8] sm:$0xff]  ;;  %s4747_s15 = smov 88   ;;  %s4748_s14 = smov 120   ;;  %vm1502_vm5 = vcmask 130112  }
 0x150   : > { %3915 = vmatprep.subr.bf16.mxu1 %v4743_v3  ;;  %3929 = vmatprep.mubr.msk.bf16.mxu0 %vm4744_vm1, %v4743_v3  ;;  %s4749_s25 = smov 56   ;;  %s4750_s3 = smov 80   ;;  %vm1729_vm6 = vcmask 195712   ;;  %vm1956_vm7 = vcmask 261312   ;;  %vm2305_vm8 = vcmask 130048   ;;  %vm3307_vm9 = vcmask 523264  }
 0x151   : > { %s4751_s16 = smov 112   ;;  %s4752_s19 = smov 48  }
 0x152   : > { %s4753_s8 = smov 72   ;;  %s4754_s30 = smov 104  }
 0x153   : > { %3916 = vmatpush3.bf16.msra.mxu1 %v4289_v4  ;;  %s4755_s2 = smov 40   ;;  %s4756_s7 = smov 8  }
 0x154   : > { %3921 = vmatprep.subr.bf16.mxu1 %v4743_v3  ;;  %s4757_s22 = smov 16   ;;  %s4758_s0 = smov 24  }
 0x155   : > { %p3812_p2 = scmp.ne.s32.totalorder %s4880_s1, 1 }
 0x156   : > { %3918 = vmatmul.mubr.msk.bf16.vlgmr.msra.gmra.mrb[0].mxu1 %vm1003_vm2, %v983_v7 }
 0x157   : > { %3923 = vmatprep.mubr.msk.bf16.mxu1 %vm4744_vm1, %v4743_v3 }
 0x229   : > { %v1041_v9 = vpop.f32.mrb[0].mxu1 }
 0x22a   : > { %v1042_v10 = vadd.f32 %v3750_v8, %v1041_v9  ;;  %v3919_v11 = vpop.f32.mrb[1].mxu1 }
 0x22b   : > { %v1044_v12 = vpop.f32.mrb[2].mxu1 }
 0x22c   : > { %v5287_v13 = vpack.c.bf16 %v1042_v10, %v1042_v10  ;;  %v1045_v14 = vadd.f32 %v3750_v8, %v1044_v12  ;;  %v3920_v15 = vpop.f32.mrb[3].mxu1 }
 0x22e   : > { %1056 = vrot.lane.b32.xlu0 %v5287_v13, %s4745_s9  ;;  %v5291_v16 = vpack.c.bf16 %v1045_v14, %v1045_v14 }
 0x232   : > { %1106 = vrot.lane.b32.xlu0 %v5291_v16, %s4745_s9 }
 0x2a0   : > { %v1057_v17 = vpop.permute.xlu0 %1056 }
 0x2a1   : > { %v1063_v18 = vsel %vm1058_vm3, %v1057_v17, 0 }
 0x2a2   : > { %3922 = vmatpush3.bf16.xpose.msra.mxu1 %v1063_v18 }
 0x2a3   : > { %3933 = vmatprep.subr.bf16.mxu1 %v4743_v3 }
 0x2a4   : > { %v1107_v19 = vpop.permute.xlu0 %1106 }
 0x2a5   : > { %v1112_v20 = vsel %vm1058_vm3, %v1107_v19, 0 }
 0x2a6   : > { %3928 = vmatpush3.bf16.xpose.msra.mxu0 %v1112_v20 }
 0x2a7   : > { %3939 = vmatprep.subr.bf16.mxu0 %v4743_v3 }
 0x2a9   : > { %3924 = vmatmul.mubr.msk.bf16.vlgmr.msra.gmra.mrb[4].mxu1 %vm1058_vm3, %v5287_v13 }
 0x2aa   : > { %3935 = vmatprep.mubr.msk.bf16.mxu1 %vm4744_vm1, %v4743_v3 }
 0x2ad   : > { %3930 = vmatmul.mubr.msk.bf16.vlgmr.msra.gmra.mrb[0].mxu0 %vm1058_vm3, %v5291_v16 }
 0x2ae   : > { %3941 = vmatprep.mubr.msk.bf16.mxu0 %vm4744_vm1, %v4743_v3 }
 0x37c   : > { %v1099_v22 = vpop.f32.mrb[4].mxu1 }
 0x37d   : > { %v1100_v23 = vadd.f32 %v1099_v22, %v5307_v21  ;;  %v3925_v24 = vpop.f32.mrb[5].mxu1 }
 0x37e   : > { %v1102_v25 = vpop.f32.mrb[6].mxu1 }
 0x37f   : > { %v3926_v26 = vpop.f32.mrb[7].mxu1  ;;  %v1154_v27 = vsel %vm1058_vm3, %v1100_v23, -inf }
 0x380   : > { %v1148_v28 = vpop.f32.mrb[0].mxu0  ;;  %1155 = vmax.xlane.f32.xlu1 %v1154_v27 }
 0x381   : > { %v1149_v29 = vadd.f32 %v1148_v28, %v5307_v21  ;;  %v3931_v30 = vpop.f32.mrb[1].mxu0 }
 0x382   : > { %v1151_v31 = vpop.f32.mrb[2].mxu0 }
 0x383   : > { %v3932_v32 = vpop.f32.mrb[3].mxu0  ;;  %v1157_v33 = vsel %vm1058_vm3, %v1149_v29, -inf }
 0x384   : > { %1158 = vmax.xlane.f32.xlu1 %v1157_v33 }
 0x395   : > { %1178 = vrot.lane.b32.xlu1 %v5287_v13, %s4746_s29 }
 0x399   : > { %1227 = vrot.lane.b32.xlu1 %v5291_v16, %s4746_s29 }
 0x39d   : > { %1279 = vrot.lane.b32.xlu1 %v5287_v13, %s4747_s15 }
 0x40d   : > { %v1156_v34 = vpop.xlane.xlu1 %1155 }
 0x40e   : > { %v1160_v35 = vsub.f32 %v1100_v23, %v1156_v34 }
 0x410   : > { %v1162_v36 = vmul.f32 1.442695, %v1160_v35 }
 0x411   : > { %v1159_v37 = vpop.xlane.xlu1 %1158 }
 0x412   : > { %4304 = vpow2.f32 %v1162_v36  ;;  %v1161_v38 = vsub.f32 %v1149_v29, %v1159_v37 }
 0x414   : > { %v1164_v39 = vmul.f32 1.442695, %v1161_v38 }
 0x415   : > { %v1179_v40 = vpop.permute.xlu1 %1178 }
 0x416   : > { %4306 = vpow2.f32 %v1164_v39  ;;  %v1185_v41 = vsel %vm1183_vm4, %v1179_v40, 0 }
 0x417   : > { %3934 = vmatpush3.bf16.msra.mxu1 %v1185_v41 }
 0x418   : > { %3945 = vmatprep.subr.bf16.mxu1 %v4743_v3 }
 0x419   : > { %v1228_v42 = vpop.permute.xlu1 %1227 }
 0x41a   : > { %v1233_v43 = vsel %vm1183_vm4, %v1228_v42, 0 }
 0x41b   : > { %3940 = vmatpush3.bf16.msra.mxu0 %v1233_v43 }
 0x41c   : > { %v4305_v44 = vpop.eup %4304  ;;  %3951 = vmatprep.subr.bf16.mxu0 %v4743_v3 }
 0x41d   : > { %v1166_v45 = vsel %vm1058_vm3, %v4305_v44, 0.0  ;;  %v1280_v48 = vpop.permute.xlu1 %1279 }
 0x41e   : > { %1167 = vadd.xlane.f32.xlu0 %v1166_v45  ;;  %v1285_v55 = vsel %vm1058_vm3, %v1280_v48, 0 }
 0x420   : > { %v4307_v46 = vpop.eup %4306 }
 0x421   : > { %v1169_v47 = vsel %vm1058_vm3, %v4307_v46, 0.0 }
 0x422   : > { %1170 = vadd.xlane.f32.xlu1 %v1169_v47 }
 0x433   : > { %1329 = vrot.lane.b32.xlu1 %v5291_v16, %s4747_s15 }
 0x434   : > { %1277 = vrot.lane.b32.xlu0 %v5287_v13, %s4748_s14 }
 0x437   : > { %1327 = vrot.lane.b32.xlu1 %v5291_v16, %s4748_s14 }
 0x4ab   : > { %v1168_v49 = vpop.xlane.xlu0 %1167 }
 0x4ac   : > { %4308 = vrcp.f32 %v1168_v49 }
 0x4af   : > { %v1171_v50 = vpop.xlane.xlu1 %1170  ;;  %v1278_v60 = vpop.permute.xlu0 %1277 }
 0x4b0   : > { %4310 = vrcp.f32 %v1171_v50 }
 0x4b3   : > { %v1330_v57 = vpop.permute.xlu1 %1329 }
 0x4b4   : > { %v1335_v59 = vsel %vm1058_vm3, %v1330_v57, 0 }
 0x4b6   : > { %v4309_v51 = vpop.eup %4308 }
 0x4b7   : > { %v1174_v52 = vmul.f32 %v4309_v51, %v4305_v44  ;;  %v1328_v61 = vpop.permute.xlu1 %1327 }
 0x4b9   : > { %v1176_v53 = vpack.c.bf16 %v1174_v52, %v1174_v52 }
 0x4ba   : > { %v4311_v54 = vpop.eup %4310 }
 0x4bb   : > { %v1175_v56 = vmul.f32 %v4311_v54, %v4307_v46  ;;  %3936 = vmatmul.mubr.msk.bf16.vlgmr.msra.gmra.mrb[8].mxu1 %vm1058_vm3, %v1176_v53 }
 0x4bc   : > { %3946 = vmatpush3.bf16.xpose.msra.mxu1 %v1285_v55  ;;  %3947 = vmatprep.mubr.msk.bf16.mxu1 %vm4744_vm1, %v4743_v3 }
 0x4bd   : > { %v1177_v58 = vpack.c.bf16 %v1175_v56, %v1175_v56  ;;  %3957 = vmatprep.subr.bf16.mxu1 %v4743_v3 }
 0x4bf   : > { %3942 = vmatmul.mubr.msk.bf16.vlgmr.msra.gmra.mrb[4].mxu0 %vm1058_vm3, %v1177_v58 }
 0x4c0   : > { %3952 = vmatpush3.bf16.xpose.msra.mxu0 %v1335_v59  ;;  %3953 = vmatprep.mubr.msk.bf16.mxu0 %vm4744_vm1, %v4743_v3 }
 0x4c1   : > { %3963 = vmatprep.subr.bf16.mxu0 %v4743_v3 }
 0x4c3   : > { %3948 = vmatmul.mubr.msk.bf16.vlgmr.msra.gmra.mrb[12].mxu1 %vm1058_vm3, %v1278_v60 }
 0x4c4   : > { %3959 = vmatprep.mubr.msk.bf16.mxu1 %vm4744_vm1, %v4743_v3 }
 0x4c7   : > { %3954 = vmatmul.mubr.msk.bf16.vlgmr.msra.gmra.mrb[8].mxu0 %vm1058_vm3, %v1328_v61 }
 0x4c8   : > { %3965 = vmatprep.mubr.msk.bf16.mxu0 %vm4744_vm1, %v4743_v3 }
 0x58e   : > { %v1221_v62 = vpop.f32.mrb[8].mxu1 }
 0x58f   : > { %v3937_v63 = vpop.f32.mrb[9].mxu1 }
 0x590   : > { %v1224_v0 = vpop.f32.mrb[10].mxu1 }
 0x591   : > { %v3938_v1 = vpop.f32.mrb[11].mxu1 }
 0x592   : > { %v1269_v2 = vpop.f32.mrb[4].mxu0 }
 0x593   : > { %v1275_v4 = vpack.c.bf16 %v1269_v2, %v1221_v62  ;;  %v3943_v7 = vpop.f32.mrb[5].mxu0 }
 0x594   : > { %v1272_v8 = vpop.f32.mrb[6].mxu0 }
 0x595   : > { %1276 = vst.msk [vmem:[#allocation2] sm:$0xff] %vm1058_vm3, %v1275_v4  ;;  %v3944_v9 = vpop.f32.mrb[7].mxu0 }
 0x596   : > { %v1321_v10 = vpop.f32.mrb[12].mxu1 }
 0x597   : > { %v1322_v11 = vadd.f32 %v1321_v10, %v5307_v21  ;;  %v3949_v12 = vpop.f32.mrb[13].mxu1 }
 0x598   : > { %v1324_v14 = vpop.f32.mrb[14].mxu1 }
 0x599   : > { %v3950_v15 = vpop.f32.mrb[15].mxu1  ;;  %v1377_v17 = vsel %vm1058_vm3, %v1322_v11, -inf }
 0x59a   : > { %v1371_v18 = vpop.f32.mrb[8].mxu0  ;;  %1378 = vmax.xlane.f32.xlu1 %v1377_v17 }
 0x59b   : > { %v1372_v19 = vadd.f32 %v1371_v18, %v5307_v21  ;;  %v3955_v20 = vpop.f32.mrb[9].mxu0 }
 0x59c   : > { %v1374_v22 = vpop.f32.mrb[10].mxu0 }
 0x59d   : > { %v3956_v23 = vpop.f32.mrb[11].mxu0  ;;  %v1380_v24 = vsel %vm1058_vm3, %v1372_v19, -inf }
 0x59e   : > { %1381 = vmax.xlane.f32.xlu0 %v1380_v24 }
 0x5ab   : > { %1401 = vrot.lane.b32.xlu1 %v5287_v13, %s4749_s25 }
 0x5af   : > { %1506 = vrot.lane.b32.xlu1 %v5287_v13, %s4750_s3 }
 0x5b4   : > { %1449 = vrot.lane.b32.xlu0 %v5291_v16, %s4749_s25 }
 0x5b8   : > { %1504 = vrot.lane.b32.xlu0 %v5287_v13, %s4751_s16 }
 0x627   : > { %v1379_v25 = vpop.xlane.xlu1 %1378 }
 0x628   : > { %v1383_v26 = vsub.f32 %v1322_v11, %v1379_v25 }
 0x62a   : > { %v1385_v27 = vmul.f32 1.442695, %v1383_v26 }
 0x62b   : > { %v1382_v28 = vpop.xlane.xlu0 %1381  ;;  %v1402_v29 = vpop.permute.xlu1 %1401 }
 0x62c   : > { %4312 = vpow2.f32 %v1385_v27  ;;  %v1384_v30 = vsub.f32 %v1372_v19, %v1382_v28  ;;  %v1407_v31 = vsel %vm1183_vm4, %v1402_v29, 0 }
 0x62d   : > { %3958 = vmatpush3.bf16.msra.mxu1 %v1407_v31 }
 0x62e   : > { %v1387_v32 = vmul.f32 1.442695, %v1384_v30  ;;  %3969 = vmatprep.subr.bf16.mxu1 %v4743_v3 }
 0x62f   : > { %v1450_v33 = vpop.permute.xlu0 %1449  ;;  %v1507_v39 = vpop.permute.xlu1 %1506 }
 0x630   : > { %4314 = vpow2.f32 %v1387_v32  ;;  %v1455_v34 = vsel %vm1183_vm4, %v1450_v33, 0  ;;  %v1512_v46 = vsel %vm1058_vm3, %v1507_v39, 0 }
 0x631   : > { %3964 = vmatpush3.bf16.msra.mxu0 %v1455_v34 }
 0x632   : > { %3975 = vmatprep.subr.bf16.mxu0 %v4743_v3 }
 0x633   : > { %v1505_v51 = vpop.permute.xlu0 %1504 }
 0x636   : > { %v4313_v35 = vpop.eup %4312 }
 0x637   : > { %v1389_v36 = vsel %vm1058_vm3, %v4313_v35, 0.0 }
 0x638   : > { %1390 = vadd.xlane.f32.xlu1 %v1389_v36 }
 0x63a   : > { %v4315_v37 = vpop.eup %4314 }
 0x63b   : > { %v1392_v38 = vsel %vm1058_vm3, %v4315_v37, 0.0 }
 0x63c   : > { %1393 = vadd.xlane.f32.xlu1 %v1392_v38 }
 0x64d   : > { %1556 = vrot.lane.b32.xlu1 %v5291_v16, %s4750_s3 }
 0x651   : > { %1554 = vrot.lane.b32.xlu1 %v5291_v16, %s4751_s16 }
 0x6c5   : > { %v1391_v40 = vpop.xlane.xlu1 %1390 }
 0x6c6   : > { %4316 = vrcp.f32 %v1391_v40 }
 0x6c9   : > { %v1394_v41 = vpop.xlane.xlu1 %1393 }
 0x6ca   : > { %4318 = vrcp.f32 %v1394_v41 }
 0x6cd   : > { %v1557_v48 = vpop.permute.xlu1 %1556 }
 0x6ce   : > { %v1562_v50 = vsel %vm1058_vm3, %v1557_v48, 0 }
 0x6d0   : > { %v4317_v42 = vpop.eup %4316 }
 0x6d1   : > { %v1397_v43 = vmul.f32 %v4317_v42, %v4313_v35  ;;  %v1555_v52 = vpop.permute.xlu1 %1554 }
 0x6d3   : > { %v1399_v44 = vpack.c.bf16 %v1397_v43, %v1397_v43 }
 0x6d4   : > { %v4319_v45 = vpop.eup %4318 }
 0x6d5   : > { %v1398_v47 = vmul.f32 %v4319_v45, %v4315_v37  ;;  %3960 = vmatmul.mubr.msk.bf16.vlgmr.msra.gmra.mrb[16].mxu1 %vm1058_vm3, %v1399_v44 }
 0x6d6   : > { %3970 = vmatpush3.bf16.xpose.msra.mxu1 %v1512_v46  ;;  %3971 = vmatprep.mubr.msk.bf16.mxu1 %vm4744_vm1, %v4743_v3 }
 0x6d7   : > { %v1400_v49 = vpack.c.bf16 %v1398_v47, %v1398_v47  ;;  %3981 = vmatprep.subr.bf16.mxu1 %v4743_v3 }
 0x6d9   : > { %3966 = vmatmul.mubr.msk.bf16.vlgmr.msra.gmra.mrb[12].mxu0 %vm1058_vm3, %v1400_v49 }
 0x6da   : > { %3976 = vmatpush3.bf16.xpose.msra.mxu0 %v1562_v50  ;;  %3977 = vmatprep.mubr.msk.bf16.mxu0 %vm4744_vm1, %v4743_v3 }
 0x6db   : > { %3987 = vmatprep.subr.bf16.mxu0 %v4743_v3 }
 0x6dd   : > { %3972 = vmatmul.mubr.msk.bf16.vlgmr.msra.gmra.mrb[20].mxu1 %vm1058_vm3, %v1505_v51 }
 0x6de   : > { %3983 = vmatprep.mubr.msk.bf16.mxu1 %vm4744_vm1, %v4743_v3 }
 0x6e1   : > { %3978 = vmatmul.mubr.msk.bf16.vlgmr.msra.gmra.mrb[16].mxu0 %vm1058_vm3, %v1555_v52 }
 0x6e2   : > { %3989 = vmatprep.mubr.msk.bf16.mxu0 %vm4744_vm1, %v4743_v3 }
 0x7a8   : > { %v5382_v53 = vpop.f32.mrb[16].mxu1 }
 0x7a9   : > { %v3961_v54 = vpop.f32.mrb[17].mxu1 }
 0x7aa   : > { %v1446_v55 = vpop.f32.mrb[18].mxu1 }
 0x7ab   : > { %v3962_v56 = vpop.f32.mrb[19].mxu1 }
 0x7ac   : > { %v5384_v57 = vpop.f32.mrb[12].mxu0 }
 0x7ad   : > { %v1497_v58 = vpack.c.bf16 %v5384_v57, %v5382_v53  ;;  %v3967_v59 = vpop.f32.mrb[13].mxu0 }
 0x7ae   : > { %v1494_v60 = vpop.f32.mrb[14].mxu0 }
 0x7af   : > { %v3968_v61 = vpop.f32.mrb[15].mxu0 }
 0x7b0   : > { %v1548_v62 = vpop.f32.mrb[20].mxu1 }
 0x7b1   : > { %v1549_v63 = vadd.f32 %v1548_v62, %v5307_v21  ;;  %v3973_v0 = vpop.f32.mrb[21].mxu1 }
 0x7b2   : > { %v1551_v1 = vpop.f32.mrb[22].mxu1 }
 0x7b3   : > { %v3974_v2 = vpop.f32.mrb[23].mxu1  ;;  %v1604_v4 = vsel %vm1058_vm3, %v1549_v63, -inf }
 0x7b4   : > { %v1598_v7 = vpop.f32.mrb[16].mxu0  ;;  %1605 = vmax.xlane.f32.xlu0 %v1604_v4 }
 0x7b5   : > { %v1599_v8 = vadd.f32 %v1598_v7, %v5307_v21  ;;  %v3979_v9 = vpop.f32.mrb[17].mxu0 }
 0x7b6   : > { %v1601_v10 = vpop.f32.mrb[18].mxu0 }
 0x7b7   : > { %v3980_v11 = vpop.f32.mrb[19].mxu0  ;;  %v1607_v12 = vsel %vm1058_vm3, %v1599_v8, -inf }
 0x7b8   : > { %1608 = vmax.xlane.f32.xlu1 %v1607_v12 }
 0x7c9   : > { %1628 = vrot.lane.b32.xlu1 %v5287_v13, %s4752_s19 }
 0x7cd   : > { %1733 = vrot.lane.b32.xlu1 %v5287_v13, %s4753_s8 }
 0x7d1   : > { %1783 = vrot.lane.b32.xlu1 %v5291_v16, %s4753_s8 }
 0x7d5   : > { %1781 = vrot.lane.b32.xlu1 %v5291_v16, %s4754_s30 }
 0x841   : > { %v1606_v14 = vpop.xlane.xlu0 %1605 }
 0x842   : > { %v1610_v15 = vsub.f32 %v1549_v63, %v1606_v14 }
 0x844   : > { %v1612_v17 = vmul.f32 1.442695, %v1610_v15 }
 0x845   : > { %v1609_v18 = vpop.xlane.xlu1 %1608 }
 0x846   : > { %4320 = vpow2.f32 %v1612_v17  ;;  %v1611_v19 = vsub.f32 %v1599_v8, %v1609_v18 }
 0x848   : > { %v1614_v20 = vmul.f32 1.442695, %v1611_v19 }
 0x849   : > { %v1629_v22 = vpop.permute.xlu1 %1628 }
 0x84a   : > { %4322 = vpow2.f32 %v1614_v20  ;;  %v1634_v23 = vsel %vm1183_vm4, %v1629_v22, 0 }
 0x84b   : > { %3982 = vmatpush3.bf16.msra.mxu1 %v1634_v23 }
 0x84c   : > { %3993 = vmatprep.subr.bf16.mxu1 %v4743_v3 }
 0x84d   : > { %v1734_v33 = vpop.permute.xlu1 %1733 }
 0x84e   : > { %v1739_v37 = vsel %vm1058_vm3, %v1734_v33, 0 }
 0x850   : > { %v4321_v24 = vpop.eup %4320 }
 0x851   : > { %v1616_v25 = vsel %vm1058_vm3, %v4321_v24, 0.0  ;;  %v1784_v39 = vpop.permute.xlu1 %1783 }
 0x852   : > { %1617 = vadd.xlane.f32.xlu0 %v1616_v25  ;;  %v1789_v41 = vsel %vm1058_vm3, %v1784_v39, 0 }
 0x854   : > { %v4323_v26 = vpop.eup %4322 }
 0x855   : > { %v1619_v27 = vsel %vm1058_vm3, %v4323_v26, 0.0  ;;  %v1782_v43 = vpop.permute.xlu1 %1781 }
 0x856   : > { %1620 = vadd.xlane.f32.xlu0 %v1619_v27 }
 0x86c   : > { %1676 = vrot.lane.b32.xlu0 %v5291_v16, %s4752_s19 }
 0x870   : > { %1731 = vrot.lane.b32.xlu0 %v5287_v13, %s4754_s30 }
 0x8df   : > { %v1618_v28 = vpop.xlane.xlu0 %1617 }
 0x8e0   : > { %4324 = vrcp.f32 %v1618_v28  ;;  %v4290_v28 = vld [vmem:[%s5233_s20] sm:$0xff]  }
 0x8e3   : > { %v1621_v29 = vpop.xlane.xlu0 %1620 }
 0x8e4   : > { %4326 = vrcp.f32 %v1621_v29  ;;  %v4291_v29 = vld [vmem:[%s5233_s20 + $0x8] sm:$0xff]   ;;  %s5864_s20 = scalar_lea.vmem [#allocation11], %s5200_s24 }
 0x8e7   : > { %v1677_v30 = vpop.permute.xlu0 %1676 }
 0x8e8   : > { %v1682_v31 = vsel %vm1183_vm4, %v1677_v30, 0 }
 0x8e9   : > { %3988 = vmatpush3.bf16.msra.mxu0 %v1682_v31 }
 0x8ea   : > { %v4325_v32 = vpop.eup %4324  ;;  %3999 = vmatprep.subr.bf16.mxu0 %v4743_v3 }
 0x8eb   : > { %v1624_v34 = vmul.f32 %v4325_v32, %v4321_v24  ;;  %v1732_v42 = vpop.permute.xlu0 %1731 }
 0x8ed   : > { %v1626_v35 = vpack.c.bf16 %v1624_v34, %v1624_v34 }
 0x8ee   : > { %v4327_v36 = vpop.eup %4326 }
 0x8ef   : > { %v1625_v38 = vmul.f32 %v4327_v36, %v4323_v26  ;;  %3984 = vmatmul.mubr.msk.bf16.vlgmr.msra.gmra.mrb[24].mxu1 %vm1058_vm3, %v1626_v35 }
 0x8f0   : > { %3994 = vmatpush3.bf16.xpose.msra.mxu1 %v1739_v37  ;;  %3995 = vmatprep.mubr.msk.bf16.mxu1 %vm4744_vm1, %v4743_v3 }
 0x8f1   : > { %v1627_v40 = vpack.c.bf16 %v1625_v38, %v1625_v38  ;;  %4005 = vmatprep.subr.bf16.mxu1 %v4743_v3 }
 0x8f3   : > { %3990 = vmatmul.mubr.msk.bf16.vlgmr.msra.gmra.mrb[20].mxu0 %vm1058_vm3, %v1627_v40 }
 0x8f4   : > { %4000 = vmatpush3.bf16.xpose.msra.mxu0 %v1789_v41  ;;  %4001 = vmatprep.mubr.msk.bf16.mxu0 %vm4744_vm1, %v4743_v3  ;;  %v3770_v41 = vld [vmem:[%s5864_s20] ss:$0 sm:$0xff] }
 0x8f5   : > { %4011 = vmatprep.subr.bf16.mxu0 %v4743_v3 }
 0x8f7   : > { %3996 = vmatmul.mubr.msk.bf16.vlgmr.msra.gmra.mrb[28].mxu1 %vm1058_vm3, %v1732_v42 }
 0x8f8   : > { %4007 = vmatprep.mubr.msk.bf16.mxu1 %vm4744_vm1, %v4743_v3 }
 0x8fb   : > { %4002 = vmatmul.mubr.msk.bf16.vlgmr.msra.gmra.mrb[24].mxu0 %vm1058_vm3, %v1782_v43 }
 0x8fc   : > { %4013 = vmatprep.mubr.msk.bf16.mxu0 %vm4744_vm1, %v4743_v3 }
 0x9c2   : > { %v1670_v44 = vpop.f32.mrb[24].mxu1 }
 0x9c3   : > { %v3985_v45 = vpop.f32.mrb[25].mxu1 }
 0x9c4   : > { %v1673_v46 = vpop.f32.mrb[26].mxu1 }
 0x9c5   : > { %v3986_v47 = vpop.f32.mrb[27].mxu1 }
 0x9c6   : > { %v1718_v48 = vpop.f32.mrb[20].mxu0 }
 0x9c7   : > { %v1724_v49 = vpack.c.bf16 %v1718_v48, %v1670_v44  ;;  %v3991_v50 = vpop.f32.mrb[21].mxu0 }
 0x9c8   : > { %v1721_v51 = vpop.f32.mrb[22].mxu0 }
 0x9c9   : > { %v3992_v52 = vpop.f32.mrb[23].mxu0 }
 0x9ca   : > { %v1775_v54 = vpop.f32.mrb[28].mxu1  ;;  %v4292_v52 = vld [vmem:[%s5238_s28] sm:$0xff]  }
 0x9cb   : > { %v1776_v55 = vadd.f32 %v1775_v54, %v5307_v21  ;;  %v3997_v56 = vpop.f32.mrb[29].mxu1  ;;  %v4293_v54 = vld [vmem:[%s5238_s28 + $0x8] sm:$0xff]   ;;  %s5865_s28 = scalar_lea.vmem [#allocation12], %s5200_s24 }
 0x9cc   : > { %v1778_v59 = vpop.f32.mrb[30].mxu1 }
 0x9cd   : > { %v3998_v60 = vpop.f32.mrb[31].mxu1  ;;  %v1831_v61 = vsel %vm1058_vm3, %v1776_v55, -inf }
 0x9ce   : > { %v1825_v62 = vpop.f32.mrb[24].mxu0  ;;  %1832 = vmax.xlane.f32.xlu0 %v1831_v61 }
 0x9cf   : > { %v1826_v63 = vadd.f32 %v1825_v62, %v5307_v21  ;;  %v4003_v0 = vpop.f32.mrb[25].mxu0 }
 0x9d0   : > { %v1828_v1 = vpop.f32.mrb[26].mxu0 }
 0x9d1   : > { %v4004_v2 = vpop.f32.mrb[27].mxu0  ;;  %v1834_v4 = vsel %vm1058_vm3, %v1826_v63, -inf  ;;  %v4294_v1 = vld [vmem:[#allocation6] sm:$0xff]  }
 0x9d2   : > { %1835 = vmax.xlane.f32.xlu1 %v1834_v4  ;;  %v3774_v2 = vld [vmem:[%s5865_s28] ss:$0 sm:$0xff] }
 0x9e3   : > { %1855 = vrot.lane.b32.xlu1 %v5287_v13, %s4755_s2 }
 0x9e7   : > { %1499 = vrot.lane.b32.xlu1 %v1497_v58, %s4756_s7 }
 0x9eb   : > { %1726 = vrot.lane.b32.xlu1 %v1724_v49, %s4757_s22 }
 0xa5b   : > { %v1833_v7 = vpop.xlane.xlu0 %1832 }
 0xa5c   : > { %v1837_v21 = vsub.f32 %v1776_v55, %v1833_v7 }
 0xa5e   : > { %v1839_v8 = vmul.f32 1.442695, %v1837_v21  ;;  %v2050_v21 = vlaneseq }
 0xa5f   : > { %v1836_v9 = vpop.xlane.xlu1 %1835 }
 0xa60   : > { %4328 = vpow2.f32 %v1839_v8  ;;  %v1838_v10 = vsub.f32 %v1826_v63, %v1836_v9 }
 0xa62   : > { %v1841_v11 = vmul.f32 1.442695, %v1838_v10 }
 0xa63   : > { %v1856_v12 = vpop.permute.xlu1 %1855 }
 0xa64   : > { %4330 = vpow2.f32 %v1841_v11  ;;  %v1861_v13 = vsel %vm1183_vm4, %v1856_v12, 0 }
 0xa65   : > { %4006 = vmatpush3.bf16.msra.mxu1 %v1861_v13  ;;  %v5473_v13 = vshrl.u32 %v2050_v21, 7 }
 0xa66   : > { %4017 = vmatprep.subr.bf16.mxu1 %v4743_v3 }
 0xa67   : > { %v1500_v53 = vpop.permute.xlu1 %1499 }
 0xa68   : > { %1503 = vst.msk [vmem:[#allocation2] sm:$0xff] %vm1502_vm5, %v1500_v53 }
 0xa6a   : > { %v4329_v57 = vpop.eup %4328 }
 0xa6b   : > { %v1727_v58 = vpop.permute.xlu1 %1726  ;;  %v1843_v14 = vsel %vm1058_vm3, %v4329_v57, 0.0 }
 0xa6c   : > { %1730 = vst.msk [vmem:[#allocation2] sm:$0xff] %vm1729_vm6, %v1727_v58  ;;  %1844 = vadd.xlane.f32.xlu0 %v1843_v14  ;;  %v2052_v58 = vsub.s32 0, %v5473_v13  ;;  %v5477_v14 = vld [vmem:[%s5258_s23] sm:$0x7] }
 0xa6e   : > { %v4331_v15 = vpop.eup %4330 }
 0xa6f   : > { %v1846_v17 = vsel %vm1058_vm3, %v4331_v15, 0.0 }
 0xa70   : > { %1847 = vadd.xlane.f32.xlu0 %v1846_v17 }
 0xa86   : > { %1903 = vrot.lane.b32.xlu0 %v5291_v16, %s4755_s2 }
 0xaf9   : > { %v1845_v18 = vpop.xlane.xlu0 %1844 }
 0xafa   : > { %4332 = vrcp.f32 %v1845_v18  ;;  %v5485_v18 = vld [vmem:[%s5263_s11] sm:$0x7] }
 0xafd   : > { %v1848_v19 = vpop.xlane.xlu0 %1847 }
 0xafe   : > { %4334 = vrcp.f32 %v1848_v19 }
 0xb01   : > { %v1904_v20 = vpop.permute.xlu0 %1903 }
 0xb02   : > { %v1909_v22 = vsel %vm1183_vm4, %v1904_v20, 0 }
 0xb03   : > { %4012 = vmatpush3.bf16.msra.mxu0 %v1909_v22 }
 0xb04   : > { %v4333_v23 = vpop.eup %4332  ;;  %4025 = vmatprep.subr.bf16.mxu0 %v4743_v3 }
 0xb05   : > { %v1851_v24 = vmul.f32 %v4333_v23, %v4329_v57  ;;  %v4295_v57 = vld [vmem:[#allocation6 + $0x8] sm:$0xff]  }
 0xb07   : > { %v1853_v25 = vpack.c.bf16 %v1851_v24, %v1851_v24  ;;  %v2059_v24 = vrot.slane %v5485_v18, %v2052_v58 }
 0xb08   : > { %v4335_v26 = vpop.eup %4334 }
 0xb09   : > { %v1852_v27 = vmul.f32 %v4335_v26, %v4331_v15  ;;  %4008 = vmatmul.mubr.msk.bf16.vlgmr.msra.gmra.mrb[32].mxu1 %vm1058_vm3, %v1853_v25  ;;  %v2053_v15 = vrot.slane %v5477_v14, %v2052_v58 }
 0xb0a   : > { %4021 = vmatprep.mubr.msk.bf16.mxu1 %vm4744_vm1, %v4743_v3  ;;  %4018 = vmatpush3.bf16.msra.mxu1 %v4290_v28 }
 0xb0b   : > { %v1854_v16 = vpack.c.bf16 %v1852_v27, %v1852_v27  ;;  %4019 = vmatprep.subr.bf16.mxu1 %v4743_v3 }
 0xb0d   : > { %4014 = vmatmul.mubr.msk.bf16.vlgmr.msra.gmra.mrb[28].mxu0 %vm1058_vm3, %v1854_v16 }
 0xb0e   : > { %4029 = vmatprep.mubr.msk.bf16.mxu0 %vm4744_vm1, %v4743_v3  ;;  %4020 = vmatpush3.bf16.msra.mxu1 %v4291_v29 }
 0xb0f   : > { %4026 = vmatpush3.bf16.msra.mxu0 %v4292_v52 }
 0xb10   : > { %4027 = vmatprep.subr.bf16.mxu0 %v4743_v3 }
 0xb13   : > { %4028 = vmatpush3.bf16.msra.mxu0 %v4293_v54 }
 0xb14   : > { %4041 = vmatprep.subr.bf16.mxu0 %v4743_v3 }
 0xbdc   : > { %v1897_v30 = vpop.f32.mrb[32].mxu1 }
 0xbdd   : > { %v4009_v31 = vpop.f32.mrb[33].mxu1 }
 0xbde   : > { %v1900_v32 = vpop.f32.mrb[34].mxu1 }
 0xbdf   : > { %v4010_v33 = vpop.f32.mrb[35].mxu1 }
 0xbe0   : > { %v1945_v34 = vpop.f32.mrb[28].mxu0 }
 0xbe1   : > { %v1951_v35 = vpack.c.bf16 %v1945_v34, %v1897_v30  ;;  %v4015_v36 = vpop.f32.mrb[29].mxu0 }
 0xbe2   : > { %v1948_v37 = vpop.f32.mrb[30].mxu0 }
 0xbe3   : > { %v4016_v38 = vpop.f32.mrb[31].mxu0  ;;  %1953 = vrot.lane.b32.xlu0 %v1951_v35, %s4758_s0 }
 0xc55   : > { %v1954_v39 = vpop.permute.xlu0 %1953 }
 0xc56   : > { %1957 = vst.msk [vmem:[#allocation2] sm:$0xff] %vm1956_vm7, %v1954_v39 }
 0xc5d   : > { %v1958_v40 = vld [vmem:[#allocation2] sm:$0xff] }
 0xc5e   : > { %4022 = vmatmul.mubr.msk.bf16.vlgmr.msra.gmra.mrb[36].mxu1 %vm1003_vm2, %v1958_v40 }
 0xc5f   : > { %4037 = vmatprep.mubr.msk.bf16.mxu1 %vm1003_vm2, %v4294_v1 }
 0xd31   : > { %v2014_v42 = vpop.f32.mrb[36].mxu1 }
 0xd32   : > { %v2015_v43 = vadd.f32 %v3770_v41, %v2014_v42  ;;  %v4023_v44 = vpop.f32.mrb[37].mxu1 }
 0xd33   : > { %v2017_v45 = vpop.f32.mrb[38].mxu1 }
 0xd34   : > { %v2018_v46 = vadd.f32 %v3770_v41, %v2017_v45  ;;  %v4024_v47 = vpop.f32.mrb[39].mxu1  ;;  %v2021_v48 = vadd.f32 %v2015_v43, %v5272_v5 }
 0xd36   : > { %v2023_v49 = vsel %vm1003_vm2, %v2021_v48, 0.0  ;;  %v2022_v50 = vadd.f32 %v2018_v46, %v5274_v6 }
 0xd37   : > { %2024 = vadd.xlane.f32.xlu1 %v2023_v49 }
 0xd38   : > { %v2026_v51 = vsel %vm1003_vm2, %v2022_v50, 0.0 }
 0xd39   : > { %2027 = vadd.xlane.f32.xlu0 %v2026_v51 }
 0xdc4   : > { %v2025_v55 = vpop.xlane.xlu1 %2024 }
 0xdc5   : > { %v2030_v56 = vmul.f32 0.03125, %v2025_v55 }
 0xdc6   : > { %v2028_v5 = vpop.xlane.xlu0 %2027 }
 0xdc7   : > { %v2032_v59 = vsub.f32 %v2021_v48, %v2030_v56  ;;  %v2031_v60 = vmul.f32 0.03125, %v2028_v5 }
 0xdc9   : > { %v2033_v61 = vsub.f32 %v2022_v50, %v2031_v60  ;;  %v2034_v6 = vmul.f32 %v2032_v59, %v2032_v59 }
 0xdcb   : > { %v2036_v62 = vsel %vm1003_vm2, %v2034_v6, 0.0  ;;  %v2035_v63 = vmul.f32 %v2033_v61, %v2033_v61 }
 0xdcc   : > { %2037 = vadd.xlane.f32.xlu0 %v2036_v62 }
 0xdcd   : > { %v2039_v0 = vsel %vm1003_vm2, %v2035_v63, 0.0 }
 0xdce   : > { %2040 = vadd.xlane.f32.xlu1 %v2039_v0 }
 0xddf   : > { %2142 = vrot.lane.b32.xlu1 %v4293_v54, %s4745_s9 }
 0xde2   : > { %2140 = vrot.lane.b32.xlu0 %v4292_v52, %s4745_s9 }
 0xde3   : > { %2146 = vrot.lane.b32.xlu1 %v3774_v2, %s4745_s9 }
 0xe59   : > { %v2038_v4 = vpop.xlane.xlu0 %2037 }
 0xe5a   : > { %v2042_v7 = vmul.f32 0.03125, %v2038_v4 }
 0xe5b   : > { %v2041_v8 = vpop.xlane.xlu1 %2040 }
 0xe5c   : > { %v2044_v9 = vadd.f32 1e-05, %v2042_v7  ;;  %v2043_v10 = vmul.f32 0.03125, %v2041_v8 }
 0xe5d   : > { %v2141_v11 = vpop.permute.xlu0 %2140 }
 0xe5e   : > { %4336 = vrsqrt.f32 %v2044_v9  ;;  %v2045_v12 = vadd.f32 1e-05, %v2043_v10  ;;  %4033 = vmatprep.subr.bf16.mxu1 %v2141_v11 }
 0xe5f   : > { %4034 = vmatpush3.bf16.msra.mxu1 %v2141_v11  ;;  %v2143_v53 = vpop.permute.xlu1 %2142 }
 0xe60   : > { %4338 = vrsqrt.f32 %v2045_v12  ;;  %4035 = vmatprep.subr.bf16.mxu1 %v2143_v53 }
 0xe63   : > { %4036 = vmatpush3.bf16.msra.mxu1 %v2143_v53  ;;  %v2147_v28 = vpop.permute.xlu1 %2146 }
 0xe64   : > { %4047 = vmatprep.subr.bf16.mxu1 %v4743_v3 }
 0xe66   : > { %4038 = vmatmul.mubr.msk.bf16.vlgmr.msra.gmra.mrb[40].mxu1 %vm1003_vm2, %v4295_v57 }
 0xe67   : > { %4049 = vmatprep.mubr.msk.bf16.mxu1 %vm4744_vm1, %v4743_v3 }
 0xe68   : > { %v4337_v17 = vpop.eup %4336 }
 0xe69   : > { %v2048_v19 = vmul.f32 %v4337_v17, %v2032_v59 }
 0xe6a   : > { %v4339_v20 = vpop.eup %4338 }
 0xe6b   : > { %v2054_v22 = vmul.f32 %v2053_v15, %v2048_v19  ;;  %v2049_v23 = vmul.f32 %v4339_v20, %v2033_v61 }
 0xe6d   : > { %v2055_v25 = vmul.f32 %v2053_v15, %v2049_v23  ;;  %v5488_v26 = vadd.f32 %v2059_v24, %v2054_v22 }
 0xe6f   : > { %v5490_v27 = vadd.f32 %v2059_v24, %v2055_v25 }
 0xe71   : > { %v2066_v16 = vpack.c.bf16 %v5490_v27, %v5488_v26 }
 0xe73   : > { %4030 = vmatmul.mubr.msk.bf16.vlgmr.msra.gmra.mrb[32].mxu0 %vm1003_vm2, %v2066_v16 }
 0xe74   : > { %4043 = vmatprep.mubr.msk.bf16.mxu0 %vm4744_vm1, %v4743_v3 }
 0xf39   : > { %v4039_v29 = vpop.f32.mrb[40].mxu1 }
 0xf3a   : > { %v2189_v30 = vpop.f32.mrb[41].mxu1  ;;  %v2198_v31 = vadd.f32 %v4039_v29, %v2147_v28 }
 0xf3b   : > { %v4040_v32 = vpop.f32.mrb[42].mxu1  ;;  %v2190_v33 = vadd.f32 %v2189_v30, %v2147_v28 }
 0xf3c   : > { %v2201_v34 = vadd.f32 %v4040_v32, %v2147_v28  ;;  %v2192_v35 = vpop.f32.mrb[43].mxu1 }
 0xf3d   : > { %v2193_v36 = vadd.f32 %v2192_v35, %v2147_v28 }
 0xf3e   : > { %v5497_v37 = vpack.c.bf16 %v2201_v34, %v2198_v31 }
 0xf3f   : > { %v5499_v38 = vpack.c.bf16 %v2193_v36, %v2190_v33 }
 0xf40   : > { %v2263_v39 = vsel %vm1058_vm3, %v5497_v37, 0 }
 0xf41   : > { %4048 = vmatpush3.bf16.xpose.msra.mxu1 %v2263_v39  ;;  %v2217_v40 = vsel %vm1058_vm3, %v5499_v38, 0 }
 0xf42   : > { %4042 = vmatpush3.bf16.xpose.msra.mxu0 %v2217_v40  ;;  %4059 = vmatprep.subr.bf16.mxu1 %v4743_v3 }
 0xf43   : > { %4053 = vmatprep.subr.bf16.mxu0 %v4743_v3 }
 0xf46   : > { %v2123_v41 = vpop.f32.mrb[32].mxu0 }
 0xf47   : > { %v2124_v42 = vadd.f32 %v3774_v2, %v2123_v41  ;;  %v4031_v43 = vpop.f32.mrb[33].mxu0 }
 0xf48   : > { %v2126_v44 = vpop.f32.mrb[34].mxu0 }
 0xf49   : > { %v5507_v45 = vpack.c.bf16 %v2124_v42, %v2124_v42  ;;  %v2127_v46 = vadd.f32 %v3774_v2, %v2126_v44  ;;  %v4032_v47 = vpop.f32.mrb[35].mxu0 }
 0xf4b   : > { %v5509_v48 = vpack.c.bf16 %v2127_v46, %v2127_v46  ;;  %4044 = vmatmul.mubr.msk.bf16.vlgmr.msra.gmra.mrb[36].mxu0 %vm1058_vm3, %v5507_v45 }
 0xf4c   : > { %4055 = vmatprep.mubr.msk.bf16.mxu0 %vm4744_vm1, %v4743_v3 }
 0xf4d   : > { %4050 = vmatmul.mubr.msk.bf16.vlgmr.msra.gmra.mrb[44].mxu1 %vm1058_vm3, %v5509_v48 }
 0xf4e   : > { %4061 = vmatprep.mubr.msk.bf16.mxu1 %vm4744_vm1, %v4743_v3 }
0x101e   : > { %v2253_v49 = vpop.f32.mrb[36].mxu0 }
0x101f   : > { %v4045_v50 = vpop.f32.mrb[37].mxu0  ;;  %v2306_v51 = vsel %vm2305_vm8, %v2253_v49, -inf }
0x1020   : > { %v2299_v52 = vpop.f32.mrb[44].mxu1  ;;  %2307 = vmax.xlane.f32.xlu0 %v2306_v51  ;;  %v2256_v54 = vpop.f32.mrb[38].mxu0 }
0x1021   : > { %v4046_v55 = vpop.f32.mrb[39].mxu0  ;;  %v4051_v56 = vpop.f32.mrb[45].mxu1  ;;  %v2309_v5 = vsel %vm2305_vm8, %v2299_v52, -inf }
0x1022   : > { %2310 = vmax.xlane.f32.xlu1 %v2309_v5  ;;  %v2302_v59 = vpop.f32.mrb[46].mxu1 }
0x1023   : > { %v4052_v60 = vpop.f32.mrb[47].mxu1 }
0x1033   : > { %2331 = vrot.lane.b32.xlu1 %v5499_v38, %s4745_s9 }
0x1037   : > { %2429 = vrot.lane.b32.xlu1 %v5499_v38, %s4748_s14 }
0x103b   : > { %2480 = vrot.lane.b32.xlu1 %v5497_v37, %s4748_s14 }
0x103f   : > { %2478 = vrot.lane.b32.xlu1 %v5509_v48, %s4748_s14 }
0x10ad   : > { %v2308_v61 = vpop.xlane.xlu0 %2307 }
0x10ae   : > { %v2312_v6 = vsub.f32 %v2253_v49, %v2308_v61 }
0x10af   : > { %v2311_v62 = vpop.xlane.xlu1 %2310 }
0x10b0   : > { %v2314_v63 = vmul.f32 1.442695, %v2312_v6  ;;  %v2313_v0 = vsub.f32 %v2299_v52, %v2311_v62 }
0x10b2   : > { %4340 = vpow2.f32 %v2314_v63  ;;  %v2316_v1 = vmul.f32 1.442695, %v2313_v0 }
0x10b3   : > { %v2332_v2 = vpop.permute.xlu1 %2331 }
0x10b4   : > { %4342 = vpow2.f32 %v2316_v1  ;;  %4054 = vmatpush3.bf16.msra.mxu0 %v2332_v2 }
0x10b5   : > { %4065 = vmatprep.subr.bf16.mxu0 %v4743_v3 }
0x10b7   : > { %v2430_v53 = vpop.permute.xlu1 %2429 }
0x10b8   : > { %v2435_v17 = vsel %vm1058_vm3, %v2430_v53, 0 }
0x10bb   : > { %v2481_v20 = vpop.permute.xlu1 %2480 }
0x10bc   : > { %v4341_v4 = vpop.eup %4340  ;;  %v2486_v23 = vsel %vm1058_vm3, %v2481_v20, 0 }
0x10bd   : > { %v2318_v7 = vsel %vm2305_vm8, %v4341_v4, 0.0 }
0x10be   : > { %v4343_v21 = vpop.eup %4342  ;;  %2319 = vadd.xlane.f32.xlu0 %v2318_v7 }
0x10bf   : > { %v2321_v8 = vsel %vm2305_vm8, %v4343_v21, 0.0  ;;  %v2479_v25 = vpop.permute.xlu1 %2478 }
0x10c2   : > { %2322 = vadd.xlane.f32.xlu0 %v2321_v8 }
0x10d8   : > { %2378 = vrot.lane.b32.xlu0 %v5497_v37, %s4745_s9 }
0x10dc   : > { %2427 = vrot.lane.b32.xlu0 %v5507_v45, %s4748_s14 }
0x114b   : > { %v2320_v9 = vpop.xlane.xlu0 %2319 }
0x114c   : > { %4344 = vrcp.f32 %v2320_v9 }
0x114f   : > { %v2323_v10 = vpop.xlane.xlu0 %2322 }
0x1150   : > { %4346 = vrcp.f32 %v2323_v10 }
0x1153   : > { %v2379_v11 = vpop.permute.xlu0 %2378 }
0x1154   : > { %4060 = vmatpush3.bf16.msra.mxu1 %v2379_v11 }
0x1155   : > { %4071 = vmatprep.subr.bf16.mxu1 %v4743_v3 }
0x1156   : > { %v4345_v12 = vpop.eup %4344 }
0x1157   : > { %v2326_v57 = vmul.f32 %v4345_v12, %v4341_v4  ;;  %v2428_v24 = vpop.permute.xlu0 %2427 }
0x1159   : > { %v2328_v58 = vpack.c.bf16 %v2326_v57, %v2326_v57 }
0x115a   : > { %v4347_v15 = vpop.eup %4346 }
0x115b   : > { %v2327_v19 = vmul.f32 %v4347_v15, %v4343_v21  ;;  %4056 = vmatmul.mubr.msk.bf16.vlgmr.msra.gmra.mrb[40].mxu0 %vm2305_vm8, %v2328_v58 }
0x115c   : > { %4066 = vmatpush3.bf16.xpose.msra.mxu0 %v2435_v17  ;;  %4067 = vmatprep.mubr.msk.bf16.mxu0 %vm4744_vm1, %v4743_v3 }
0x115d   : > { %v2329_v22 = vpack.c.bf16 %v2327_v19, %v2327_v19  ;;  %4077 = vmatprep.subr.bf16.mxu0 %v4743_v3 }
0x115f   : > { %4062 = vmatmul.mubr.msk.bf16.vlgmr.msra.gmra.mrb[48].mxu1 %vm2305_vm8, %v2329_v22 }
0x1160   : > { %4072 = vmatpush3.bf16.xpose.msra.mxu1 %v2486_v23  ;;  %4073 = vmatprep.mubr.msk.bf16.mxu1 %vm4744_vm1, %v4743_v3 }
0x1161   : > { %4083 = vmatprep.subr.bf16.mxu1 %v4743_v3 }
0x1163   : > { %4068 = vmatmul.mubr.msk.bf16.vlgmr.msra.gmra.mrb[44].mxu0 %vm1058_vm3, %v2428_v24 }
0x1164   : > { %4079 = vmatprep.mubr.msk.bf16.mxu0 %vm4744_vm1, %v4743_v3 }
0x1167   : > { %4074 = vmatmul.mubr.msk.bf16.vlgmr.msra.gmra.mrb[52].mxu1 %vm1058_vm3, %v2479_v25 }
0x1168   : > { %4085 = vmatprep.mubr.msk.bf16.mxu1 %vm4744_vm1, %v4743_v3 }
0x122e   : > { %v2371_v16 = vpop.f32.mrb[40].mxu0 }
0x122f   : > { %v4057_v28 = vpop.f32.mrb[41].mxu0 }
0x1230   : > { %v2374_v29 = vpop.f32.mrb[42].mxu0 }
0x1231   : > { %v4058_v30 = vpop.f32.mrb[43].mxu0 }
0x1232   : > { %v2418_v31 = vpop.f32.mrb[48].mxu1 }
0x1233   : > { %v2424_v32 = vpack.c.bf16 %v2418_v31, %v2371_v16  ;;  %v4063_v33 = vpop.f32.mrb[49].mxu1 }
0x1234   : > { %v2421_v34 = vpop.f32.mrb[50].mxu1 }
0x1235   : > { %2425 = vst.msk [vmem:[#allocation2] sm:$0xff] %vm1058_vm3, %v2424_v32  ;;  %v4064_v35 = vpop.f32.mrb[51].mxu1 }
0x1236   : > { %v2471_v36 = vpop.f32.mrb[44].mxu0 }
0x1237   : > { %v4069_v39 = vpop.f32.mrb[45].mxu0  ;;  %v2528_v40 = vsel %vm2305_vm8, %v2471_v36, -inf }
0x1238   : > { %2529 = vmax.xlane.f32.xlu0 %v2528_v40  ;;  %v2474_v41 = vpop.f32.mrb[46].mxu0 }
0x1239   : > { %v4070_v42 = vpop.f32.mrb[47].mxu0 }
0x123a   : > { %v2522_v43 = vpop.f32.mrb[52].mxu1 }
0x123b   : > { %v4075_v44 = vpop.f32.mrb[53].mxu1  ;;  %v2531_v46 = vsel %vm2305_vm8, %v2522_v43, -inf }
0x123c   : > { %2532 = vmax.xlane.f32.xlu1 %v2531_v46  ;;  %v2525_v47 = vpop.f32.mrb[54].mxu1 }
0x123d   : > { %v4076_v49 = vpop.f32.mrb[55].mxu1 }
0x124d   : > { %2552 = vrot.lane.b32.xlu1 %v5499_v38, %s4747_s15 }
0x1251   : > { %2652 = vrot.lane.b32.xlu1 %v5499_v38, %s4751_s16 }
0x1255   : > { %2702 = vrot.lane.b32.xlu1 %v5497_v37, %s4751_s16 }
0x1259   : > { %2700 = vrot.lane.b32.xlu1 %v5509_v48, %s4751_s16 }
0x12c5   : > { %v2530_v50 = vpop.xlane.xlu0 %2529 }
0x12c6   : > { %v2534_v51 = vsub.f32 %v2471_v36, %v2530_v50 }
0x12c8   : > { %v2536_v52 = vmul.f32 1.442695, %v2534_v51 }
0x12c9   : > { %v2533_v54 = vpop.xlane.xlu1 %2532 }
0x12ca   : > { %4348 = vpow2.f32 %v2536_v52  ;;  %v2535_v55 = vsub.f32 %v2522_v43, %v2533_v54 }
0x12cc   : > { %v2538_v56 = vmul.f32 1.442695, %v2535_v55 }
0x12cd   : > { %v2553_v5 = vpop.permute.xlu1 %2552 }
0x12ce   : > { %4350 = vpow2.f32 %v2538_v56  ;;  %4078 = vmatpush3.bf16.msra.mxu0 %v2553_v5 }
0x12cf   : > { %4089 = vmatprep.subr.bf16.mxu0 %v4743_v3 }
0x12d1   : > { %v2653_v2 = vpop.permute.xlu1 %2652 }
0x12d2   : > { %v2658_v8 = vsel %vm1058_vm3, %v2653_v2, 0 }
0x12d4   : > { %v4349_v59 = vpop.eup %4348 }
0x12d5   : > { %v2540_v60 = vsel %vm2305_vm8, %v4349_v59, 0.0  ;;  %v2703_v10 = vpop.permute.xlu1 %2702 }
0x12d6   : > { %2541 = vadd.xlane.f32.xlu0 %v2540_v60  ;;  %v2708_v12 = vsel %vm1058_vm3, %v2703_v10, 0 }
0x12d8   : > { %v4351_v61 = vpop.eup %4350 }
0x12d9   : > { %v2543_v6 = vsel %vm2305_vm8, %v4351_v61, 0.0  ;;  %v2701_v57 = vpop.permute.xlu1 %2700 }
0x12da   : > { %2544 = vadd.xlane.f32.xlu0 %v2543_v6 }
0x12f0   : > { %2598 = vrot.lane.b32.xlu0 %v5497_v37, %s4747_s15 }
0x12f4   : > { %2650 = vrot.lane.b32.xlu0 %v5507_v45, %s4751_s16 }
0x1363   : > { %v2542_v62 = vpop.xlane.xlu0 %2541 }
0x1364   : > { %4352 = vrcp.f32 %v2542_v62 }
0x1367   : > { %v2545_v63 = vpop.xlane.xlu0 %2544 }
0x1368   : > { %4354 = vrcp.f32 %v2545_v63 }
0x136b   : > { %v2599_v0 = vpop.permute.xlu0 %2598 }
0x136c   : > { %4084 = vmatpush3.bf16.msra.mxu1 %v2599_v0 }
0x136d   : > { %4095 = vmatprep.subr.bf16.mxu1 %v4743_v3 }
0x136e   : > { %v4353_v1 = vpop.eup %4352 }
0x136f   : > { %v2548_v4 = vmul.f32 %v4353_v1, %v4349_v59  ;;  %v2651_v53 = vpop.permute.xlu0 %2650 }
0x1371   : > { %v2550_v7 = vpack.c.bf16 %v2548_v4, %v2548_v4 }
0x1372   : > { %v4355_v21 = vpop.eup %4354 }
0x1373   : > { %v2549_v9 = vmul.f32 %v4355_v21, %v4351_v61  ;;  %4080 = vmatmul.mubr.msk.bf16.vlgmr.msra.gmra.mrb[48].mxu0 %vm2305_vm8, %v2550_v7 }
0x1374   : > { %4090 = vmatpush3.bf16.xpose.msra.mxu0 %v2658_v8  ;;  %4091 = vmatprep.mubr.msk.bf16.mxu0 %vm4744_vm1, %v4743_v3 }
0x1375   : > { %v2551_v11 = vpack.c.bf16 %v2549_v9, %v2549_v9  ;;  %4101 = vmatprep.subr.bf16.mxu0 %v4743_v3 }
0x1377   : > { %4086 = vmatmul.mubr.msk.bf16.vlgmr.msra.gmra.mrb[56].mxu1 %vm2305_vm8, %v2551_v11 }
0x1378   : > { %4096 = vmatpush3.bf16.xpose.msra.mxu1 %v2708_v12  ;;  %4097 = vmatprep.mubr.msk.bf16.mxu1 %vm4744_vm1, %v4743_v3 }
0x1379   : > { %4107 = vmatprep.subr.bf16.mxu1 %v4743_v3 }
0x137b   : > { %4092 = vmatmul.mubr.msk.bf16.vlgmr.msra.gmra.mrb[52].mxu0 %vm1058_vm3, %v2651_v53 }
0x137c   : > { %4103 = vmatprep.mubr.msk.bf16.mxu0 %vm4744_vm1, %v4743_v3 }
0x137f   : > { %4098 = vmatmul.mubr.msk.bf16.vlgmr.msra.gmra.mrb[60].mxu1 %vm1058_vm3, %v2701_v57 }
0x1380   : > { %4109 = vmatprep.mubr.msk.bf16.mxu1 %vm4744_vm1, %v4743_v3 }
0x1446   : > { %v5588_v58 = vpop.f32.mrb[48].mxu0 }
0x1447   : > { %v4081_v15 = vpop.f32.mrb[49].mxu0 }
0x1448   : > { %v2595_v17 = vpop.f32.mrb[50].mxu0 }
0x1449   : > { %v4082_v19 = vpop.f32.mrb[51].mxu0 }
0x144a   : > { %v5590_v20 = vpop.f32.mrb[56].mxu1 }
0x144b   : > { %v2644_v22 = vpack.c.bf16 %v5590_v20, %v5588_v58  ;;  %v4087_v23 = vpop.f32.mrb[57].mxu1 }
0x144c   : > { %v2641_v24 = vpop.f32.mrb[58].mxu1 }
0x144d   : > { %v4088_v25 = vpop.f32.mrb[59].mxu1 }
0x144e   : > { %v2694_v16 = vpop.f32.mrb[52].mxu0 }
0x144f   : > { %v4093_v28 = vpop.f32.mrb[53].mxu0  ;;  %v2750_v29 = vsel %vm2305_vm8, %v2694_v16, -inf }
0x1450   : > { %2751 = vmax.xlane.f32.xlu0 %v2750_v29  ;;  %v2697_v30 = vpop.f32.mrb[54].mxu0 }
0x1451   : > { %v4094_v31 = vpop.f32.mrb[55].mxu0 }
0x1452   : > { %v2744_v32 = vpop.f32.mrb[60].mxu1 }
0x1453   : > { %v4099_v33 = vpop.f32.mrb[61].mxu1  ;;  %v2753_v34 = vsel %vm2305_vm8, %v2744_v32, -inf }
0x1454   : > { %2754 = vmax.xlane.f32.xlu1 %v2753_v34  ;;  %v2747_v35 = vpop.f32.mrb[62].mxu1 }
0x1455   : > { %v4100_v36 = vpop.f32.mrb[63].mxu1 }
0x1465   : > { %2774 = vrot.lane.b32.xlu1 %v5499_v38, %s4750_s3 }
0x1469   : > { %2874 = vrot.lane.b32.xlu1 %v5499_v38, %s4754_s30 }
0x146d   : > { %2924 = vrot.lane.b32.xlu1 %v5497_v37, %s4754_s30 }
0x1471   : > { %2922 = vrot.lane.b32.xlu1 %v5509_v48, %s4754_s30 }
0x14dd   : > { %v2752_v39 = vpop.xlane.xlu0 %2751 }
0x14de   : > { %v2756_v40 = vsub.f32 %v2694_v16, %v2752_v39 }
0x14e0   : > { %v2758_v41 = vmul.f32 1.442695, %v2756_v40 }
0x14e1   : > { %v2755_v42 = vpop.xlane.xlu1 %2754 }
0x14e2   : > { %4356 = vpow2.f32 %v2758_v41  ;;  %v2757_v43 = vsub.f32 %v2744_v32, %v2755_v42 }
0x14e4   : > { %v2760_v44 = vmul.f32 1.442695, %v2757_v43 }
0x14e5   : > { %v2775_v46 = vpop.permute.xlu1 %2774 }
0x14e6   : > { %4358 = vpow2.f32 %v2760_v44  ;;  %4102 = vmatpush3.bf16.msra.mxu0 %v2775_v46 }
0x14e7   : > { %4113 = vmatprep.subr.bf16.mxu0 %v4743_v3 }
0x14e9   : > { %v2875_v56 = vpop.permute.xlu1 %2874 }
0x14ea   : > { %v2880_v61 = vsel %vm1058_vm3, %v2875_v56, 0 }
0x14ec   : > { %v4357_v47 = vpop.eup %4356 }
0x14ed   : > { %v2762_v49 = vsel %vm2305_vm8, %v4357_v47, 0.0  ;;  %v2925_v62 = vpop.permute.xlu1 %2924 }
0x14ee   : > { %2763 = vadd.xlane.f32.xlu0 %v2762_v49  ;;  %v2930_v63 = vsel %vm1058_vm3, %v2925_v62, 0 }
0x14f0   : > { %v4359_v50 = vpop.eup %4358 }
0x14f1   : > { %v2765_v51 = vsel %vm2305_vm8, %v4359_v50, 0.0  ;;  %v2923_v1 = vpop.permute.xlu1 %2922 }
0x14f2   : > { %2766 = vadd.xlane.f32.xlu0 %v2765_v51  ;;  %v4297_v51 = vld [vmem:[%s5243_s21 + $0x8] sm:$0xff]  }
0x1508   : > { %2820 = vrot.lane.b32.xlu0 %v5497_v37, %s4750_s3 }
0x150c   : > { %2872 = vrot.lane.b32.xlu0 %v5507_v45, %s4754_s30 }
0x157b   : > { %v2764_v48 = vpop.xlane.xlu0 %2763 }
0x157c   : > { %4360 = vrcp.f32 %v2764_v48 }
0x157f   : > { %v2767_v52 = vpop.xlane.xlu0 %2766 }
0x1580   : > { %4362 = vrcp.f32 %v2767_v52 }
0x1583   : > { %v2821_v54 = vpop.permute.xlu0 %2820 }
0x1584   : > { %4108 = vmatpush3.bf16.msra.mxu1 %v2821_v54 }
0x1585   : > { %4119 = vmatprep.subr.bf16.mxu1 %v4743_v3 }
0x1586   : > { %v4361_v55 = vpop.eup %4360 }
0x1587   : > { %v2770_v5 = vmul.f32 %v4361_v55, %v4357_v47  ;;  %v2873_v0 = vpop.permute.xlu0 %2872 }
0x1589   : > { %v2772_v59 = vpack.c.bf16 %v2770_v5, %v2770_v5 }
0x158a   : > { %v4363_v60 = vpop.eup %4362 }
0x158b   : > { %v2771_v6 = vmul.f32 %v4363_v60, %v4359_v50  ;;  %4104 = vmatmul.mubr.msk.bf16.vlgmr.msra.gmra.mrb[56].mxu0 %vm2305_vm8, %v2772_v59  ;;  %v4296_v50 = vld [vmem:[%s5243_s21] sm:$0xff]   ;;  %s5866_s21 = scalar_lea.vmem [#allocation14], %s5200_s24 }
0x158c   : > { %4114 = vmatpush3.bf16.xpose.msra.mxu0 %v2880_v61  ;;  %4115 = vmatprep.mubr.msk.bf16.mxu0 %vm4744_vm1, %v4743_v3 }
0x158d   : > { %v2773_v45 = vpack.c.bf16 %v2771_v6, %v2771_v6  ;;  %4125 = vmatprep.subr.bf16.mxu0 %v4743_v3 }
0x158f   : > { %4110 = vmatmul.mubr.msk.bf16.vlgmr.msra.gmra.mrb[64].mxu1 %vm2305_vm8, %v2773_v45  ;;  %v3798_v45 = vld [vmem:[%s5866_s21] ss:$0 sm:$0xff] }
0x1590   : > { %4120 = vmatpush3.bf16.xpose.msra.mxu1 %v2930_v63  ;;  %4121 = vmatprep.mubr.msk.bf16.mxu1 %vm4744_vm1, %v4743_v3 }
0x1591   : > { %4131 = vmatprep.subr.bf16.mxu1 %v4743_v3 }
0x1593   : > { %4116 = vmatmul.mubr.msk.bf16.vlgmr.msra.gmra.mrb[60].mxu0 %vm1058_vm3, %v2873_v0 }
0x1594   : > { %4127 = vmatprep.mubr.msk.bf16.mxu0 %vm4744_vm1, %v4743_v3 }
0x1597   : > { %4122 = vmatmul.mubr.msk.bf16.vlgmr.msra.gmra.mrb[68].mxu1 %vm1058_vm3, %v2923_v1 }
0x1598   : > { %4133 = vmatprep.mubr.msk.bf16.mxu1 %vm4744_vm1, %v4743_v3 }
0x165e   : > { %v2814_v2 = vpop.f32.mrb[56].mxu0 }
0x165f   : > { %v4105_v4 = vpop.f32.mrb[57].mxu0 }
0x1660   : > { %v2817_v7 = vpop.f32.mrb[58].mxu0 }
0x1661   : > { %v4106_v21 = vpop.f32.mrb[59].mxu0 }
0x1662   : > { %v2860_v8 = vpop.f32.mrb[64].mxu1 }
0x1663   : > { %v2866_v9 = vpack.c.bf16 %v2860_v8, %v2814_v2  ;;  %v4111_v10 = vpop.f32.mrb[65].mxu1 }
0x1664   : > { %v2863_v11 = vpop.f32.mrb[66].mxu1 }
0x1665   : > { %v4112_v12 = vpop.f32.mrb[67].mxu1 }
0x1666   : > { %v2916_v53 = vpop.f32.mrb[60].mxu0 }
0x1667   : > { %v4117_v57 = vpop.f32.mrb[61].mxu0  ;;  %v2972_v15 = vsel %vm2305_vm8, %v2916_v53, -inf }
0x1668   : > { %2973 = vmax.xlane.f32.xlu0 %v2972_v15  ;;  %v2919_v17 = vpop.f32.mrb[62].mxu0 }
0x1669   : > { %v4118_v19 = vpop.f32.mrb[63].mxu0 }
0x166a   : > { %v2966_v23 = vpop.f32.mrb[68].mxu1 }
0x166b   : > { %v4123_v24 = vpop.f32.mrb[69].mxu1  ;;  %v2975_v25 = vsel %vm2305_vm8, %v2966_v23, -inf }
0x166c   : > { %2976 = vmax.xlane.f32.xlu1 %v2975_v25  ;;  %v2969_v16 = vpop.f32.mrb[70].mxu1  ;;  %v4298_v24 = vld [vmem:[%s5215_s13] sm:$0xff]   ;;  %v4299_v25 = vld [vmem:[%s5215_s13 + $0x8] sm:$0xff]  }
0x166d   : > { %v4124_v28 = vpop.f32.mrb[71].mxu1  ;;  %v4300_v16 = vld [vmem:[%s5248_s5] sm:$0xff]  }
0x166e   : > { %v4301_v28 = vld [vmem:[%s5248_s5 + $0x8] sm:$0xff]  }
0x167d   : > { %2996 = vrot.lane.b32.xlu1 %v5499_v38, %s4753_s8 }
0x1681   : > { %2646 = vrot.lane.b32.xlu1 %v2644_v22, %s4756_s7 }
0x1685   : > { %2868 = vrot.lane.b32.xlu1 %v2866_v9, %s4757_s22 }
0x16f5   : > { %v2974_v29 = vpop.xlane.xlu0 %2973 }
0x16f6   : > { %v2978_v30 = vsub.f32 %v2916_v53, %v2974_v29 }
0x16f8   : > { %v2980_v31 = vmul.f32 1.442695, %v2978_v30 }
0x16f9   : > { %v2977_v32 = vpop.xlane.xlu1 %2976 }
0x16fa   : > { %4364 = vpow2.f32 %v2980_v31  ;;  %v2979_v33 = vsub.f32 %v2966_v23, %v2977_v32 }
0x16fc   : > { %v2982_v34 = vmul.f32 1.442695, %v2979_v33 }
0x16fd   : > { %v2997_v35 = vpop.permute.xlu1 %2996 }
0x16fe   : > { %4366 = vpow2.f32 %v2982_v34  ;;  %4126 = vmatpush3.bf16.msra.mxu0 %v2997_v35  ;;  %v3187_v35 = vsub.s32 1, %v5473_v13 }
0x16ff   : > { %4137 = vmatprep.subr.bf16.mxu0 %v4743_v3 }
0x1701   : > { %v2647_v38 = vpop.permute.xlu1 %2646 }
0x1702   : > { %2649 = vst.msk [vmem:[#allocation2] sm:$0xff] %vm1502_vm5, %v2647_v38  ;;  %v3188_v38 = vrot.slane %v5477_v14, %v3187_v35 }
0x1704   : > { %v4365_v36 = vpop.eup %4364 }
0x1705   : > { %v2869_v58 = vpop.permute.xlu1 %2868  ;;  %v2984_v20 = vsel %vm2305_vm8, %v4365_v36, 0.0 }
0x1706   : > { %2871 = vst.msk [vmem:[#allocation2] sm:$0xff] %vm1729_vm6, %v2869_v58  ;;  %2985 = vadd.xlane.f32.xlu0 %v2984_v20 }
0x1708   : > { %v4367_v22 = vpop.eup %4366 }
0x1709   : > { %v2987_v39 = vsel %vm2305_vm8, %v4367_v22, 0.0 }
0x170a   : > { %2988 = vadd.xlane.f32.xlu0 %v2987_v39 }
0x1720   : > { %3042 = vrot.lane.b32.xlu0 %v5497_v37, %s4753_s8 }
0x1793   : > { %v2986_v40 = vpop.xlane.xlu0 %2985 }
0x1794   : > { %4368 = vrcp.f32 %v2986_v40  ;;  %v3194_v40 = vrot.slane %v5485_v18, %v3187_v35 }
0x1797   : > { %v2989_v41 = vpop.xlane.xlu0 %2988 }
0x1798   : > { %4370 = vrcp.f32 %v2989_v41 }
0x179b   : > { %v3043_v42 = vpop.permute.xlu0 %3042 }
0x179c   : > { %4132 = vmatpush3.bf16.msra.mxu1 %v3043_v42 }
0x179d   : > { %4145 = vmatprep.subr.bf16.mxu1 %v4743_v3 }
0x179e   : > { %v4369_v43 = vpop.eup %4368 }
0x179f   : > { %v2992_v44 = vmul.f32 %v4369_v43, %v4365_v36 }
0x17a1   : > { %v2994_v46 = vpack.c.bf16 %v2992_v44, %v2992_v44 }
0x17a2   : > { %v4371_v47 = vpop.eup %4370 }
0x17a3   : > { %v2993_v49 = vmul.f32 %v4371_v47, %v4367_v22  ;;  %4128 = vmatmul.mubr.msk.bf16.vlgmr.msra.gmra.mrb[64].mxu0 %vm2305_vm8, %v2994_v46  ;;  %v4302_v46 = vld [vmem:[%s5248_s5 + $0x10] sm:$0xff]   ;;  %v4303_v47 = vld [vmem:[%s5248_s5 + $0x18] sm:$0xff]   ;;  %s5868_s5 = sld [smem:[#allocation45_spill]] (!%p3812_p2) }
0x17a4   : > { %4141 = vmatprep.mubr.msk.bf16.mxu0 %vm4744_vm1, %v4743_v3  ;;  %4138 = vmatpush3.bf16.msra.mxu0 %v4296_v50 }
0x17a5   : > { %v2995_v37 = vpack.c.bf16 %v2993_v49, %v2993_v49  ;;  %4139 = vmatprep.subr.bf16.mxu0 %v4743_v3  ;;  %v3802_v49 = vld [vmem:[%s818_s4] ss:$0 sm:$0xff]  ;;  %s5869_s4 = sld [smem:[#allocation46_spill]] (!%p3812_p2) }
0x17a7   : > { %4134 = vmatmul.mubr.msk.bf16.vlgmr.msra.gmra.mrb[72].mxu1 %vm2305_vm8, %v2995_v37 }
0x17a8   : > { %4149 = vmatprep.mubr.msk.bf16.mxu1 %vm4744_vm1, %v4743_v3  ;;  %4140 = vmatpush3.bf16.msra.mxu0 %v4297_v51 }
0x17a9   : > { %4153 = vmatprep.subr.bf16.mxu0 %v4743_v3  ;;  %4146 = vmatpush3.bf16.msra.mxu1 %v4298_v24  ;;  %v3382_v24 = vsub.s32 2, %v5473_v13 }
0x17aa   : > { %4147 = vmatprep.subr.bf16.mxu1 %v4743_v3 }
0x17ad   : > { %4148 = vmatpush3.bf16.msra.mxu1 %v4299_v25  ;;  %v3383_v25 = vrot.slane %v5477_v14, %v3382_v24 }
0x1876   : > { %v3036_v48 = vpop.f32.mrb[64].mxu0 }
0x1877   : > { %v4129_v52 = vpop.f32.mrb[65].mxu0 }
0x1878   : > { %v3039_v54 = vpop.f32.mrb[66].mxu0 }
0x1879   : > { %v4130_v55 = vpop.f32.mrb[67].mxu0 }
0x187a   : > { %v3082_v56 = vpop.f32.mrb[72].mxu1 }
0x187b   : > { %v3088_v5 = vpack.c.bf16 %v3082_v56, %v3036_v48  ;;  %v4135_v59 = vpop.f32.mrb[73].mxu1 }
0x187c   : > { %v3085_v60 = vpop.f32.mrb[74].mxu1 }
0x187d   : > { %v4136_v61 = vpop.f32.mrb[75].mxu1  ;;  %3090 = vrot.lane.b32.xlu0 %v3088_v5, %s4758_s0 }
0x18ef   : > { %v3091_v6 = vpop.permute.xlu0 %3090 }
0x18f0   : > { %3093 = vst.msk [vmem:[#allocation2] sm:$0xff] %vm1956_vm7, %v3091_v6 }
0x18f7   : > { %v3094_v62 = vld [vmem:[#allocation2] sm:$0xff] }
0x18f8   : > { %4142 = vmatmul.mubr.msk.bf16.vlgmr.msra.gmra.mrb[68].mxu0 %vm1003_vm2, %v3094_v62 }
0x18f9   : > { %4161 = vmatprep.mubr.msk.bf16.mxu0 %vm4744_vm1, %v4743_v3  ;;  %4154 = vmatpush3.bf16.msra.mxu0 %v4300_v16 }
0x18fa   : > { %4155 = vmatprep.subr.bf16.mxu0 %v4743_v3 }
0x18fd   : > { %4156 = vmatpush3.bf16.msra.mxu0 %v4301_v28  ;;  %v3389_v28 = vrot.slane %v5485_v18, %v3382_v24 }
0x18fe   : > { %4157 = vmatprep.subr.bf16.mxu0 %v4743_v3 }
0x1901   : > { %4158 = vmatpush3.bf16.msra.mxu0 %v4302_v46 }
0x1902   : > { %4159 = vmatprep.subr.bf16.mxu0 %v4743_v3  ;;  %v3806_v3 = vld [vmem:[%s951_s27] ss:$0 sm:$0xff] }
0x1905   : > { %4160 = vmatpush3.bf16.msra.mxu0 %v4303_v47 }
0x19cb   : > { %v3150_v63 = vpop.f32.mrb[68].mxu0 }
0x19cc   : > { %v3151_v0 = vadd.f32 %v3798_v45, %v3150_v63  ;;  %v4143_v1 = vpop.f32.mrb[69].mxu0 }
0x19cd   : > { %v3153_v2 = vpop.f32.mrb[70].mxu0 }
0x19ce   : > { %v3154_v4 = vadd.f32 %v3798_v45, %v3153_v2  ;;  %v4144_v7 = vpop.f32.mrb[71].mxu0  ;;  %v3157_v21 = vadd.f32 %v3151_v0, %v5488_v26 }
0x19d0   : > { %v3159_v8 = vsel %vm1003_vm2, %v3157_v21, 0.0  ;;  %v3158_v9 = vadd.f32 %v3154_v4, %v5490_v27 }
0x19d1   : > { %3160 = vadd.xlane.f32.xlu1 %v3159_v8 }
0x19d2   : > { %v3162_v10 = vsel %vm1003_vm2, %v3158_v9, 0.0 }
0x19d3   : > { %3163 = vadd.xlane.f32.xlu0 %v3162_v10 }
0x1a5e   : > { %v3161_v11 = vpop.xlane.xlu1 %3160 }
0x1a5f   : > { %v3165_v12 = vmul.f32 0.03125, %v3161_v11 }
0x1a60   : > { %v3164_v53 = vpop.xlane.xlu0 %3163 }
0x1a61   : > { %v3167_v57 = vsub.f32 %v3157_v21, %v3165_v12  ;;  %v3166_v15 = vmul.f32 0.03125, %v3164_v53 }
0x1a63   : > { %v3168_v17 = vsub.f32 %v3158_v9, %v3166_v15  ;;  %v3169_v19 = vmul.f32 %v3167_v57, %v3167_v57 }
0x1a65   : > { %v3171_v26 = vsel %vm1003_vm2, %v3169_v19, 0.0  ;;  %v3170_v23 = vmul.f32 %v3168_v17, %v3168_v17 }
0x1a66   : > { %3172 = vadd.xlane.f32.xlu0 %v3171_v26 }
0x1a67   : > { %v3174_v27 = vsel %vm1003_vm2, %v3170_v23, 0.0 }
0x1a68   : > { %3175 = vadd.xlane.f32.xlu1 %v3174_v27 }
0x1af3   : > { %v3173_v29 = vpop.xlane.xlu0 %3172 }
0x1af4   : > { %v3177_v30 = vmul.f32 0.03125, %v3173_v29 }
0x1af5   : > { %v3176_v31 = vpop.xlane.xlu1 %3175 }
0x1af6   : > { %v3179_v32 = vadd.f32 1e-05, %v3177_v30  ;;  %v3178_v33 = vmul.f32 0.03125, %v3176_v31 }
0x1af8   : > { %4372 = vrsqrt.f32 %v3179_v32  ;;  %v3180_v34 = vadd.f32 1e-05, %v3178_v33 }
0x1afa   : > { %4374 = vrsqrt.f32 %v3180_v34 }
0x1b02   : > { %v4373_v36 = vpop.eup %4372 }
0x1b03   : > { %v3183_v58 = vmul.f32 %v4373_v36, %v3167_v57 }
0x1b04   : > { %v4375_v20 = vpop.eup %4374 }
0x1b05   : > { %v3189_v22 = vmul.f32 %v3188_v38, %v3183_v58  ;;  %v3184_v39 = vmul.f32 %v4375_v20, %v3168_v17 }
0x1b07   : > { %v3190_v41 = vmul.f32 %v3188_v38, %v3184_v39  ;;  %v3195_v42 = vadd.f32 %v3194_v40, %v3189_v22 }
0x1b09   : > { %v3196_v43 = vadd.f32 %v3194_v40, %v3190_v41 }
0x1b0b   : > { %v3201_v44 = vpack.c.bf16 %v3196_v43, %v3195_v42 }
0x1b0d   : > { %4150 = vmatmul.mubr.msk.bf16.vlgmr.msra.gmra.mrb[76].mxu1 %vm1003_vm2, %v3201_v44 }
0x1be0   : > { %v3258_v37 = vpop.f32.mrb[76].mxu1 }
0x1be1   : > { %v3259_v50 = vadd.f32 %v3802_v49, %v3258_v37  ;;  %v4151_v51 = vpop.f32.mrb[77].mxu1 }
0x1be2   : > { %v3261_v48 = vpop.f32.mrb[78].mxu1  ;;  %v3813_v51 = vld [vmem:[%s5868_s5] ss:$0 sm:$0xff] (!%p3812_p2) }
0x1be3   : > { %v3262_v52 = vadd.f32 %v3802_v49, %v3261_v48  ;;  %v4152_v54 = vpop.f32.mrb[79].mxu1  ;;  %v3265_v55 = vmax.f32 %v3259_v50, 0.0 }
0x1be5   : > { %v3266_v56 = vmax.f32 %v3262_v52, 0.0  ;;  %v3814_v52 = vld [vmem:[%s5869_s4] ss:$0 sm:$0xff] (!%p3812_p2) }
0x1be7   : > { %v3275_v5 = vpack.c.bf16 %v3266_v56, %v3265_v55 }
0x1be9   : > { %4162 = vmatmul.mubr.msk.bf16.vlgmr.msra.gmra.mrb[72].mxu0 %vm3307_vm9, %v3275_v5 }
0x1cbc   : > { %v3345_v59 = vpop.f32.mrb[72].mxu0 }
0x1cbd   : > { %v3346_v60 = vadd.f32 %v3806_v3, %v3345_v59  ;;  %v4163_v61 = vpop.f32.mrb[73].mxu0 }
0x1cbe   : > { %v3348_v6 = vpop.f32.mrb[74].mxu0 }
0x1cbf   : > { %v3349_v62 = vadd.f32 %v3806_v3, %v3348_v6  ;;  %v4164_v45 = vpop.f32.mrb[75].mxu0  ;;  %v3352_v63 = vadd.f32 %v3346_v60, %v3195_v42 }
0x1cc1   : > { %v3353_v0 = vadd.f32 %v3349_v62, %v3196_v43  ;;  %v3354_v1 = vsel %vm1003_vm2, %v3352_v63, 0.0 }
0x1cc2   : > { %3355 = vadd.xlane.f32.xlu0 %v3354_v1 }
0x1cc3   : > { %v3357_v2 = vsel %vm1003_vm2, %v3353_v0, 0.0 }
0x1cc4   : > { %3358 = vadd.xlane.f32.xlu1 %v3357_v2 }
0x1d4f   : > { %v3356_v4 = vpop.xlane.xlu0 %3355 }
0x1d50   : > { %v3360_v7 = vmul.f32 0.03125, %v3356_v4 }
0x1d51   : > { %v3359_v21 = vpop.xlane.xlu1 %3358 }
0x1d52   : > { %v3362_v8 = vsub.f32 %v3352_v63, %v3360_v7  ;;  %v3361_v9 = vmul.f32 0.03125, %v3359_v21 }
0x1d54   : > { %v3363_v10 = vsub.f32 %v3353_v0, %v3361_v9  ;;  %v3364_v11 = vmul.f32 %v3362_v8, %v3362_v8 }
0x1d56   : > { %v3366_v12 = vsel %vm1003_vm2, %v3364_v11, 0.0  ;;  %v3365_v53 = vmul.f32 %v3363_v10, %v3363_v10 }
0x1d57   : > { %3367 = vadd.xlane.f32.xlu0 %v3366_v12 }
0x1d58   : > { %v3369_v57 = vsel %vm1003_vm2, %v3365_v53, 0.0 }
0x1d59   : > { %3370 = vadd.xlane.f32.xlu1 %v3369_v57 }
0x1de4   : > { %v3368_v15 = vpop.xlane.xlu0 %3367 }
0x1de5   : > { %v3372_v17 = vmul.f32 0.03125, %v3368_v15 }
0x1de6   : > { %v3371_v19 = vpop.xlane.xlu1 %3370 }
0x1de7   : > { %v3374_v26 = vadd.f32 1e-05, %v3372_v17  ;;  %v3373_v23 = vmul.f32 0.03125, %v3371_v19 }
0x1de9   : > { %4376 = vrsqrt.f32 %v3374_v26  ;;  %v3375_v27 = vadd.f32 1e-05, %v3373_v23 }
0x1deb   : > { %4378 = vrsqrt.f32 %v3375_v27 }
0x1df3   : > { %v4377_v16 = vpop.eup %4376 }
0x1df4   : > { %v3378_v29 = vmul.f32 %v4377_v16, %v3362_v8 }
0x1df5   : > { %v4379_v30 = vpop.eup %4378 }
0x1df6   : > { %v3384_v31 = vmul.f32 %v3383_v25, %v3378_v29  ;;  %v3379_v32 = vmul.f32 %v4379_v30, %v3363_v10  ;;  %3397 = sbr.rel (%p3812_p2) target bundleno = 7992 (0x1f38), region = 140 }
0x1df8   : > { %v3390_v33 = vadd.f32 %v3389_v28, %v3384_v31  ;;  %v3385_v34 = vmul.f32 %v3383_v25, %v3379_v32 }
0x1dfa   : > { %3392 = vst.msk [vmem:[#allocation18] sm:$0xff] %vm1003_vm2, %v3390_v33  ;;  %v3391_v35 = vadd.f32 %v3389_v28, %v3385_v34  ;;  %v3400_v13 = vsel (!%p3812_p2), %vm1003_vm2, %v3390_v33, 0.0 }
0x1dfb   : > { %3401 = vadd.xlane.f32.xlu0 (!%p3812_p2), %v3400_v13 }
0x1dfc   : > { %3393 = vst.msk [vmem:[#allocation18 + $0x8] sm:$0xff] %vm1003_vm2, %v3391_v35  ;;  %v3403_v14 = vsel (!%p3812_p2), %vm1003_vm2, %v3391_v35, 0.0 }
0x1dff   : > { %3404 = vadd.xlane.f32.xlu0 %v3403_v14 }
0x1e88   : > { %v3402_v18 = vpop.xlane.xlu0 %3401 }
0x1e89   : > { %v3406_v38 = vmul.f32 0.03125, %v3402_v18 }
0x1e8b   : > { %v3408_v36 = vsub.f32 %v3390_v33, %v3406_v38 }
0x1e8c   : > { %v3405_v58 = vpop.xlane.xlu0 %3404 }
0x1e8d   : > { %v3407_v20 = vmul.f32 0.03125, %v3405_v58  ;;  %v3410_v22 = vmul.f32 %v3408_v36, %v3408_v36 }
0x1e8f   : > { %v3409_v39 = vsub.f32 %v3391_v35, %v3407_v20  ;;  %v3412_v40 = vsel %vm1003_vm2, %v3410_v22, 0.0 }
0x1e90   : > { %3413 = vadd.xlane.f32.xlu1 %v3412_v40 }
0x1e91   : > { %v3411_v41 = vmul.f32 %v3409_v39, %v3409_v39 }
0x1e93   : > { %v3415_v42 = vsel %vm1003_vm2, %v3411_v41, 0.0 }
0x1e94   : > { %3416 = vadd.xlane.f32.xlu1 %v3415_v42 }
0x1f1d   : > { %v3414_v43 = vpop.xlane.xlu1 %3413 }
0x1f1e   : > { %v3418_v44 = vmul.f32 0.03125, %v3414_v43 }
0x1f20   : > { %v3420_v46 = vadd.f32 1e-05, %v3418_v44 }
0x1f21   : > { %v3417_v47 = vpop.xlane.xlu1 %3416 }
0x1f22   : > { %4380 = vrsqrt.f32 %v3420_v46  ;;  %v3419_v49 = vmul.f32 0.03125, %v3417_v47 }
0x1f24   : > { %v3421_v37 = vadd.f32 1e-05, %v3419_v49 }
0x1f26   : > { %4382 = vrsqrt.f32 %v3421_v37 }
0x1f2c   : > { %v4381_v50 = vpop.eup %4380 }
0x1f2d   : > { %v3424_v48 = vmul.f32 %v4381_v50, %v3408_v36 }
0x1f2f   : > { %v3432_v54 = vmul.f32 %v3813_v51, %v3424_v48 }
0x1f30   : > { %v4383_v55 = vpop.eup %4382 }
0x1f31   : > { %v3440_v56 = vadd.f32 %v3814_v52, %v3432_v54  ;;  %v3425_v5 = vmul.f32 %v4383_v55, %v3409_v39 }
0x1f33   : > { %3442 = vst.msk [vmem:[#allocation18] sm:$0xff] %vm1003_vm2, %v3440_v56  ;;  %v3433_v3 = vmul.f32 %v3813_v51, %v3425_v5 }
0x1f35   : > { %v3441_v59 = vadd.f32 %v3814_v52, %v3433_v3 }
0x1f37   : > { %3443 = vst.msk [vmem:[#allocation18 + $0x8] sm:$0xff] %vm1003_vm2, %v3441_v59 }
0x1f38 PF: > { %p4229_p0 = scmp.eq.s32.totalorder %s4880_s1, 1  ;;  %s4759_s6 = smov [#allocation18]  }
0x1f39   : > { %s3450_s9 = sshll.u32 %s4759_s6, 4  ;;  %s3451_s9 = int_to_ptr.vmem [resolvable:$true] %s3450_s9 }
0x1f3a   : > { %s4648_s29 = scalar_lea.vmem %s3451_s9, 256  ;;  %p4655_p13 = scmp.lt.s32.totalorder %s3451_s9, %s3451_s9 }
0x1f3b   : > { %p4649_p12 = scmp.ne.s32.totalorder %s3451_s9, %s4648_s29  ;;  %p4656_p11 = scmp.lt.s32.totalorder %s4648_s29, %s4648_s29 }
0x1f3d   : > { %p4650_p4 = pnand %p4649_p12, %p4229_p0  ;;  %p4657_p8 = por %p4656_p11, %p4655_p13 }
0x1f3f   : > { %p4651_p7 = pneg %p4650_p4 }
0x1f41   : > { %p4658_p5 = pnand %p4657_p8, %p4651_p7 }
0x1f43   : > { %4661 = shalt.err (!%p4658_p5)
}
0x1f44   : > { %s5870_s25 = sld [smem:[#allocation47_spill]] }
0x1f4a   : > { %s4662_s3 = scalar_lea.hbm %s5870_s25, 256 }
0x1f4b   : > { %p4663_p10 = scmp.ne.s32.totalorder %s5870_s25, %s4662_s3  ;;  %p4668_p9 = scmp.lt.u32.totalorder %s4662_s3, %s5870_s25 }
0x1f4d   : > { %p4664_p6 = pnand %p4663_p10, %p4229_p0 }
0x1f4f   : > { %p4665_p1 = pneg %p4664_p6 }
0x1f51   : > { %p4670_p3 = pnand %p4668_p9, %p4665_p1 }
0x1f53   : > { %4673 = shalt.err (!%p4670_p3)
}
0x1f54   : > { %s4760_s2 = smov 128  }
0x1f55   : > { %4190 = dma.vmem_to_hbm [thread:$0]  (%p4229_p0), %s3451_s9, 256, %s5870_s25, [#allocation5], %s4760_s2, %s4760_s2, %s4756_s7  }
0x1f56   : > { %4711 = dma.done.wait (%p4229_p0), [#allocation5], 256  }
0x1f57   : > { %4713 = vsyncadd (%p4229_p0), [#allocation5], 4294967040 }
0x1f58 PF: > { %s5871_s21 = sld [smem:[#allocation27_spill]]  ;;  %s5872_s0 = sld [smem:[#allocation25_spill]] }
0x1f59   : > { %s5873_s30 = sld [smem:[#allocation26_spill]]  ;;  %s5874_s20 = sld [smem:[#allocation28_spill]] }
0x1f5e   : > { %p38_p2 = scmp.ge.s32.totalorder %s5871_s21, 4  }
0x1f60   :  { %40 = sbr.rel (!%p38_p2) target bundleno = 29 (0x1d), region = 237 }
0x1f67   :  { %3466 = vsyncpa [#allocation4], 1 }
0x1f68   :  { %3468 = vsyncpa [#allocation4 + $0x1], 1 }
0x1f69   :  { %3469 = vsyncpa [#allocation7], 1 }
0x1f6a   :  { %3470 = vsyncpa [#allocation10], 1 }
0x1f6b   :  { %3472 = vsyncpa [#allocation10 + $0x1], 1 }
0x1f6c   :  { %3473 = vsyncpa [#allocation13], 1 }
0x1f6d   :  { %3475 = vsyncpa [#allocation13 + $0x1], 1 }
0x1f6e   :  { %3476 = vsyncpa [#allocation16], 1 }
0x1f6f   :  { %3478 = vsyncpa [#allocation16 + $0x1], 1 }
0x1f70   :  { %3479 = vsyncpa [#allocation5], 1 }
0x1f71   :  { %3481 = vsyncpa [#allocation5 + $0x1], 1 }

</bundles_post_ra>
